<compile_context>
chip_gen: v6e
topology: v6e:2x2x1
jax: 0.10.0
libtpu: 0.0.40
codegen_flags: <defaults>
</compile_context>

<pallas_src>
import functools

import jax
import jax.numpy as jnp
from jax import lax
from jax.experimental import pallas as pl
from jax.experimental.pallas import tpu as pltpu


def basic_block_kernel(xp_ref, wb1_ref, s1_ref, b1_ref, wb2_ref, s2_ref,
                       b2_ref, o_ref, y1p_ref):
    """Fused conv3x3+BN+ReLU -> conv3x3+BN -> residual add -> ReLU.

    xp_ref : (nb, H+2, W*C) bf16   H-padded, lane-dense activations
    wb*_ref: (3, W*C, W*C)  bf16   banded weights, one matrix per vertical tap
    s*/b*  : (1, W*C)       f32    folded BatchNorm scale / bias
    o_ref  : (nb, H, W*C)   f32    output block
    y1p_ref: (nb, H+2, W*C) bf16   VMEM scratch (H-padded conv1 output)
    """
    nb, Hp, WC = xp_ref.shape
    H = Hp - 2
    M = nb * H

    def conv3x3(src_ref, wb_ref):
        # One (M, WC) x (WC, WC) MXU matmul per vertical tap dy; each tap's
        # input rows are a static sublane slice of the H-padded slab, so the
        # H-direction zero padding comes for free (no masks, no shift matmuls).
        acc = jnp.dot(src_ref[:, 0:H, :].reshape(M, WC), wb_ref[0],
                      preferred_element_type=jnp.float32)
        acc = acc + jnp.dot(src_ref[:, 1:H + 1, :].reshape(M, WC), wb_ref[1],
                            preferred_element_type=jnp.float32)
        acc = acc + jnp.dot(src_ref[:, 2:H + 2, :].reshape(M, WC), wb_ref[2],
                            preferred_element_type=jnp.float32)
        return acc

    # conv1 -> BN1 -> ReLU (f32 epilogue).
    y1 = jnp.maximum(conv3x3(xp_ref, wb1_ref) * s1_ref[...] + b1_ref[...], 0.0)

    # Stage into the H-padded bf16 scratch.  Padding rows are zeroed every
    # step (scratch is per-core and persistent, so do NOT gate on program_id).
    y1p_ref[:, 0:1, :] = jnp.zeros((nb, 1, WC), y1p_ref.dtype)
    y1p_ref[:, Hp - 1:Hp, :] = jnp.zeros((nb, 1, WC), y1p_ref.dtype)
    y1p_ref[:, 1:Hp - 1, :] = y1.astype(y1p_ref.dtype).reshape(nb, H, WC)

    # conv2 -> BN2.
    y2 = conv3x3(y1p_ref, wb2_ref) * s2_ref[...] + b2_ref[...]

    # Identity skip + final ReLU, f32.
    xres = xp_ref[:, 1:Hp - 1, :].reshape(M, WC).astype(jnp.float32)
    out = jnp.maximum(y2 + xres, 0.0)
    o_ref[...] = out.reshape(nb, H, WC).astype(o_ref.dtype)


def _fold_bn(gamma, beta, mean, var, eps=1e-5):
    scale = gamma / jnp.sqrt(var + eps)
    bias = beta - mean * scale
    return scale, bias


def _banded_weights(w_hwio, W):
    """(3, 3, C, C) HWIO -> (3, W*C, W*C) bf16 banded matrices.

    For vertical tap dy, block (w_in, w_out) equals w[dy, dx] iff
    w_in == w_out + dx - 1 (else zero), so `row @ mat` performs the horizontal
    convolution with the W-direction zero padding built in.
    # TODO(synk): at large W*C (>= ~3584) tile the 3-block band via an extra
    # grid axis instead of storing the dense (W*C, W*C) matrix (v7x VMEM)."""
    C = w_hwio.shape[-1]
    mats = []
    for dy in range(3):
        wb = jnp.zeros((W * C, W * C), jnp.float32)
        for dx in range(3):
            band = jnp.eye(W, k=1 - dx, dtype=jnp.float32)  # rows=w_in, cols=w_out
            wb = wb + jnp.kron(band, w_hwio[dy, dx].astype(jnp.float32))
        mats.append(wb)
    return jnp.stack(mats).astype(jnp.bfloat16)


def _pick_block_n(N, H):
    """Largest divisor of N with M = block_n*H <= 256 (fills the 256x256 MXU,
    bounds VMEM) while keeping >= 2 grid steps so v7x megacore stays busy."""
    best = 1
    for d in range(1, N + 1):
        if N % d:
            continue
        if d * H > 256:
            continue
        if N >= 2 and N // d < 2:
            continue
        best = d
    return best


def _basic_block_lanedense(xp, wb1, s1t, b1t, wb2, s2t, b2t, block_n):
    """Core call on the lane-dense, H-padded layout.

    xp: (N, H+2, W*C) bf16 -> (N, H, W*C) f32.  A multi-block network should
    keep activations in this layout between blocks to avoid per-block
    NCHW <-> lane-dense transposes in HBM."""
    N, Hp, WC = xp.shape
    H = Hp - 2
    return pl.pallas_call(
        basic_block_kernel,
        out_shape=jax.ShapeDtypeStruct((N, H, WC), jnp.float32),
        grid_spec=pltpu.PrefetchScalarGridSpec(
            num_scalar_prefetch=0,
            grid=(N // block_n,),
            in_specs=[
                pl.BlockSpec((block_n, Hp, WC), lambda n: (n, 0, 0)),
                # Constant operands (weights / BN params): index_map never
                # changes, so they are fetched once and stay VMEM-resident.
                pl.BlockSpec((3, WC, WC), lambda n: (0, 0, 0)),
                pl.BlockSpec((1, WC), lambda n: (0, 0)),
                pl.BlockSpec((1, WC), lambda n: (0, 0)),
                pl.BlockSpec((3, WC, WC), lambda n: (0, 0, 0)),
                pl.BlockSpec((1, WC), lambda n: (0, 0)),
                pl.BlockSpec((1, WC), lambda n: (0, 0)),
            ],
            out_specs=pl.BlockSpec((block_n, H, WC), lambda n: (n, 0, 0)),
            scratch_shapes=[pltpu.VMEM((block_n, Hp, WC), jnp.bfloat16)],
        ),
        compiler_params=pltpu.CompilerParams(
            dimension_semantics=("parallel",),   # batch axis -> both v7x TCs
            vmem_limit_bytes=32 * 1024 * 1024,
        ),
    )(xp, wb1, s1t, b1t, wb2, s2t, b2t)


@functools.partial(jax.jit, static_argnames=("block_n",))
def basic_block(x, w1, g1, be1, m1, v1, w2, g2, be2, m2, v2, *, block_n=None):
    """BasicBlock forward (inference). x: NCHW f32, w: OIHW, BN running stats."""
    N, C, H, W = x.shape
    WC = W * C
    assert H % 8 == 0 and WC % 128 == 0, "sublane/lane alignment"
    if block_n is None:
        block_n = _pick_block_n(N, H)
    assert N % block_n == 0

    # Lane-dense (channels-minor) layout, bf16 DMA, one zero row of H padding
    # top and bottom (the conv's H-direction zero padding, materialized once).
    x_whc = jnp.transpose(x, (0, 2, 3, 1)).reshape(N, H, WC)
    xp = jnp.pad(x_whc.astype(jnp.bfloat16), ((0, 0), (1, 1), (0, 0)))

    wb1 = _banded_weights(jnp.transpose(w1, (2, 3, 1, 0)), W)   # OIHW -> HWIO
    wb2 = _banded_weights(jnp.transpose(w2, (2, 3, 1, 0)), W)

    s1, b1 = _fold_bn(g1, be1, m1, v1)
    s2, b2 = _fold_bn(g2, be2, m2, v2)
    s1t = jnp.tile(s1, W).reshape(1, WC).astype(jnp.float32)
    b1t = jnp.tile(b1, W).reshape(1, WC).astype(jnp.float32)
    s2t = jnp.tile(s2, W).reshape(1, WC).astype(jnp.float32)
    b2t = jnp.tile(b2, W).reshape(1, WC).astype(jnp.float32)

    out = _basic_block_lanedense(xp, wb1, s1t, b1t, wb2, s2t, b2t, block_n)
    return jnp.transpose(out.reshape(N, H, W, C), (0, 3, 1, 2))


def reference(x, w1, bn1, w2, bn2):
    s1, b1 = _fold_bn(*bn1)
    s2, b2 = _fold_bn(*bn2)
    dn = ('NCHW', 'OIHW', 'NCHW')
    y = lax.conv_general_dilated(x, w1, (1, 1), 'SAME', dimension_numbers=dn)
    y = jnp.maximum(y * s1[None, :, None, None] + b1[None, :, None, None], 0.0)
    z = lax.conv_general_dilated(y, w2, (1, 1), 'SAME', dimension_numbers=dn)
    z = z * s2[None, :, None, None] + b2[None, :, None, None]
    return jnp.maximum(z + x, 0.0)


if __name__ == "__main__":
    # BasicBlock-consistent shapes: stride=1, in_ch == out_ch -> Identity skip.
    N, C, H, W = 2, 32, 16, 16
    key = jax.random.PRNGKey(0)
    ks = jax.random.split(key, 11)

    x = jax.random.normal(ks[0], (N, C, H, W), jnp.float32)

    # conv1 weights (OIHW, no bias) + BN1 running stats (eval mode, folded)
    w1 = jax.random.normal(ks[1], (C, C, 3, 3), jnp.float32) * 0.1
    g1 = 1.0 + 0.1 * jax.random.normal(ks[2], (C,), jnp.float32)
    be1 = 0.1 * jax.random.normal(ks[3], (C,), jnp.float32)
    m1 = 0.1 * jax.random.normal(ks[4], (C,), jnp.float32)
    v1 = jax.random.uniform(ks[5], (C,), jnp.float32, 0.5, 1.5)

    # conv2 weights + BN2 running stats
    w2 = jax.random.normal(ks[6], (C, C, 3, 3), jnp.float32) * 0.1
    g2 = 1.0 + 0.1 * jax.random.normal(ks[7], (C,), jnp.float32)
    be2 = 0.1 * jax.random.normal(ks[8], (C,), jnp.float32)
    m2 = 0.1 * jax.random.normal(ks[9], (C,), jnp.float32)
    v2 = jax.random.uniform(ks[10], (C,), jnp.float32, 0.5, 1.5)

    out = basic_block(x, w1, g1, be1, m1, v1, w2, g2, be2, m2, v2)
    out = jax.block_until_ready(out)

    ref = reference(x, w1, (g1, be1, m1, v1), w2, (g2, be2, m2, v2))
    assert out.shape == x.shape
    max_abs = float(jnp.max(jnp.abs(out - ref)))
    rel_l2 = float(jnp.linalg.norm(out - ref) / jnp.linalg.norm(ref))
    # bf16 matmul inputs / bf16 activation DMA with f32 accumulation;
    # BN, residual add and ReLU in f32.
    assert rel_l2 < 2e-2 and max_abs < 1.5e-1, (rel_l2, max_abs)

    print("KERNEL_OK")
</pallas_src>

<mosaic_0001>
module attributes {stable_mosaic.version = 11 : i64} {
  func.func @basic_block_kernel(%arg0: i32, %arg1: memref<1x18x512xbf16, #tpu.memory_space<vmem>>, %arg2: memref<3x512x512xbf16, #tpu.memory_space<vmem>>, %arg3: memref<1x512xf32, #tpu.memory_space<vmem>>, %arg4: memref<1x512xf32, #tpu.memory_space<vmem>>, %arg5: memref<3x512x512xbf16, #tpu.memory_space<vmem>>, %arg6: memref<1x512xf32, #tpu.memory_space<vmem>>, %arg7: memref<1x512xf32, #tpu.memory_space<vmem>>, %arg8: memref<1x16x512xf32, #tpu.memory_space<vmem>>, %arg9: memref<1x18x512xbf16, #tpu.memory_space<vmem>>) attributes {dimension_semantics = [#tpu.dimension_semantics<parallel>], iteration_bounds = array<i64: 2>, scalar_prefetch = 0 : i64, scratch_operands = 1 : i64, tpu.core_type = #tpu.core_type<tc>, window_params = [{transform_indices = @transform_0, window_bounds = array<i64: 1, 18, 512>}, {pipeline_mode = #tpu.pipeline_mode<synchronous>, transform_indices = @transform_1, window_bounds = array<i64: 3, 512, 512>}, {pipeline_mode = #tpu.pipeline_mode<synchronous>, transform_indices = @transform_2, window_bounds = array<i64: 1, 512>}, {pipeline_mode = #tpu.pipeline_mode<synchronous>, transform_indices = @transform_3, window_bounds = array<i64: 1, 512>}, {pipeline_mode = #tpu.pipeline_mode<synchronous>, transform_indices = @transform_4, window_bounds = array<i64: 3, 512, 512>}, {pipeline_mode = #tpu.pipeline_mode<synchronous>, transform_indices = @transform_5, window_bounds = array<i64: 1, 512>}, {pipeline_mode = #tpu.pipeline_mode<synchronous>, transform_indices = @transform_6, window_bounds = array<i64: 1, 512>}, {transform_indices = @transform_7, window_bounds = array<i64: 1, 16, 512>}]} {
    %c0 = arith.constant 0 : index
    %c0_0 = arith.constant 0 : index
    %c0_1 = arith.constant 0 : index
    %0 = vector.load %arg1[%c0, %c0_0, %c0_1] : memref<1x18x512xbf16, #tpu.memory_space<vmem>>, vector<1x16x512xbf16>
    %1 = vector.shape_cast %0 : vector<1x16x512xbf16> to vector<16x512xbf16>
    %c0_2 = arith.constant 0 : index
    %c0_3 = arith.constant 0 : index
    %c0_4 = arith.constant 0 : index
    %2 = vector.load %arg2[%c0_2, %c0_3, %c0_4] : memref<3x512x512xbf16, #tpu.memory_space<vmem>>, vector<1x512x512xbf16>
    %3 = vector.shape_cast %2 : vector<1x512x512xbf16> to vector<512x512xbf16>
    %cst = arith.constant dense<0.000000e+00> : vector<16x512xf32>
    %4 = tpu.matmul %1, %3, %cst {dimension_numbers = #tpu.dot_dimension_numbers<[1], [0], [0], [1], [0, 0, 1, 1], [], []>} : vector<16x512xbf16>, vector<512x512xbf16>, vector<16x512xf32> -> vector<16x512xf32>
    %c0_5 = arith.constant 0 : index
    %c1 = arith.constant 1 : index
    %c0_6 = arith.constant 0 : index
    %5 = vector.load %arg1[%c0_5, %c1, %c0_6] : memref<1x18x512xbf16, #tpu.memory_space<vmem>>, vector<1x16x512xbf16>
    %6 = vector.shape_cast %5 : vector<1x16x512xbf16> to vector<16x512xbf16>
    %c1_7 = arith.constant 1 : index
    %c0_8 = arith.constant 0 : index
    %c0_9 = arith.constant 0 : index
    %7 = vector.load %arg2[%c1_7, %c0_8, %c0_9] : memref<3x512x512xbf16, #tpu.memory_space<vmem>>, vector<1x512x512xbf16>
    %8 = vector.shape_cast %7 : vector<1x512x512xbf16> to vector<512x512xbf16>
    %cst_10 = arith.constant dense<0.000000e+00> : vector<16x512xf32>
    %9 = tpu.matmul %6, %8, %cst_10 {dimension_numbers = #tpu.dot_dimension_numbers<[1], [0], [0], [1], [0, 0, 1, 1], [], []>} : vector<16x512xbf16>, vector<512x512xbf16>, vector<16x512xf32> -> vector<16x512xf32>
    %10 = arith.addf %4, %9 : vector<16x512xf32>
    %c0_11 = arith.constant 0 : index
    %c2 = arith.constant 2 : index
    %c0_12 = arith.constant 0 : index
    %11 = vector.load %arg1[%c0_11, %c2, %c0_12] : memref<1x18x512xbf16, #tpu.memory_space<vmem>>, vector<1x16x512xbf16>
    %12 = vector.shape_cast %11 : vector<1x16x512xbf16> to vector<16x512xbf16>
    %c2_13 = arith.constant 2 : index
    %c0_14 = arith.constant 0 : index
    %c0_15 = arith.constant 0 : index
    %13 = vector.load %arg2[%c2_13, %c0_14, %c0_15] : memref<3x512x512xbf16, #tpu.memory_space<vmem>>, vector<1x512x512xbf16>
    %14 = vector.shape_cast %13 : vector<1x512x512xbf16> to vector<512x512xbf16>
    %cst_16 = arith.constant dense<0.000000e+00> : vector<16x512xf32>
    %15 = tpu.matmul %12, %14, %cst_16 {dimension_numbers = #tpu.dot_dimension_numbers<[1], [0], [0], [1], [0, 0, 1, 1], [], []>} : vector<16x512xbf16>, vector<512x512xbf16>, vector<16x512xf32> -> vector<16x512xf32>
    %16 = arith.addf %10, %15 : vector<16x512xf32>
    %c0_17 = arith.constant 0 : index
    %c0_18 = arith.constant 0 : index
    %17 = vector.load %arg3[%c0_17, %c0_18] : memref<1x512xf32, #tpu.memory_space<vmem>>, vector<1x512xf32>
    %18 = vector.broadcast %17 : vector<1x512xf32> to vector<16x512xf32>
    %19 = arith.mulf %16, %18 : vector<16x512xf32>
    %c0_19 = arith.constant 0 : index
    %c0_20 = arith.constant 0 : index
    %20 = vector.load %arg4[%c0_19, %c0_20] : memref<1x512xf32, #tpu.memory_space<vmem>>, vector<1x512xf32>
    %21 = vector.broadcast %20 : vector<1x512xf32> to vector<16x512xf32>
    %22 = arith.addf %19, %21 : vector<16x512xf32>
    %cst_21 = arith.constant 0.000000e+00 : f32
    %23 = vector.broadcast %cst_21 : f32 to vector<16x512xf32>
    %24 = arith.maximumf %22, %23 : vector<16x512xf32>
    %cst_22 = arith.constant 0.000000e+00 : bf16
    %25 = vector.broadcast %cst_22 : bf16 to vector<1x1x512xbf16>
    %c0_23 = arith.constant 0 : index
    %c0_24 = arith.constant 0 : index
    %c0_25 = arith.constant 0 : index
    %26 = vector.load %arg9[%c0_23, %c0_24, %c0_25] : memref<1x18x512xbf16, #tpu.memory_space<vmem>>, vector<1x1x512xbf16>
    tpu.vector_store %arg9[%c0_23, %c0_24, %c0_25], %25 {strides = array<i32>} : memref<1x18x512xbf16, #tpu.memory_space<vmem>>, vector<1x1x512xbf16>,
    %cst_26 = arith.constant 0.000000e+00 : bf16
    %27 = vector.broadcast %cst_26 : bf16 to vector<1x1x512xbf16>
    %c0_27 = arith.constant 0 : index
    %c17 = arith.constant 17 : index
    %c0_28 = arith.constant 0 : index
    %28 = vector.load %arg9[%c0_27, %c17, %c0_28] : memref<1x18x512xbf16, #tpu.memory_space<vmem>>, vector<1x1x512xbf16>
    tpu.vector_store %arg9[%c0_27, %c17, %c0_28], %27 {strides = array<i32>} : memref<1x18x512xbf16, #tpu.memory_space<vmem>>, vector<1x1x512xbf16>,
    %29 = arith.truncf %24 : vector<16x512xf32> to vector<16x512xbf16>
    %30 = vector.shape_cast %29 : vector<16x512xbf16> to vector<1x16x512xbf16>
    %c0_29 = arith.constant 0 : index
    %c1_30 = arith.constant 1 : index
    %c0_31 = arith.constant 0 : index
    %31 = vector.load %arg9[%c0_29, %c1_30, %c0_31] : memref<1x18x512xbf16, #tpu.memory_space<vmem>>, vector<1x16x512xbf16>
    tpu.vector_store %arg9[%c0_29, %c1_30, %c0_31], %30 {strides = array<i32>} : memref<1x18x512xbf16, #tpu.memory_space<vmem>>, vector<1x16x512xbf16>,
    %c0_32 = arith.constant 0 : index
    %c0_33 = arith.constant 0 : index
    %c0_34 = arith.constant 0 : index
    %32 = vector.load %arg9[%c0_32, %c0_33, %c0_34] : memref<1x18x512xbf16, #tpu.memory_space<vmem>>, vector<1x16x512xbf16>
    %33 = vector.shape_cast %32 : vector<1x16x512xbf16> to vector<16x512xbf16>
    %c0_35 = arith.constant 0 : index
    %c0_36 = arith.constant 0 : index
    %c0_37 = arith.constant 0 : index
    %34 = vector.load %arg5[%c0_35, %c0_36, %c0_37] : memref<3x512x512xbf16, #tpu.memory_space<vmem>>, vector<1x512x512xbf16>
    %35 = vector.shape_cast %34 : vector<1x512x512xbf16> to vector<512x512xbf16>
    %cst_38 = arith.constant dense<0.000000e+00> : vector<16x512xf32>
    %36 = tpu.matmul %33, %35, %cst_38 {dimension_numbers = #tpu.dot_dimension_numbers<[1], [0], [0], [1], [0, 0, 1, 1], [], []>} : vector<16x512xbf16>, vector<512x512xbf16>, vector<16x512xf32> -> vector<16x512xf32>
    %c0_39 = arith.constant 0 : index
    %c1_40 = arith.constant 1 : index
    %c0_41 = arith.constant 0 : index
    %37 = vector.load %arg9[%c0_39, %c1_40, %c0_41] : memref<1x18x512xbf16, #tpu.memory_space<vmem>>, vector<1x16x512xbf16>
    %38 = vector.shape_cast %37 : vector<1x16x512xbf16> to vector<16x512xbf16>
    %c1_42 = arith.constant 1 : index
    %c0_43 = arith.constant 0 : index
    %c0_44 = arith.constant 0 : index
    %39 = vector.load %arg5[%c1_42, %c0_43, %c0_44] : memref<3x512x512xbf16, #tpu.memory_space<vmem>>, vector<1x512x512xbf16>
    %40 = vector.shape_cast %39 : vector<1x512x512xbf16> to vector<512x512xbf16>
    %cst_45 = arith.constant dense<0.000000e+00> : vector<16x512xf32>
    %41 = tpu.matmul %38, %40, %cst_45 {dimension_numbers = #tpu.dot_dimension_numbers<[1], [0], [0], [1], [0, 0, 1, 1], [], []>} : vector<16x512xbf16>, vector<512x512xbf16>, vector<16x512xf32> -> vector<16x512xf32>
    %42 = arith.addf %36, %41 : vector<16x512xf32>
    %c0_46 = arith.constant 0 : index
    %c2_47 = arith.constant 2 : index
    %c0_48 = arith.constant 0 : index
    %43 = vector.load %arg9[%c0_46, %c2_47, %c0_48] : memref<1x18x512xbf16, #tpu.memory_space<vmem>>, vector<1x16x512xbf16>
    %44 = vector.shape_cast %43 : vector<1x16x512xbf16> to vector<16x512xbf16>
    %c2_49 = arith.constant 2 : index
    %c0_50 = arith.constant 0 : index
    %c0_51 = arith.constant 0 : index
    %45 = vector.load %arg5[%c2_49, %c0_50, %c0_51] : memref<3x512x512xbf16, #tpu.memory_space<vmem>>, vector<1x512x512xbf16>
    %46 = vector.shape_cast %45 : vector<1x512x512xbf16> to vector<512x512xbf16>
    %cst_52 = arith.constant dense<0.000000e+00> : vector<16x512xf32>
    %47 = tpu.matmul %44, %46, %cst_52 {dimension_numbers = #tpu.dot_dimension_numbers<[1], [0], [0], [1], [0, 0, 1, 1], [], []>} : vector<16x512xbf16>, vector<512x512xbf16>, vector<16x512xf32> -> vector<16x512xf32>
    %48 = arith.addf %42, %47 : vector<16x512xf32>
    %c0_53 = arith.constant 0 : index
    %c0_54 = arith.constant 0 : index
    %49 = vector.load %arg6[%c0_53, %c0_54] : memref<1x512xf32, #tpu.memory_space<vmem>>, vector<1x512xf32>
    %50 = vector.broadcast %49 : vector<1x512xf32> to vector<16x512xf32>
    %51 = arith.mulf %48, %50 : vector<16x512xf32>
    %c0_55 = arith.constant 0 : index
    %c0_56 = arith.constant 0 : index
    %52 = vector.load %arg7[%c0_55, %c0_56] : memref<1x512xf32, #tpu.memory_space<vmem>>, vector<1x512xf32>
    %53 = vector.broadcast %52 : vector<1x512xf32> to vector<16x512xf32>
    %54 = arith.addf %51, %53 : vector<16x512xf32>
    %c0_57 = arith.constant 0 : index
    %c1_58 = arith.constant 1 : index
    %c0_59 = arith.constant 0 : index
    %55 = vector.load %arg1[%c0_57, %c1_58, %c0_59] : memref<1x18x512xbf16, #tpu.memory_space<vmem>>, vector<1x16x512xbf16>
    %56 = vector.shape_cast %55 : vector<1x16x512xbf16> to vector<16x512xbf16>
    %57 = arith.extf %56 : vector<16x512xbf16> to vector<16x512xf32>
    %58 = arith.addf %54, %57 : vector<16x512xf32>
    %cst_60 = arith.constant 0.000000e+00 : f32
    %59 = vector.broadcast %cst_60 : f32 to vector<16x512xf32>
    %60 = arith.maximumf %58, %59 : vector<16x512xf32>
    %61 = vector.shape_cast %60 : vector<16x512xf32> to vector<1x16x512xf32>
    %c0_61 = arith.constant 0 : index
    %c0_62 = arith.constant 0 : index
    %c0_63 = arith.constant 0 : index
    %62 = vector.load %arg8[%c0_61, %c0_62, %c0_63] : memref<1x16x512xf32, #tpu.memory_space<vmem>>, vector<1x16x512xf32>
    tpu.vector_store %arg8[%c0_61, %c0_62, %c0_63], %61 {strides = array<i32>} : memref<1x16x512xf32, #tpu.memory_space<vmem>>, vector<1x16x512xf32>,
    return
  }
  func.func @transform_0(%arg0: i32) -> (i32, i32, i32) {
    %c0_i32 = arith.constant 0 : i32
    %c0_i32_0 = arith.constant 0 : i32
    %c0_i32_1 = arith.constant 0 : i32
    return %arg0, %c0_i32, %c0_i32_0 : i32, i32, i32
  }
  func.func @transform_1(%arg0: i32) -> (i32, i32, i32) {
    %c0_i32 = arith.constant 0 : i32
    %c0_i32_0 = arith.constant 0 : i32
    %c0_i32_1 = arith.constant 0 : i32
    %c0_i32_2 = arith.constant 0 : i32
    return %c0_i32, %c0_i32_0, %c0_i32_1 : i32, i32, i32
  }
  func.func @transform_2(%arg0: i32) -> (i32, i32) {
    %c0_i32 = arith.constant 0 : i32
    %c0_i32_0 = arith.constant 0 : i32
    %c0_i32_1 = arith.constant 0 : i32
    return %c0_i32, %c0_i32_0 : i32, i32
  }
  func.func @transform_3(%arg0: i32) -> (i32, i32) {
    %c0_i32 = arith.constant 0 : i32
    %c0_i32_0 = arith.constant 0 : i32
    %c0_i32_1 = arith.constant 0 : i32
    return %c0_i32, %c0_i32_0 : i32, i32
  }
  func.func @transform_4(%arg0: i32) -> (i32, i32, i32) {
    %c0_i32 = arith.constant 0 : i32
    %c0_i32_0 = arith.constant 0 : i32
    %c0_i32_1 = arith.constant 0 : i32
    %c0_i32_2 = arith.constant 0 : i32
    return %c0_i32, %c0_i32_0, %c0_i32_1 : i32, i32, i32
  }
  func.func @transform_5(%arg0: i32) -> (i32, i32) {
    %c0_i32 = arith.constant 0 : i32
    %c0_i32_0 = arith.constant 0 : i32
    %c0_i32_1 = arith.constant 0 : i32
    return %c0_i32, %c0_i32_0 : i32, i32
  }
  func.func @transform_6(%arg0: i32) -> (i32, i32) {
    %c0_i32 = arith.constant 0 : i32
    %c0_i32_0 = arith.constant 0 : i32
    %c0_i32_1 = arith.constant 0 : i32
    return %c0_i32, %c0_i32_0 : i32, i32
  }
  func.func @transform_7(%arg0: i32) -> (i32, i32, i32) {
    %c0_i32 = arith.constant 0 : i32
    %c0_i32_0 = arith.constant 0 : i32
    %c0_i32_1 = arith.constant 0 : i32
    return %arg0, %c0_i32, %c0_i32_0 : i32, i32, i32
  }
}

</mosaic_0001>

<bundles_post_ra>
// kernel: tile.23
= control target key start
LH: loop header
LB: loop body
LE: loop exit
PB: predicated region body
PF: predicated region fallthrough
CT: control target
= control target key end

     0   :  { %s28_s0 = inlined_call_operand.vmem [shape: f32[32], index: 0, kind: input, shape index: {}]   ;;  %s29_s1 = inlined_call_operand.vmem [shape: f32[16,32], index: 1, kind: output, shape index: {}]  }
   0x1   :  { %v4_v0 = vld [vmem:[%s28_s0] ss:$0 sm:$0xff] }
   0x2   :  { %5 = vst [vmem:[%s29_s1] sm:$0xff] %v4_v0  ;;  %8 = vst [vmem:[%s29_s1 + $0x8] sm:$0xff] %v4_v0 }

// kernel: tile.24
= control target key start
LH: loop header
LB: loop body
LE: loop exit
PB: predicated region body
PF: predicated region fallthrough
CT: control target
= control target key end

     0   :  { %s62_s8 = smov 96   ;;  %vm3_vm0 = vcmask 261120   ;;  %s64_s15 = smov 64   ;;  %vm9_vm1 = vcmask 1048320   ;;  %vm15_vm2 = vcmask 785920   ;;  %vm21_vm3 = vcmask 523520   ;;  %s99_s0 = inlined_call_operand.vmem [shape: f32[16,32], index: 0, kind: input, shape index: {}]   ;;  %s100_s1 = inlined_call_operand.vmem [shape: f32[1,512], index: 1, kind: output, shape index: {}]  }
   0x1   :  { %v53_v0 = vld [vmem:[%s99_s0 + $0x3] ss:$4 sm:$0xf]   ;;  %v54_v1 = vld [vmem:[%s99_s0 + $0x2] ss:$4 sm:$0xf]  }
   0x2   :  { %7 = vrot.lane.b32.xlu0 %v53_v0, %s62_s8  ;;  %v55_v2 = vld [vmem:[%s99_s0 + $0x1] ss:$4 sm:$0xf]   ;;  %v2_v3 = vld [vmem:[%s99_s0] ss:$4 sm:$0xf]  }
   0x3   :  { %s63_s0 = smov 32   ;;  %4 = vst.msk [vmem:[#allocation0] ss:$8 sm:$0xf] %vm3_vm0, %v2_v3  }
   0x4   :  { %19 = vrot.lane.b32.xlu1 %v55_v2, %s63_s0 }
   0x6   :  { %13 = vrot.lane.b32.xlu0 %v54_v1, %s64_s15 }
  0x74   :  { %v8_v4 = vpop.permute.xlu0 %7  }
  0x75   :  { %10 = vst.msk [vmem:[#allocation0] ss:$8 sm:$0xf] %vm9_vm1, %v8_v4  }
  0x76   :  { %v20_v5 = vpop.permute.xlu1 %19  }
  0x78   :  { %v14_v6 = vpop.permute.xlu0 %13  }
  0x79   :  { %16 = vst.msk [vmem:[#allocation0] ss:$8 sm:$0xf] %vm15_vm2, %v14_v6  }
  0x7a   :  { %22 = vst.msk [vmem:[#allocation0] ss:$8 sm:$0xf] %vm21_vm3, %v20_v5  }
  0x81   :  { %v27_v7 = vld [vmem:[#allocation0] sm:$0x1]  ;;  %v32_v8 = vld [vmem:[#allocation0 + $0x8] sm:$0x1]  ;;  %v38_v9 = vld [vmem:[#allocation0 + $0x10] sm:$0x1] }
  0x82   :  { %30 = vst [vmem:[%s100_s1] sm:$0x1] %v27_v7  ;;  %56 = vst [vmem:[%s100_s1 + $0x1] sm:$0x1] %v32_v8  ;;  %v45_v10 = vld [vmem:[#allocation0 + $0x18] sm:$0x1] }
  0x83   :  { %57 = vst [vmem:[%s100_s1 + $0x2] sm:$0x1] %v38_v9  ;;  %58 = vst [vmem:[%s100_s1 + $0x3] sm:$0x1] %v45_v10 }

// kernel: basic_block.1
= control target key start
LH: loop header
LB: loop body
LE: loop exit
PB: predicated region body
PF: predicated region fallthrough
CT: control target
= control target key end

     0   :  { %s9095_s24 = smov 0   ;;  %s11842_s0 = inlined_call_operand.vmem [shape: bf16[2,18,512], index: 0, kind: input, shape index: {}]   ;;  %s11843_s1 = inlined_call_operand.vmem [shape: bf16[3,512,512], index: 1, kind: input, shape index: {}]   ;;  %s11844_s2 = inlined_call_operand.vmem [shape: f32[1,512], index: 2, kind: input, shape index: {}]   ;;  %s11845_s3 = inlined_call_operand.vmem [shape: f32[1,512], index: 3, kind: input, shape index: {}]   ;;  %s11846_s4 = inlined_call_operand.vmem [shape: bf16[3,512,512], index: 4, kind: input, shape index: {}]   ;;  %s11847_s5 = inlined_call_operand.vmem [shape: f32[1,512], index: 5, kind: input, shape index: {}]   ;;  %s11848_s6 = inlined_call_operand.vmem [shape: f32[1,512], index: 6, kind: input, shape index: {}]   ;;  %s11849_s7 = inlined_call_operand.vmem [shape: f32[2,16,512], index: 7, kind: output, shape index: {}]  }
   0x1 LB: > { %s6545_s25 = sadd.s32 4294967295, %s9053_s24   ;;  %p6549_p0 = scmp.ge.s32.totalorder %s9053_s24, 1  ;;  %s9053_s24 = sphi %s9095_s24, %s17_s24  }
   0x2   : > { %p237_p1 = scmp.lt.s32.totalorder %s9053_s24, 3 }
   0x4   : > { %p238_p2 = pnand %p6549_p0, %p237_p1 }
   0x5   : > { %p269_p3 = scmp.lt.s32.totalorder (!%p238_p2), %s6545_s25, 1 }
   0x6   : > { %241 = sbr.rel (%p238_p2) target bundleno = 1163 (0x48b), region = 48 }
   0xb   : > { %v7877_v0 = vld [vmem:[%s11843_s1 + $0x4e4] ss:$16 sps:$4 sm:$0xff]   ;;  %v7881_v2 = vld [vmem:[%s11843_s1 + $0x4e0] ss:$16 sps:$4 sm:$0xff]   ;;  %s11859_s25 = smov (!%p269_p3, %s6545_s25), 1  ;;  %vm2391_vm1 = vcmask 1046528  }
   0xc   : > { %v7879_v1 = vld [vmem:[%s11843_s1 + $0x6e4] ss:$16 sps:$4 sm:$0xff]   ;;  %1262 = vmatprep.subr.bf16.mxu0 %v7877_v0  ;;  %v7882_v3 = vld [vmem:[%s11843_s1 + $0x6e0] ss:$16 sps:$4 sm:$0xff]   ;;  %s7868_s18 = smul.u32 48, %s11859_s25  ;;  %vm3296_vm2 = vcmask 1040384  }
   0xd   : > { %1305 = vmatprep.subr.bf16.mxu1 %v7879_v1  ;;  %v7883_v4 = vld [vmem:[%s11843_s1 + $0x4c4] ss:$16 sps:$4 sm:$0xff]   ;;  %1263 = vmatpush1.bf16.msra.mxu0 %v7881_v2  ;;  %v7887_v6 = vld [vmem:[%s11843_s1 + $0x4c0] ss:$16 sps:$4 sm:$0xff]   ;;  %vm569_vm0 = vsmask.f32 7424 }
   0xe   : > { %1306 = vmatpush1.bf16.msra.mxu1 %v7882_v3  ;;  %v7885_v5 = vld [vmem:[%s11843_s1 + $0x6c4] ss:$16 sps:$4 sm:$0xff]   ;;  %1264 = vmatprep.subr.bf16.mxu0 %v7883_v4  ;;  %v7888_v7 = vld [vmem:[%s11843_s1 + $0x6c0] ss:$16 sps:$4 sm:$0xff]   ;;  %s9245_s10 = scalar_lea.vmem %s11842_s0, %s7868_s18  ;;  %vm3297_vm3 = vsmask.f32 256 }
   0xf   : > { %1307 = vmatprep.subr.bf16.mxu1 %v7885_v5  ;;  %v7889_v8 = vld [vmem:[%s11843_s1 + $0x4a4] ss:$16 sps:$4 sm:$0xff]   ;;  %v7893_v10 = vld [vmem:[%s11843_s1 + $0x4a0] ss:$16 sps:$4 sm:$0xff]   ;;  %v281_v51 = vld [vmem:[%s9245_s10 + $0x8] sm:$0xff]  ;;  %vm3299_vm4 = vcmask 1044484  }
  0x10   : > { %v7891_v9 = vld [vmem:[%s11843_s1 + $0x6a4] ss:$16 sps:$4 sm:$0xff]   ;;  %v7894_v11 = vld [vmem:[%s11843_s1 + $0x6a0] ss:$16 sps:$4 sm:$0xff]   ;;  %v283_v54 = vld [vmem:[%s9245_s10 + $0x18] sm:$0xff]  ;;  %vm3382_vm14 = vcmask 1043456  }
  0x11   : > { %1265 = vmatpush1.bf16.msra.mxu0 %v7887_v6  ;;  %v7895_v12 = vld [vmem:[%s11843_s1 + $0x484] ss:$16 sps:$4 sm:$0xff]   ;;  %v7899_v14 = vld [vmem:[%s11843_s1 + $0x480] ss:$16 sps:$4 sm:$0xff]   ;;  %v413_v55 = vld [vmem:[%s9245_s10 + $0x28] sm:$0x11]  ;;  %v9275_v58 = vcombine.high %v281_v51, %v283_v54 }
  0x12   : > { %1308 = vmatpush1.bf16.msra.mxu1 %v7888_v7  ;;  %1266 = vmatprep.subr.bf16.mxu0 %v7889_v8  ;;  %v7897_v13 = vld [vmem:[%s11843_s1 + $0x684] ss:$16 sps:$4 sm:$0xff]   ;;  %v7900_v15 = vld [vmem:[%s11843_s1 + $0x680] ss:$16 sps:$4 sm:$0xff]   ;;  %v9277_v59 = vcombine.high %v413_v55, %v413_v55  ;;  %v9296_v8 = vcombine.low %v281_v51, %v283_v54  ;;  %v7998_v51 = vld [vmem:[%s11843_s1 + $0x6ac] ss:$16 sps:$4 sm:$0xff]  }
  0x13   : > { %1309 = vmatprep.subr.bf16.mxu1 %v7891_v9  ;;  %v7901_v16 = vld [vmem:[%s11843_s1 + $0x464] ss:$16 sps:$4 sm:$0xff]   ;;  %v7905_v18 = vld [vmem:[%s11843_s1 + $0x460] ss:$16 sps:$4 sm:$0xff]   ;;  %v607_v1 = vshrl.u32 %v9275_v58, 16  ;;  %v609_v2 = vshll.u32 %v9275_v58, 16  ;;  %vm3298_vm5 = vmand %vm3296_vm2, %vm3297_vm3 }
  0x14   : > { %v7903_v17 = vld [vmem:[%s11843_s1 + $0x664] ss:$16 sps:$4 sm:$0xff]   ;;  %v7906_v19 = vld [vmem:[%s11843_s1 + $0x660] ss:$16 sps:$4 sm:$0xff]   ;;  %v614_v3 = vshll.u32 %v9277_v59, 16  ;;  %vm3384_vm15 = vcmask 1047556  }
  0x15   : > { %1267 = vmatpush1.bf16.msra.mxu0 %v7893_v10  ;;  %v7907_v20 = vld [vmem:[%s11843_s1 + $0x444] ss:$16 sps:$4 sm:$0xff]   ;;  %v7911_v22 = vld [vmem:[%s11843_s1 + $0x440] ss:$16 sps:$4 sm:$0xff]   ;;  %v611_v10 = vrot.slane %v609_v2, 1  ;;  %s7863_s29 = sshll.u32 %s11859_s25, 6 }
  0x16   : > { %1310 = vmatpush1.bf16.msra.mxu1 %v7894_v11  ;;  %1268 = vmatprep.subr.bf16.mxu0 %v7895_v12  ;;  %v7909_v21 = vld [vmem:[%s11843_s1 + $0x644] ss:$16 sps:$4 sm:$0xff]   ;;  %v7912_v23 = vld [vmem:[%s11843_s1 + $0x640] ss:$16 sps:$4 sm:$0xff]   ;;  %v616_v11 = vrot.slane %v614_v3, 1  ;;  %s11808_s9 = scalar_lea.vmem %s11849_s7, %s7863_s29 }
  0x17   : > { %1311 = vmatprep.subr.bf16.mxu1 %v7897_v13  ;;  %v7913_v24 = vld [vmem:[%s11843_s1 + $0x424] ss:$16 sps:$4 sm:$0xff]   ;;  %v7917_v26 = vld [vmem:[%s11843_s1 + $0x420] ss:$16 sps:$4 sm:$0xff]   ;;  %v7993_v54 = vld [vmem:[%s11843_s1 + $0x4a8] ss:$16 sps:$4 sm:$0xff]  }
  0x18   : > { %v7915_v25 = vld [vmem:[%s11843_s1 + $0x624] ss:$16 sps:$4 sm:$0xff]   ;;  %v7918_v27 = vld [vmem:[%s11843_s1 + $0x620] ss:$16 sps:$4 sm:$0xff]   ;;  %v8013_v2 = vld [vmem:[%s11843_s1 + $0x44c] ss:$16 sps:$4 sm:$0xff]  }
  0x19   : > { %1269 = vmatpush1.bf16.msra.mxu0 %v7899_v14  ;;  %v7919_v28 = vld [vmem:[%s11843_s1 + $0x404] ss:$16 sps:$4 sm:$0xff]   ;;  %v7923_v30 = vld [vmem:[%s11843_s1 + $0x400] ss:$16 sps:$4 sm:$0xff]   ;;  %v8016_v3 = vld [vmem:[%s11843_s1 + $0x64c] ss:$16 sps:$4 sm:$0xff]  }
  0x1a   : > { %1312 = vmatpush1.bf16.msra.mxu1 %v7900_v15  ;;  %1270 = vmatprep.subr.bf16.mxu0 %v7901_v16  ;;  %v7921_v29 = vld [vmem:[%s11843_s1 + $0x604] ss:$16 sps:$4 sm:$0xff]   ;;  %v7924_v31 = vld [vmem:[%s11843_s1 + $0x600] ss:$16 sps:$4 sm:$0xff]   ;;  %v612_v15 = vor.u32 %v611_v10, %v607_v1  ;;  %v8008_v1 = vld [vmem:[%s11843_s1 + $0x668] ss:$16 sps:$4 sm:$0xff]  }
  0x1b   : > { %1313 = vmatprep.subr.bf16.mxu1 %v7903_v17  ;;  %v7925_v32 = vld [vmem:[%s11843_s1 + $0x5e4] ss:$16 sps:$4 sm:$0xff]   ;;  %v7929_v34 = vld [vmem:[%s11843_s1 + $0x5e0] ss:$16 sps:$4 sm:$0xff]   ;;  %v8017_v10 = vld [vmem:[%s11843_s1 + $0x428] ss:$16 sps:$4 sm:$0xff]  }
  0x1c   : > { %v7927_v33 = vld [vmem:[%s11843_s1 + $0x7e4] ss:$16 sps:$4 sm:$0xff]   ;;  %v7930_v35 = vld [vmem:[%s11843_s1 + $0x7e0] ss:$16 sps:$4 sm:$0xff]   ;;  %vm3300_vm6 = vsmask.f32 4352 }
  0x1d   : > { %1271 = vmatpush1.bf16.msra.mxu0 %v7905_v18  ;;  %v7931_v36 = vld [vmem:[%s11843_s1 + $0x5c4] ss:$16 sps:$4 sm:$0xff]   ;;  %v7935_v38 = vld [vmem:[%s11843_s1 + $0x5c0] ss:$16 sps:$4 sm:$0xff]   ;;  %vm3301_vm7 = vmand %vm3299_vm4, %vm3300_vm6  ;;  %vm3309_vm8 = vsmask.f32 7938 }
  0x1e   : > { %1314 = vmatpush1.bf16.msra.mxu1 %v7906_v19  ;;  %1272 = vmatprep.subr.bf16.mxu0 %v7907_v20  ;;  %v7933_v37 = vld [vmem:[%s11843_s1 + $0x7c4] ss:$16 sps:$4 sm:$0xff]   ;;  %v7936_v39 = vld [vmem:[%s11843_s1 + $0x7c0] ss:$16 sps:$4 sm:$0xff]   ;;  %v9314_v20 = vcombine.low %v413_v55, %v413_v55  ;;  %v7996_v55 = vld [vmem:[%s11843_s1 + $0x6a8] ss:$16 sps:$4 sm:$0xff]  }
  0x1f   : > { %1315 = vmatprep.subr.bf16.mxu1 %v7909_v21  ;;  %v7937_v40 = vld [vmem:[%s11843_s1 + $0x5a4] ss:$16 sps:$4 sm:$0xff]   ;;  %v7941_v42 = vld [vmem:[%s11843_s1 + $0x5a0] ss:$16 sps:$4 sm:$0xff]   ;;  %v597_v21 = vshll.u32 %v9296_v8, 16  ;;  %vm10422_vm10 = vmor %vm3301_vm7, %vm3298_vm5 }
  0x20   : > { %v7939_v41 = vld [vmem:[%s11843_s1 + $0x7a4] ss:$16 sps:$4 sm:$0xff]   ;;  %v7942_v43 = vld [vmem:[%s11843_s1 + $0x7a0] ss:$16 sps:$4 sm:$0xff]   ;;  %vm3311_vm9 = vsmask.f32 7954  ;;  %vm3310_vm11 = vmand %vm3296_vm2, %vm3309_vm8 }
  0x21   : > { %1273 = vmatpush1.bf16.msra.mxu0 %v7911_v22  ;;  %v7943_v44 = vld [vmem:[%s11843_s1 + $0x584] ss:$16 sps:$4 sm:$0xff]   ;;  %v7947_v46 = vld [vmem:[%s11843_s1 + $0x580] ss:$16 sps:$4 sm:$0xff]   ;;  %vm3312_vm12 = vmand %vm3299_vm4, %vm3311_vm9  ;;  %vm3340_vm6 = vsmask.f32 4368 }
  0x22   : > { %1316 = vmatpush1.bf16.msra.mxu1 %v7912_v23  ;;  %1274 = vmatprep.subr.bf16.mxu0 %v7913_v24  ;;  %v7945_v45 = vld [vmem:[%s11843_s1 + $0x784] ss:$16 sps:$4 sm:$0xff]   ;;  %v7948_v47 = vld [vmem:[%s11843_s1 + $0x780] ss:$16 sps:$4 sm:$0xff]   ;;  %v617_v23 = vsel %vm569_vm0, %v612_v15, %v616_v11  ;;  %v8020_v11 = vld [vmem:[%s11843_s1 + $0x628] ss:$16 sps:$4 sm:$0xff]  }
  0x23   : > { %1317 = vmatprep.subr.bf16.mxu1 %v7915_v25  ;;  %v280_v48 = vld [vmem:[%s9245_s10] sm:$0xff]  ;;  %v282_v49 = vld [vmem:[%s9245_s10 + $0x10] sm:$0xff]  ;;  %1337 = vmatprep.mubr.bf16.mxu1 %v617_v23  ;;  %v8026_v15 = vld [vmem:[%s11843_s1 + $0x608] ss:$16 sps:$4 sm:$0xff]  }
  0x24   : > { %v412_v50 = vld [vmem:[%s9245_s10 + $0x20] sm:$0x11]  ;;  %v9263_v52 = vcombine.high %v280_v48, %v282_v49  ;;  %v9294_v7 = vcombine.low %v280_v48, %v282_v49  ;;  %v7987_v48 = vld [vmem:[%s11843_s1 + $0x4c8] ss:$16 sps:$4 sm:$0xff]   ;;  %vm3313_vm13 = vmor %vm3312_vm12, %vm3310_vm11 }
  0x25   : > { %1275 = vmatpush1.bf16.msra.mxu0 %v7917_v26  ;;  %v9265_v53 = vcombine.high %v412_v50, %v412_v50  ;;  %v7949_v56 = vld [vmem:[%s11843_s1 + $0x564] ss:$16 sps:$4 sm:$0xff]   ;;  %v7953_v60 = vld [vmem:[%s11843_s1 + $0x560] ss:$16 sps:$4 sm:$0xff]   ;;  %v9307_v16 = vcombine.low %v412_v50, %v412_v50  ;;  %v7990_v49 = vld [vmem:[%s11843_s1 + $0x6c8] ss:$16 sps:$4 sm:$0xff]  }
  0x26   : > { %1318 = vmatpush1.bf16.msra.mxu1 %v7918_v27  ;;  %1276 = vmatprep.subr.bf16.mxu0 %v7919_v28  ;;  %v7951_v57 = vld [vmem:[%s11843_s1 + $0x764] ss:$16 sps:$4 sm:$0xff]   ;;  %v583_v61 = vshrl.u32 %v9263_v52, 16  ;;  %v585_v62 = vshll.u32 %v9263_v52, 16  ;;  %v7954_v0 = vld [vmem:[%s11843_s1 + $0x760] ss:$16 sps:$4 sm:$0xff]   ;;  %vm10442_vm2 = vmand %vm3382_vm14, %vm3309_vm8 }
  0x27   : > { %1319 = vmatprep.subr.bf16.mxu1 %v7921_v29  ;;  %v590_v63 = vshll.u32 %v9265_v53, 16  ;;  %v7955_v4 = vld [vmem:[%s11843_s1 + $0x544] ss:$16 sps:$4 sm:$0xff]   ;;  %v7959_v13 = vld [vmem:[%s11843_s1 + $0x540] ss:$16 sps:$4 sm:$0xff]   ;;  %v573_v19 = vshll.u32 %v9294_v7, 16  ;;  %vm10447_vm4 = vmand %vm3384_vm15, %vm3311_vm9 }
  0x28   : > { %v587_v5 = vrot.slane %v585_v62, 1  ;;  %v7957_v9 = vld [vmem:[%s11843_s1 + $0x744] ss:$16 sps:$4 sm:$0xff]   ;;  %v7960_v14 = vld [vmem:[%s11843_s1 + $0x740] ss:$16 sps:$4 sm:$0xff]   ;;  %v571_v27 = vshrl.u32 %v9294_v7, 16  ;;  %vm3386_vm5 = vmor %vm10447_vm4, %vm10442_vm2 }
  0x29   : > { %1277 = vmatpush1.bf16.msra.mxu0 %v7923_v30  ;;  %v592_v6 = vrot.slane %v590_v63, 1  ;;  %v7961_v17 = vld [vmem:[%s11843_s1 + $0x524] ss:$16 sps:$4 sm:$0xff]   ;;  %v7965_v24 = vld [vmem:[%s11843_s1 + $0x520] ss:$16 sps:$4 sm:$0xff]   ;;  %v578_v28 = vshll.u32 %v9307_v16, 16  ;;  %vm10692_vm7 = vmor %vm3297_vm3, %vm3340_vm6 }
  0x2a   : > { %1320 = vmatpush1.bf16.msra.mxu1 %v7924_v31  ;;  %1278 = vmatprep.subr.bf16.mxu0 %v7925_v32  ;;  %v588_v12 = vor.u32 %v587_v5, %v583_v61  ;;  %v7963_v22 = vld [vmem:[%s11843_s1 + $0x724] ss:$16 sps:$4 sm:$0xff]   ;;  %v7966_v25 = vld [vmem:[%s11843_s1 + $0x720] ss:$16 sps:$4 sm:$0xff]   ;;  %v575_v29 = vrot.slane %v573_v19, 1  ;;  %v595_v30 = vshrl.u32 %v9296_v8, 16 }
  0x2b   : > { %1321 = vmatprep.subr.bf16.mxu1 %v7927_v33  ;;  %v7967_v26 = vld [vmem:[%s11843_s1 + $0x504] ss:$16 sps:$4 sm:$0xff]   ;;  %v599_v31 = vrot.slane %v597_v21, 1  ;;  %v602_v32 = vshll.u32 %v9314_v20, 16  ;;  %v7995_v50 = vld [vmem:[%s11843_s1 + $0x4ac] ss:$16 sps:$4 sm:$0xff]  }
  0x2c   : > { %v593_v18 = vsel %vm569_vm0, %v588_v12, %v592_v6  ;;  %v7969_v33 = vld [vmem:[%s11843_s1 + $0x704] ss:$16 sps:$4 sm:$0xff]   ;;  %v8002_v61 = vld [vmem:[%s11843_s1 + $0x688] ss:$16 sps:$4 sm:$0xff]   ;;  %v8007_v62 = vld [vmem:[%s11843_s1 + $0x46c] ss:$16 sps:$4 sm:$0xff]  }
  0x2d   : > { %1279 = vmatpush2.bf16.msra.mxu0 %v7929_v34  ;;  %1294 = vmatprep.mubr.bf16.mxu0 %v593_v18  ;;  %v7971_v34 = vld [vmem:[%s11843_s1 + $0x500] ss:$16 sps:$4 sm:$0xff]   ;;  %v8010_v63 = vld [vmem:[%s11843_s1 + $0x66c] ss:$16 sps:$4 sm:$0xff]   ;;  %v8014_v5 = vld [vmem:[%s11843_s1 + $0x648] ss:$16 sps:$4 sm:$0xff]  }
  0x2e   : > { %1322 = vmatpush2.bf16.msra.mxu1 %v7930_v35  ;;  %1280 = vmatprep.subr.bf16.mxu0 %v7931_v36  ;;  %v7972_v35 = vld [vmem:[%s11843_s1 + $0x700] ss:$16 sps:$4 sm:$0xff]   ;;  %v576_v36 = vor.u32 %v575_v29, %v571_v27  ;;  %v8019_v6 = vld [vmem:[%s11843_s1 + $0x42c] ss:$16 sps:$4 sm:$0xff]   ;;  %v8029_v19 = vld [vmem:[%s11843_s1 + $0x5e8] ss:$16 sps:$4 sm:$0xff]  }
  0x2f   : > { %1323 = vmatprep.subr.bf16.mxu1 %v7933_v37  ;;  %v580_v37 = vrot.slane %v578_v28, 1  ;;  %v8025_v12 = vld [vmem:[%s11843_s1 + $0x40c] ss:$16 sps:$4 sm:$0xff]   ;;  %v8032_v21 = vld [vmem:[%s11843_s1 + $0x7e8] ss:$16 sps:$4 sm:$0xff]  }
  0x30   : > { %v8046_v27 = vld [vmem:[%s11843_s1 + $0x7ac] ss:$16 sps:$4 sm:$0xff]   ;;  %v8041_v28 = vld [vmem:[%s11843_s1 + $0x5a8] ss:$16 sps:$4 sm:$0xff]  }
  0x31   : > { %1281 = vmatpush2.bf16.msra.mxu0 %v7935_v38  ;;  %v600_v38 = vor.u32 %v599_v31, %v595_v30  ;;  %v8044_v29 = vld [vmem:[%s11843_s1 + $0x7a8] ss:$16 sps:$4 sm:$0xff]   ;;  %v8049_v30 = vld [vmem:[%s11843_s1 + $0x58c] ss:$16 sps:$4 sm:$0xff]  }
  0x32   : > { %1324 = vmatpush2.bf16.msra.mxu1 %v7936_v39  ;;  %1282 = vmatprep.subr.bf16.mxu0 %v7937_v40  ;;  %v604_v39 = vrot.slane %v602_v32, 1  ;;  %v7983_v40 = vld [vmem:[%s11843_s1 + $0x4ec] ss:$16 sps:$4 sm:$0xff]   ;;  %v8047_v32 = vld [vmem:[%s11843_s1 + $0x588] ss:$16 sps:$4 sm:$0xff]  }
  0x33   : > { %1325 = vmatprep.subr.bf16.mxu1 %v7939_v41  ;;  %v7986_v41 = vld [vmem:[%s11843_s1 + $0x6ec] ss:$16 sps:$4 sm:$0xff]  }
  0x34   : > { %v8052_v31 = vld [vmem:[%s11843_s1 + $0x78c] ss:$16 sps:$4 sm:$0xff]  }
  0x35   : > { %1283 = vmatpush2.bf16.msra.mxu0 %v7941_v42  ;;  %v7981_v42 = vld [vmem:[%s11843_s1 + $0x4e8] ss:$16 sps:$4 sm:$0xff]  }
  0x36   : > { %1326 = vmatpush2.bf16.msra.mxu1 %v7942_v43  ;;  %1284 = vmatprep.subr.bf16.mxu0 %v7943_v44  ;;  %v7984_v43 = vld [vmem:[%s11843_s1 + $0x6e8] ss:$16 sps:$4 sm:$0xff]   ;;  %v9356_v44 = vsel %vm569_vm0, %v576_v36, %v580_v37 }
  0x37   : > { %1327 = vmatprep.subr.bf16.mxu1 %v7945_v45  ;;  %v9359_v45 = vsel %vm569_vm0, %v600_v38, %v604_v39  ;;  %v8053_v36 = vld [vmem:[%s11843_s1 + $0x568] ss:$16 sps:$4 sm:$0xff]   ;;  %v8061_v38 = vld [vmem:[%s11843_s1 + $0x54c] ss:$16 sps:$4 sm:$0xff]  }
  0x38   : > { %v8056_v37 = vld [vmem:[%s11843_s1 + $0x768] ss:$16 sps:$4 sm:$0xff]   ;;  %v8064_v39 = vld [vmem:[%s11843_s1 + $0x74c] ss:$16 sps:$4 sm:$0xff]  }
  0x39   : > { %1285 = vmatpush2.bf16.msra.mxu0 %v7947_v46  ;;  %v7989_v46 = vld [vmem:[%s11843_s1 + $0x4cc] ss:$16 sps:$4 sm:$0xff]  }
  0x3a   : > { %1328 = vmatpush2.bf16.msra.mxu1 %v7948_v47  ;;  %1286 = vmatprep.subr.bf16.mxu0 %v7949_v56  ;;  %v7992_v47 = vld [vmem:[%s11843_s1 + $0x6cc] ss:$16 sps:$4 sm:$0xff]  }
  0x3b   : > { %1329 = vmatprep.subr.bf16.mxu1 %v7951_v57  ;;  %v8001_v56 = vld [vmem:[%s11843_s1 + $0x48c] ss:$16 sps:$4 sm:$0xff]  }
  0x3c   : > { %v8004_v57 = vld [vmem:[%s11843_s1 + $0x68c] ss:$16 sps:$4 sm:$0xff]  }
  0x3d   : > { %1287 = vmatpush2.bf16.msra.mxu0 %v7953_v60  ;;  %v7999_v60 = vld [vmem:[%s11843_s1 + $0x488] ss:$16 sps:$4 sm:$0xff]  }
  0x3e   : > { %1330 = vmatpush2.bf16.msra.mxu1 %v7954_v0  ;;  %1288 = vmatprep.subr.bf16.mxu0 %v7955_v4  ;;  %v8005_v0 = vld [vmem:[%s11843_s1 + $0x468] ss:$16 sps:$4 sm:$0xff]  }
  0x3f   : > { %1331 = vmatprep.subr.bf16.mxu1 %v7957_v9  ;;  %v8011_v4 = vld [vmem:[%s11843_s1 + $0x448] ss:$16 sps:$4 sm:$0xff]   ;;  %v8022_v9 = vld [vmem:[%s11843_s1 + $0x62c] ss:$16 sps:$4 sm:$0xff]  }
  0x41   : > { %1289 = vmatpush2.bf16.msra.mxu0 %v7959_v13  ;;  %v8028_v13 = vld [vmem:[%s11843_s1 + $0x60c] ss:$16 sps:$4 sm:$0xff]  }
  0x42   : > { %1332 = vmatpush2.bf16.msra.mxu1 %v7960_v14  ;;  %1290 = vmatprep.subr.bf16.mxu0 %v7961_v17  ;;  %v8023_v14 = vld [vmem:[%s11843_s1 + $0x408] ss:$16 sps:$4 sm:$0xff]   ;;  %v8031_v17 = vld [vmem:[%s11843_s1 + $0x5ec] ss:$16 sps:$4 sm:$0xff]  }
  0x43   : > { %1333 = vmatprep.subr.bf16.mxu1 %v7963_v22  ;;  %v8037_v22 = vld [vmem:[%s11843_s1 + $0x5cc] ss:$16 sps:$4 sm:$0xff]  }
  0x45   : > { %1291 = vmatpush2.bf16.msra.mxu0 %v7965_v24  ;;  %v8035_v24 = vld [vmem:[%s11843_s1 + $0x5c8] ss:$16 sps:$4 sm:$0xff]  }
  0x46   : > { %1334 = vmatpush2.bf16.msra.mxu1 %v7966_v25  ;;  %1292 = vmatprep.subr.bf16.mxu0 %v7967_v26  ;;  %v8038_v25 = vld [vmem:[%s11843_s1 + $0x7c8] ss:$16 sps:$4 sm:$0xff]   ;;  %v8043_v26 = vld [vmem:[%s11843_s1 + $0x5ac] ss:$16 sps:$4 sm:$0xff]  }
  0x47   : > { %1335 = vmatprep.subr.bf16.mxu1 %v7969_v33  ;;  %v8050_v33 = vld [vmem:[%s11843_s1 + $0x788] ss:$16 sps:$4 sm:$0xff]  }
  0x49   : > { %1293 = vmatpush2.bf16.msra.mxu0 %v7971_v34  ;;  %v8055_v34 = vld [vmem:[%s11843_s1 + $0x56c] ss:$16 sps:$4 sm:$0xff]  }
  0x4a   : > { %1336 = vmatpush2.bf16.msra.mxu1 %v7972_v35  ;;  %1348 = vmatprep.subr.bf16.mxu0 %v7983_v40  ;;  %v8058_v35 = vld [vmem:[%s11843_s1 + $0x76c] ss:$16 sps:$4 sm:$0xff]   ;;  %v8059_v40 = vld [vmem:[%s11843_s1 + $0x548] ss:$16 sps:$4 sm:$0xff]  }
  0x4b   : > { %1391 = vmatprep.subr.bf16.mxu1 %v7986_v41  ;;  %v8062_v41 = vld [vmem:[%s11843_s1 + $0x748] ss:$16 sps:$4 sm:$0xff]  }
  0x4c   : > { %1295 = vmatmul.mubr.bf16.vlgmr.msra.gmra.mxu0 %v9356_v44 }
  0x4d   : > { %1338 = vmatmul.mubr.bf16.vlgmr.msra.gmra.mxu1 %v9359_v45  ;;  %1349 = vmatpush1.bf16.msra.mxu0 %v7981_v42  ;;  %v8067_v42 = vld [vmem:[%s11843_s1 + $0x52c] ss:$16 sps:$4 sm:$0xff]  }
  0x4e   : > { %1392 = vmatpush1.bf16.msra.mxu1 %v7984_v43  ;;  %1350 = vmatprep.subr.bf16.mxu0 %v7989_v46  ;;  %v8070_v43 = vld [vmem:[%s11843_s1 + $0x72c] ss:$16 sps:$4 sm:$0xff]   ;;  %v8065_v46 = vld [vmem:[%s11843_s1 + $0x528] ss:$16 sps:$4 sm:$0xff]  }
  0x4f   : > { %1393 = vmatprep.subr.bf16.mxu1 %v7992_v47  ;;  %1380 = vmatprep.mubr.bf16.mxu0 %v593_v18  ;;  %v8034_v18 = vld [vmem:[%s11843_s1 + $0x7ec] ss:$16 sps:$4 sm:$0xff]   ;;  %v8068_v47 = vld [vmem:[%s11843_s1 + $0x728] ss:$16 sps:$4 sm:$0xff]  }
  0x50   : > { %1423 = vmatprep.mubr.bf16.mxu1 %v617_v23  ;;  %v8040_v23 = vld [vmem:[%s11843_s1 + $0x7cc] ss:$16 sps:$4 sm:$0xff]  }
  0x51   : > { %1351 = vmatpush1.bf16.msra.mxu0 %v7987_v48  ;;  %v8073_v48 = vld [vmem:[%s11843_s1 + $0x50c] ss:$16 sps:$4 sm:$0xff]  }
  0x52   : > { %1394 = vmatpush1.bf16.msra.mxu1 %v7990_v49  ;;  %1352 = vmatprep.subr.bf16.mxu0 %v7995_v50  ;;  %v8076_v49 = vld [vmem:[%s11843_s1 + $0x70c] ss:$16 sps:$4 sm:$0xff]   ;;  %v8071_v50 = vld [vmem:[%s11843_s1 + $0x508] ss:$16 sps:$4 sm:$0xff]  }
  0x53   : > { %1395 = vmatprep.subr.bf16.mxu1 %v7998_v51  ;;  %v8074_v51 = vld [vmem:[%s11843_s1 + $0x708] ss:$16 sps:$4 sm:$0xff]  }
  0x55   : > { %1353 = vmatpush1.bf16.msra.mxu0 %v7993_v54  ;;  %v8079_v54 = vld [vmem:[%s11843_s1 + $0xe4] ss:$16 sps:$4 sm:$0xff]  }
  0x56   : > { %1396 = vmatpush1.bf16.msra.mxu1 %v7996_v55  ;;  %1354 = vmatprep.subr.bf16.mxu0 %v8001_v56  ;;  %v8082_v55 = vld [vmem:[%s11843_s1 + $0x2e4] ss:$16 sps:$4 sm:$0xff]   ;;  %v8077_v56 = vld [vmem:[%s11843_s1 + $0xe0] ss:$16 sps:$4 sm:$0xff]  }
  0x57   : > { %1397 = vmatprep.subr.bf16.mxu1 %v8004_v57  ;;  %v8080_v57 = vld [vmem:[%s11843_s1 + $0x2e0] ss:$16 sps:$4 sm:$0xff]  }
  0x59   : > { %1355 = vmatpush1.bf16.msra.mxu0 %v7999_v60  ;;  %v8085_v60 = vld [vmem:[%s11843_s1 + $0xc4] ss:$16 sps:$4 sm:$0xff]  }
  0x5a   : > { %1398 = vmatpush1.bf16.msra.mxu1 %v8002_v61  ;;  %1356 = vmatprep.subr.bf16.mxu0 %v8007_v62  ;;  %v8088_v61 = vld [vmem:[%s11843_s1 + $0x2c4] ss:$16 sps:$4 sm:$0xff]   ;;  %v8083_v62 = vld [vmem:[%s11843_s1 + $0xc0] ss:$16 sps:$4 sm:$0xff]  }
  0x5b   : > { %1399 = vmatprep.subr.bf16.mxu1 %v8010_v63  ;;  %v8086_v63 = vld [vmem:[%s11843_s1 + $0x2c0] ss:$16 sps:$4 sm:$0xff]  }
  0x5d   : > { %1357 = vmatpush1.bf16.msra.mxu0 %v8005_v0  ;;  %v8091_v0 = vld [vmem:[%s11843_s1 + $0xa4] ss:$16 sps:$4 sm:$0xff]  }
  0x5e   : > { %1400 = vmatpush1.bf16.msra.mxu1 %v8008_v1  ;;  %1358 = vmatprep.subr.bf16.mxu0 %v8013_v2  ;;  %v8092_v1 = vld [vmem:[%s11843_s1 + $0x2a0] ss:$16 sps:$4 sm:$0xff]   ;;  %v8097_v2 = vld [vmem:[%s11843_s1 + $0x84] ss:$16 sps:$4 sm:$0xff]  }
  0x5f   : > { %1401 = vmatprep.subr.bf16.mxu1 %v8016_v3  ;;  %v8100_v3 = vld [vmem:[%s11843_s1 + $0x284] ss:$16 sps:$4 sm:$0xff]  }
  0x61   : > { %1359 = vmatpush1.bf16.msra.mxu0 %v8011_v4  ;;  %v8095_v4 = vld [vmem:[%s11843_s1 + $0x80] ss:$16 sps:$4 sm:$0xff]  }
  0x62   : > { %1402 = vmatpush1.bf16.msra.mxu1 %v8014_v5  ;;  %1360 = vmatprep.subr.bf16.mxu0 %v8019_v6  ;;  %v8098_v5 = vld [vmem:[%s11843_s1 + $0x280] ss:$16 sps:$4 sm:$0xff]   ;;  %v8103_v6 = vld [vmem:[%s11843_s1 + $0x64] ss:$16 sps:$4 sm:$0xff]  }
  0x63   : > { %1403 = vmatprep.subr.bf16.mxu1 %v8022_v9  ;;  %v8106_v9 = vld [vmem:[%s11843_s1 + $0x264] ss:$16 sps:$4 sm:$0xff]  }
  0x65   : > { %1361 = vmatpush1.bf16.msra.mxu0 %v8017_v10  ;;  %v8101_v10 = vld [vmem:[%s11843_s1 + $0x60] ss:$16 sps:$4 sm:$0xff]  }
  0x66   : > { %1404 = vmatpush1.bf16.msra.mxu1 %v8020_v11  ;;  %1362 = vmatprep.subr.bf16.mxu0 %v8025_v12  ;;  %v8104_v11 = vld [vmem:[%s11843_s1 + $0x260] ss:$16 sps:$4 sm:$0xff]   ;;  %v8109_v12 = vld [vmem:[%s11843_s1 + $0x44] ss:$16 sps:$4 sm:$0xff]  }
  0x67   : > { %1405 = vmatprep.subr.bf16.mxu1 %v8028_v13  ;;  %v8112_v13 = vld [vmem:[%s11843_s1 + $0x244] ss:$16 sps:$4 sm:$0xff]  }
  0x69   : > { %1363 = vmatpush1.bf16.msra.mxu0 %v8023_v14  ;;  %v8107_v14 = vld [vmem:[%s11843_s1 + $0x40] ss:$16 sps:$4 sm:$0xff]  }
  0x6a   : > { %1406 = vmatpush1.bf16.msra.mxu1 %v8026_v15  ;;  %1364 = vmatprep.subr.bf16.mxu0 %v8031_v17  ;;  %v8110_v15 = vld [vmem:[%s11843_s1 + $0x240] ss:$16 sps:$4 sm:$0xff]   ;;  %v8115_v17 = vld [vmem:[%s11843_s1 + $0x24] ss:$16 sps:$4 sm:$0xff]  }
  0x6b   : > { %1407 = vmatprep.subr.bf16.mxu1 %v8034_v18  ;;  %v8118_v18 = vld [vmem:[%s11843_s1 + $0x224] ss:$16 sps:$4 sm:$0xff]  }
  0x6d   : > { %1365 = vmatpush2.bf16.msra.mxu0 %v8029_v19  ;;  %v8113_v19 = vld [vmem:[%s11843_s1 + $0x20] ss:$16 sps:$4 sm:$0xff]  }
  0x6e   : > { %1408 = vmatpush2.bf16.msra.mxu1 %v8032_v21  ;;  %1366 = vmatprep.subr.bf16.mxu0 %v8037_v22  ;;  %v8116_v21 = vld [vmem:[%s11843_s1 + $0x220] ss:$16 sps:$4 sm:$0xff]   ;;  %v8121_v22 = vld [vmem:[%s11843_s1 + $0x4] ss:$16 sps:$4 sm:$0xff]  }
  0x6f   : > { %1409 = vmatprep.subr.bf16.mxu1 %v8040_v23  ;;  %v8124_v23 = vld [vmem:[%s11843_s1 + $0x204] ss:$16 sps:$4 sm:$0xff]  }
  0x71   : > { %1367 = vmatpush2.bf16.msra.mxu0 %v8035_v24  ;;  %v8119_v24 = vld [vmem:[%s11843_s1] ss:$16 sps:$4 sm:$0xff]  }
  0x72   : > { %1410 = vmatpush2.bf16.msra.mxu1 %v8038_v25  ;;  %1368 = vmatprep.subr.bf16.mxu0 %v8043_v26  ;;  %v8122_v25 = vld [vmem:[%s11843_s1 + $0x200] ss:$16 sps:$4 sm:$0xff]   ;;  %v8127_v26 = vld [vmem:[%s11843_s1 + $0x1e4] ss:$16 sps:$4 sm:$0xff]  }
  0x73   : > { %1411 = vmatprep.subr.bf16.mxu1 %v8046_v27  ;;  %v8130_v27 = vld [vmem:[%s11843_s1 + $0x3e4] ss:$16 sps:$4 sm:$0xff]  }
  0x75   : > { %1369 = vmatpush2.bf16.msra.mxu0 %v8041_v28  ;;  %v8125_v28 = vld [vmem:[%s11843_s1 + $0x1e0] ss:$16 sps:$4 sm:$0xff]  }
  0x76   : > { %1412 = vmatpush2.bf16.msra.mxu1 %v8044_v29  ;;  %1370 = vmatprep.subr.bf16.mxu0 %v8049_v30  ;;  %v8128_v29 = vld [vmem:[%s11843_s1 + $0x3e0] ss:$16 sps:$4 sm:$0xff]   ;;  %v8133_v30 = vld [vmem:[%s11843_s1 + $0x1c4] ss:$16 sps:$4 sm:$0xff]  }
  0x77   : > { %1413 = vmatprep.subr.bf16.mxu1 %v8052_v31  ;;  %v8136_v31 = vld [vmem:[%s11843_s1 + $0x3c4] ss:$16 sps:$4 sm:$0xff]  }
  0x79   : > { %1371 = vmatpush2.bf16.msra.mxu0 %v8047_v32  ;;  %v8131_v32 = vld [vmem:[%s11843_s1 + $0x1c0] ss:$16 sps:$4 sm:$0xff]  }
  0x7a   : > { %1414 = vmatpush2.bf16.msra.mxu1 %v8050_v33  ;;  %1372 = vmatprep.subr.bf16.mxu0 %v8055_v34  ;;  %v8134_v33 = vld [vmem:[%s11843_s1 + $0x3c0] ss:$16 sps:$4 sm:$0xff]   ;;  %v8139_v34 = vld [vmem:[%s11843_s1 + $0x1a4] ss:$16 sps:$4 sm:$0xff]  }
  0x7b   : > { %1415 = vmatprep.subr.bf16.mxu1 %v8058_v35  ;;  %v8142_v35 = vld [vmem:[%s11843_s1 + $0x3a4] ss:$16 sps:$4 sm:$0xff]  }
  0x7d   : > { %1373 = vmatpush2.bf16.msra.mxu0 %v8053_v36  ;;  %v8137_v36 = vld [vmem:[%s11843_s1 + $0x1a0] ss:$16 sps:$4 sm:$0xff]  }
  0x7e   : > { %1416 = vmatpush2.bf16.msra.mxu1 %v8056_v37  ;;  %1374 = vmatprep.subr.bf16.mxu0 %v8061_v38  ;;  %v8140_v37 = vld [vmem:[%s11843_s1 + $0x3a0] ss:$16 sps:$4 sm:$0xff]   ;;  %v8145_v38 = vld [vmem:[%s11843_s1 + $0x184] ss:$16 sps:$4 sm:$0xff]  }
  0x7f   : > { %1417 = vmatprep.subr.bf16.mxu1 %v8064_v39  ;;  %v8148_v39 = vld [vmem:[%s11843_s1 + $0x384] ss:$16 sps:$4 sm:$0xff]  }
  0x81   : > { %1375 = vmatpush2.bf16.msra.mxu0 %v8059_v40  ;;  %v8143_v40 = vld [vmem:[%s11843_s1 + $0x180] ss:$16 sps:$4 sm:$0xff]  }
  0x82   : > { %1418 = vmatpush2.bf16.msra.mxu1 %v8062_v41  ;;  %1376 = vmatprep.subr.bf16.mxu0 %v8067_v42  ;;  %v8146_v41 = vld [vmem:[%s11843_s1 + $0x380] ss:$16 sps:$4 sm:$0xff]   ;;  %v8151_v42 = vld [vmem:[%s11843_s1 + $0x164] ss:$16 sps:$4 sm:$0xff]  }
  0x83   : > { %1419 = vmatprep.subr.bf16.mxu1 %v8070_v43  ;;  %v8154_v43 = vld [vmem:[%s11843_s1 + $0x364] ss:$16 sps:$4 sm:$0xff]  }
  0x85   : > { %1377 = vmatpush2.bf16.msra.mxu0 %v8065_v46  ;;  %v8149_v46 = vld [vmem:[%s11843_s1 + $0x160] ss:$16 sps:$4 sm:$0xff]  }
  0x86   : > { %1420 = vmatpush2.bf16.msra.mxu1 %v8068_v47  ;;  %1378 = vmatprep.subr.bf16.mxu0 %v8073_v48  ;;  %v8152_v47 = vld [vmem:[%s11843_s1 + $0x360] ss:$16 sps:$4 sm:$0xff]   ;;  %v8157_v48 = vld [vmem:[%s11843_s1 + $0x144] ss:$16 sps:$4 sm:$0xff]  }
  0x87   : > { %1421 = vmatprep.subr.bf16.mxu1 %v8076_v49  ;;  %v8160_v49 = vld [vmem:[%s11843_s1 + $0x344] ss:$16 sps:$4 sm:$0xff]  }
  0x89   : > { %1379 = vmatpush2.bf16.msra.mxu0 %v8071_v50  ;;  %v8155_v50 = vld [vmem:[%s11843_s1 + $0x140] ss:$16 sps:$4 sm:$0xff]  }
  0x8a   : > { %1422 = vmatpush2.bf16.msra.mxu1 %v8074_v51  ;;  %2078 = vmatprep.subr.bf16.mxu0 %v8079_v54  ;;  %v8158_v51 = vld [vmem:[%s11843_s1 + $0x340] ss:$16 sps:$4 sm:$0xff]   ;;  %v8163_v54 = vld [vmem:[%s11843_s1 + $0x124] ss:$16 sps:$4 sm:$0xff]  }
  0x8b   : > { %2121 = vmatprep.subr.bf16.mxu1 %v8082_v55  ;;  %v8166_v55 = vld [vmem:[%s11843_s1 + $0x324] ss:$16 sps:$4 sm:$0xff]  }
  0x8c   : > { %1381 = vmatmul.mubr.bf16.vlgmr.msra.gmra.mxu0 %v9356_v44  ;;  %v8094_v44 = vld [vmem:[%s11843_s1 + $0x2a4] ss:$16 sps:$4 sm:$0xff]  }
  0x8d   : > { %1424 = vmatmul.mubr.bf16.vlgmr.msra.gmra.mxu1 %v9359_v45  ;;  %2079 = vmatpush1.bf16.msra.mxu0 %v8077_v56  ;;  %v8089_v45 = vld [vmem:[%s11843_s1 + $0xa0] ss:$16 sps:$4 sm:$0xff]  }
  0x8e   : > { %2122 = vmatpush1.bf16.msra.mxu1 %v8080_v57  ;;  %2080 = vmatprep.subr.bf16.mxu0 %v8085_v60  ;;  %v8161_v56 = vld [vmem:[%s11843_s1 + $0x120] ss:$16 sps:$4 sm:$0xff]   ;;  %v8169_v60 = vld [vmem:[%s11843_s1 + $0x104] ss:$16 sps:$4 sm:$0xff]  }
  0x8f   : > { %2123 = vmatprep.subr.bf16.mxu1 %v8088_v61  ;;  %2110 = vmatprep.mubr.bf16.mxu0 %v9263_v52  ;;  %v8164_v57 = vld [vmem:[%s11843_s1 + $0x320] ss:$16 sps:$4 sm:$0xff]   ;;  %v8172_v61 = vld [vmem:[%s11843_s1 + $0x304] ss:$16 sps:$4 sm:$0xff]  }
  0x90   : > { %2153 = vmatprep.mubr.bf16.mxu1 %v9275_v58 }
  0x91   : > { %2081 = vmatpush1.bf16.msra.mxu0 %v8083_v62  ;;  %v8167_v62 = vld [vmem:[%s11843_s1 + $0x100] ss:$16 sps:$4 sm:$0xff]  }
  0x92   : > { %2124 = vmatpush1.bf16.msra.mxu1 %v8086_v63  ;;  %2082 = vmatprep.subr.bf16.mxu0 %v8091_v0  ;;  %v8170_v63 = vld [vmem:[%s11843_s1 + $0x300] ss:$16 sps:$4 sm:$0xff]   ;;  %v8175_v0 = vld [vmem:[%s11843_s1 + $0xec] ss:$16 sps:$4 sm:$0xff]  }
  0x93   : > { %2125 = vmatprep.subr.bf16.mxu1 %v8094_v44  ;;  %v8178_v44 = vld [vmem:[%s11843_s1 + $0x2ec] ss:$16 sps:$4 sm:$0xff]  }
  0x95   : > { %2083 = vmatpush1.bf16.msra.mxu0 %v8089_v45  ;;  %v8173_v45 = vld [vmem:[%s11843_s1 + $0xe8] ss:$16 sps:$4 sm:$0xff]  }
  0x96   : > { %2126 = vmatpush1.bf16.msra.mxu1 %v8092_v1  ;;  %2084 = vmatprep.subr.bf16.mxu0 %v8097_v2  ;;  %v8176_v1 = vld [vmem:[%s11843_s1 + $0x2e8] ss:$16 sps:$4 sm:$0xff]   ;;  %v8181_v2 = vld [vmem:[%s11843_s1 + $0xcc] ss:$16 sps:$4 sm:$0xff]  }
  0x97   : > { %2127 = vmatprep.subr.bf16.mxu1 %v8100_v3  ;;  %v8184_v3 = vld [vmem:[%s11843_s1 + $0x2cc] ss:$16 sps:$4 sm:$0xff]  }
  0x99   : > { %2085 = vmatpush1.bf16.msra.mxu0 %v8095_v4  ;;  %v8179_v4 = vld [vmem:[%s11843_s1 + $0xc8] ss:$16 sps:$4 sm:$0xff]  }
  0x9a   : > { %2128 = vmatpush1.bf16.msra.mxu1 %v8098_v5  ;;  %2086 = vmatprep.subr.bf16.mxu0 %v8103_v6  ;;  %v8182_v5 = vld [vmem:[%s11843_s1 + $0x2c8] ss:$16 sps:$4 sm:$0xff]   ;;  %v8187_v6 = vld [vmem:[%s11843_s1 + $0xac] ss:$16 sps:$4 sm:$0xff]  }
  0x9b   : > { %2129 = vmatprep.subr.bf16.mxu1 %v8106_v9  ;;  %v8190_v9 = vld [vmem:[%s11843_s1 + $0x2ac] ss:$16 sps:$4 sm:$0xff]  }
  0x9d   : > { %2087 = vmatpush1.bf16.msra.mxu0 %v8101_v10  ;;  %v8185_v10 = vld [vmem:[%s11843_s1 + $0xa8] ss:$16 sps:$4 sm:$0xff]  }
  0x9e   : > { %2130 = vmatpush1.bf16.msra.mxu1 %v8104_v11  ;;  %2088 = vmatprep.subr.bf16.mxu0 %v8109_v12  ;;  %v8188_v11 = vld [vmem:[%s11843_s1 + $0x2a8] ss:$16 sps:$4 sm:$0xff]   ;;  %v8193_v12 = vld [vmem:[%s11843_s1 + $0x8c] ss:$16 sps:$4 sm:$0xff]  }
  0x9f   : > { %2131 = vmatprep.subr.bf16.mxu1 %v8112_v13  ;;  %v8194_v13 = vld [vmem:[%s11843_s1 + $0x288] ss:$16 sps:$4 sm:$0xff]  }
  0xa1   : > { %2089 = vmatpush1.bf16.msra.mxu0 %v8107_v14  ;;  %v8199_v14 = vld [vmem:[%s11843_s1 + $0x6c] ss:$16 sps:$4 sm:$0xff]  }
  0xa2   : > { %2132 = vmatpush1.bf16.msra.mxu1 %v8110_v15  ;;  %2090 = vmatprep.subr.bf16.mxu0 %v8115_v17  ;;  %v8202_v15 = vld [vmem:[%s11843_s1 + $0x26c] ss:$16 sps:$4 sm:$0xff]   ;;  %v8197_v17 = vld [vmem:[%s11843_s1 + $0x68] ss:$16 sps:$4 sm:$0xff]  }
  0xa3   : > { %2133 = vmatprep.subr.bf16.mxu1 %v8118_v18  ;;  %v8200_v18 = vld [vmem:[%s11843_s1 + $0x268] ss:$16 sps:$4 sm:$0xff]  }
  0xa5   : > { %2091 = vmatpush1.bf16.msra.mxu0 %v8113_v19  ;;  %v8205_v19 = vld [vmem:[%s11843_s1 + $0x4c] ss:$16 sps:$4 sm:$0xff]  }
  0xa6   : > { %2134 = vmatpush1.bf16.msra.mxu1 %v8116_v21  ;;  %2092 = vmatprep.subr.bf16.mxu0 %v8121_v22  ;;  %v8208_v21 = vld [vmem:[%s11843_s1 + $0x24c] ss:$16 sps:$4 sm:$0xff]   ;;  %v8203_v22 = vld [vmem:[%s11843_s1 + $0x48] ss:$16 sps:$4 sm:$0xff]  }
  0xa7   : > { %2135 = vmatprep.subr.bf16.mxu1 %v8124_v23  ;;  %v8206_v23 = vld [vmem:[%s11843_s1 + $0x248] ss:$16 sps:$4 sm:$0xff]  }
  0xa9   : > { %2093 = vmatpush1.bf16.msra.mxu0 %v8119_v24  ;;  %v8211_v24 = vld [vmem:[%s11843_s1 + $0x2c] ss:$16 sps:$4 sm:$0xff]  }
  0xaa   : > { %2136 = vmatpush1.bf16.msra.mxu1 %v8122_v25  ;;  %2094 = vmatprep.subr.bf16.mxu0 %v8127_v26  ;;  %v8214_v25 = vld [vmem:[%s11843_s1 + $0x22c] ss:$16 sps:$4 sm:$0xff]   ;;  %v8209_v26 = vld [vmem:[%s11843_s1 + $0x28] ss:$16 sps:$4 sm:$0xff]  }
  0xab   : > { %2137 = vmatprep.subr.bf16.mxu1 %v8130_v27  ;;  %v8212_v27 = vld [vmem:[%s11843_s1 + $0x228] ss:$16 sps:$4 sm:$0xff]  }
  0xad   : > { %2095 = vmatpush2.bf16.msra.mxu0 %v8125_v28  ;;  %v8217_v28 = vld [vmem:[%s11843_s1 + $0xc] ss:$16 sps:$4 sm:$0xff]  }
  0xae   : > { %2138 = vmatpush2.bf16.msra.mxu1 %v8128_v29  ;;  %2096 = vmatprep.subr.bf16.mxu0 %v8133_v30  ;;  %v8220_v29 = vld [vmem:[%s11843_s1 + $0x20c] ss:$16 sps:$4 sm:$0xff]   ;;  %v8215_v30 = vld [vmem:[%s11843_s1 + $0x8] ss:$16 sps:$4 sm:$0xff]  }
  0xaf   : > { %2139 = vmatprep.subr.bf16.mxu1 %v8136_v31  ;;  %v8218_v31 = vld [vmem:[%s11843_s1 + $0x208] ss:$16 sps:$4 sm:$0xff]  }
  0xb1   : > { %2097 = vmatpush2.bf16.msra.mxu0 %v8131_v32  ;;  %v8223_v32 = vld [vmem:[%s11843_s1 + $0x1ec] ss:$16 sps:$4 sm:$0xff]  }
  0xb2   : > { %2140 = vmatpush2.bf16.msra.mxu1 %v8134_v33  ;;  %2098 = vmatprep.subr.bf16.mxu0 %v8139_v34  ;;  %v8226_v33 = vld [vmem:[%s11843_s1 + $0x3ec] ss:$16 sps:$4 sm:$0xff]   ;;  %v8221_v34 = vld [vmem:[%s11843_s1 + $0x1e8] ss:$16 sps:$4 sm:$0xff]  }
  0xb3   : > { %2141 = vmatprep.subr.bf16.mxu1 %v8142_v35  ;;  %v8224_v35 = vld [vmem:[%s11843_s1 + $0x3e8] ss:$16 sps:$4 sm:$0xff]  }
  0xb5   : > { %2099 = vmatpush2.bf16.msra.mxu0 %v8137_v36  ;;  %v8229_v36 = vld [vmem:[%s11843_s1 + $0x1cc] ss:$16 sps:$4 sm:$0xff]  }
  0xb6   : > { %2142 = vmatpush2.bf16.msra.mxu1 %v8140_v37  ;;  %2100 = vmatprep.subr.bf16.mxu0 %v8145_v38  ;;  %v8232_v37 = vld [vmem:[%s11843_s1 + $0x3cc] ss:$16 sps:$4 sm:$0xff]   ;;  %v8227_v38 = vld [vmem:[%s11843_s1 + $0x1c8] ss:$16 sps:$4 sm:$0xff]  }
  0xb7   : > { %2143 = vmatprep.subr.bf16.mxu1 %v8148_v39  ;;  %v8230_v39 = vld [vmem:[%s11843_s1 + $0x3c8] ss:$16 sps:$4 sm:$0xff]  }
  0xb9   : > { %2101 = vmatpush2.bf16.msra.mxu0 %v8143_v40  ;;  %v8235_v40 = vld [vmem:[%s11843_s1 + $0x1ac] ss:$16 sps:$4 sm:$0xff]  }
  0xba   : > { %2144 = vmatpush2.bf16.msra.mxu1 %v8146_v41  ;;  %2102 = vmatprep.subr.bf16.mxu0 %v8151_v42  ;;  %v8238_v41 = vld [vmem:[%s11843_s1 + $0x3ac] ss:$16 sps:$4 sm:$0xff]   ;;  %v8233_v42 = vld [vmem:[%s11843_s1 + $0x1a8] ss:$16 sps:$4 sm:$0xff]  }
  0xbb   : > { %2145 = vmatprep.subr.bf16.mxu1 %v8154_v43  ;;  %v8236_v43 = vld [vmem:[%s11843_s1 + $0x3a8] ss:$16 sps:$4 sm:$0xff]  }
  0xbd   : > { %2103 = vmatpush2.bf16.msra.mxu0 %v8149_v46  ;;  %v8241_v46 = vld [vmem:[%s11843_s1 + $0x18c] ss:$16 sps:$4 sm:$0xff]  }
  0xbe   : > { %2146 = vmatpush2.bf16.msra.mxu1 %v8152_v47  ;;  %2104 = vmatprep.subr.bf16.mxu0 %v8157_v48  ;;  %v8244_v47 = vld [vmem:[%s11843_s1 + $0x38c] ss:$16 sps:$4 sm:$0xff]   ;;  %v8239_v48 = vld [vmem:[%s11843_s1 + $0x188] ss:$16 sps:$4 sm:$0xff]  }
  0xbf   : > { %2147 = vmatprep.subr.bf16.mxu1 %v8160_v49  ;;  %v8242_v49 = vld [vmem:[%s11843_s1 + $0x388] ss:$16 sps:$4 sm:$0xff]  }
  0xc1   : > { %2105 = vmatpush2.bf16.msra.mxu0 %v8155_v50  ;;  %v8247_v50 = vld [vmem:[%s11843_s1 + $0x16c] ss:$16 sps:$4 sm:$0xff]  }
  0xc2   : > { %2148 = vmatpush2.bf16.msra.mxu1 %v8158_v51  ;;  %2106 = vmatprep.subr.bf16.mxu0 %v8163_v54  ;;  %v8250_v51 = vld [vmem:[%s11843_s1 + $0x36c] ss:$16 sps:$4 sm:$0xff]   ;;  %v8245_v54 = vld [vmem:[%s11843_s1 + $0x168] ss:$16 sps:$4 sm:$0xff]  }
  0xc3   : > { %2149 = vmatprep.subr.bf16.mxu1 %v8166_v55  ;;  %v8248_v55 = vld [vmem:[%s11843_s1 + $0x368] ss:$16 sps:$4 sm:$0xff]  }
  0xc5   : > { %2107 = vmatpush2.bf16.msra.mxu0 %v8161_v56  ;;  %v8253_v56 = vld [vmem:[%s11843_s1 + $0x14c] ss:$16 sps:$4 sm:$0xff]  }
  0xc6   : > { %2150 = vmatpush2.bf16.msra.mxu1 %v8164_v57  ;;  %2108 = vmatprep.subr.bf16.mxu0 %v8169_v60  ;;  %v8256_v57 = vld [vmem:[%s11843_s1 + $0x34c] ss:$16 sps:$4 sm:$0xff]   ;;  %v8251_v60 = vld [vmem:[%s11843_s1 + $0x148] ss:$16 sps:$4 sm:$0xff]  }
  0xc7   : > { %2151 = vmatprep.subr.bf16.mxu1 %v8172_v61  ;;  %v8254_v61 = vld [vmem:[%s11843_s1 + $0x348] ss:$16 sps:$4 sm:$0xff]  }
  0xc9   : > { %2109 = vmatpush2.bf16.msra.mxu0 %v8167_v62  ;;  %v8259_v62 = vld [vmem:[%s11843_s1 + $0x12c] ss:$16 sps:$4 sm:$0xff]  }
  0xca   : > { %2152 = vmatpush2.bf16.msra.mxu1 %v8170_v63  ;;  %2164 = vmatprep.subr.bf16.mxu0 %v8175_v0  ;;  %v8262_v63 = vld [vmem:[%s11843_s1 + $0x32c] ss:$16 sps:$4 sm:$0xff]   ;;  %v8257_v0 = vld [vmem:[%s11843_s1 + $0x128] ss:$16 sps:$4 sm:$0xff]  }
  0xcb   : > { %2207 = vmatprep.subr.bf16.mxu1 %v8178_v44  ;;  %v8260_v44 = vld [vmem:[%s11843_s1 + $0x328] ss:$16 sps:$4 sm:$0xff]  }
  0xcc   : > { %2111 = vmatmul.mubr.bf16.vlgmr.msra.gmra.mxu0 %v9294_v7 }
  0xcd   : > { %2154 = vmatmul.mubr.bf16.vlgmr.msra.gmra.mxu1 %v9296_v8  ;;  %2165 = vmatpush1.bf16.msra.mxu0 %v8173_v45  ;;  %v8265_v45 = vld [vmem:[%s11843_s1 + $0x10c] ss:$16 sps:$4 sm:$0xff]  }
  0xce   : > { %2208 = vmatpush1.bf16.msra.mxu1 %v8176_v1  ;;  %2166 = vmatprep.subr.bf16.mxu0 %v8181_v2  ;;  %v9927_v1 = vld [vmem:[%s9245_s10] sm:$0xee]  ;;  %v9930_v2 = vld [vmem:[%s9245_s10 + $0x8] sm:$0xee] }
  0xcf   : > { %2209 = vmatprep.subr.bf16.mxu1 %v8184_v3  ;;  %2196 = vmatprep.mubr.bf16.mxu0 %v9263_v52  ;;  %v8196_v52 = vld [vmem:[%s11843_s1 + $0x28c] ss:$16 sps:$4 sm:$0xff]  }
  0xd0   : > { %2239 = vmatprep.mubr.bf16.mxu1 %v9275_v58  ;;  %v8191_v58 = vld [vmem:[%s11843_s1 + $0x88] ss:$16 sps:$4 sm:$0xff]   ;;  %v8268_v3 = vld [vmem:[%s11843_s1 + $0x30c] ss:$16 sps:$4 sm:$0xff]  }
  0xd1   : > { %2167 = vmatpush1.bf16.msra.mxu0 %v8179_v4  ;;  %v8263_v4 = vld [vmem:[%s11843_s1 + $0x108] ss:$16 sps:$4 sm:$0xff]  }
  0xd2   : > { %2210 = vmatpush1.bf16.msra.mxu1 %v8182_v5  ;;  %2168 = vmatprep.subr.bf16.mxu0 %v8187_v6  ;;  %v8266_v5 = vld [vmem:[%s11843_s1 + $0x308] ss:$16 sps:$4 sm:$0xff]   ;;  %v9942_v6 = vld [vmem:[%s9245_s10 + $0x10] sm:$0xff] }
  0xd3   : > { %2211 = vmatprep.subr.bf16.mxu1 %v8190_v9  ;;  %v7074_v9 = vcombine.high %v9927_v1, %v9942_v6 }
  0xd5   : > { %2169 = vmatpush1.bf16.msra.mxu0 %v8185_v10  ;;  %v9947_v10 = vld [vmem:[%s9245_s10 + $0x18] sm:$0xff] }
  0xd6   : > { %2212 = vmatpush1.bf16.msra.mxu1 %v8188_v11  ;;  %2170 = vmatprep.subr.bf16.mxu0 %v8193_v12  ;;  %v7076_v11 = vcombine.high %v9930_v2, %v9947_v10  ;;  %v8271_v12 = vld [vmem:[%s11843_s1 + $0x8e4] ss:$16 sps:$4 sm:$0xff]  }
  0xd7   : > { %2213 = vmatprep.subr.bf16.mxu1 %v8196_v52  ;;  %v8274_v52 = vld [vmem:[%s11843_s1 + $0xae4] ss:$16 sps:$4 sm:$0xff]  }
  0xd9   : > { %2171 = vmatpush1.bf16.msra.mxu0 %v8191_v58  ;;  %v8269_v58 = vld [vmem:[%s11843_s1 + $0x8e0] ss:$16 sps:$4 sm:$0xff]  }
  0xda   : > { %2214 = vmatpush1.bf16.msra.mxu1 %v8194_v13  ;;  %2172 = vmatprep.subr.bf16.mxu0 %v8199_v14  ;;  %v8272_v13 = vld [vmem:[%s11843_s1 + $0xae0] ss:$16 sps:$4 sm:$0xff]   ;;  %v2395_v14 = vrot.slane %v7074_v9, 1 }
  0xdb   : > { %2215 = vmatprep.subr.bf16.mxu1 %v8202_v15  ;;  %v2396_v15 = vrot.slane %v9265_v53, 1  ;;  %v8275_v53 = vld [vmem:[%s11843_s1 + $0x8c0] ss:$16 sps:$4 sm:$0xff]  }
  0xdc   : > { %v8341_v9 = vld [vmem:[%s11843_s1 + $0x960] ss:$16 sps:$4 sm:$0xff]  }
  0xdd   : > { %2173 = vmatpush1.bf16.msra.mxu0 %v8197_v17  ;;  %v2401_v17 = vrot.slane %v7076_v11, 1  ;;  %v8344_v11 = vld [vmem:[%s11843_s1 + $0xb60] ss:$16 sps:$4 sm:$0xff]  }
  0xde   : > { %2216 = vmatpush1.bf16.msra.mxu1 %v8200_v18  ;;  %2174 = vmatprep.subr.bf16.mxu0 %v8205_v19  ;;  %v2402_v18 = vrot.slane %v9277_v59, 1  ;;  %v8277_v19 = vld [vmem:[%s11843_s1 + $0x8c4] ss:$16 sps:$4 sm:$0xff]   ;;  %v8278_v59 = vld [vmem:[%s11843_s1 + $0xac0] ss:$16 sps:$4 sm:$0xff]  }
  0xdf   : > { %2217 = vmatprep.subr.bf16.mxu1 %v8208_v21  ;;  %v8280_v21 = vld [vmem:[%s11843_s1 + $0xac4] ss:$16 sps:$4 sm:$0xff]  }
  0xe1   : > { %2175 = vmatpush1.bf16.msra.mxu0 %v8203_v22  ;;  %v9980_v22 = vsel %vm2391_vm1, %v2395_v14, %v2396_v15  ;;  %v8355_v14 = vld [vmem:[%s11843_s1 + $0x924] ss:$16 sps:$4 sm:$0xff]  }
  0xe2   : > { %2218 = vmatpush1.bf16.msra.mxu1 %v8206_v23  ;;  %2176 = vmatprep.subr.bf16.mxu0 %v8211_v24  ;;  %v9983_v23 = vsel %vm2391_vm1, %v2401_v17, %v2402_v18  ;;  %v8281_v24 = vld [vmem:[%s11843_s1 + $0x8a0] ss:$16 sps:$4 sm:$0xff]   ;;  %v8358_v15 = vld [vmem:[%s11843_s1 + $0xb24] ss:$16 sps:$4 sm:$0xff]  }
  0xe3   : > { %2219 = vmatprep.subr.bf16.mxu1 %v8214_v25  ;;  %v8284_v25 = vld [vmem:[%s11843_s1 + $0xaa0] ss:$16 sps:$4 sm:$0xff]  }
  0xe5   : > { %2177 = vmatpush1.bf16.msra.mxu0 %v8209_v26  ;;  %v8289_v26 = vld [vmem:[%s11843_s1 + $0x884] ss:$16 sps:$4 sm:$0xff]  }
  0xe6   : > { %2220 = vmatpush1.bf16.msra.mxu1 %v8212_v27  ;;  %2178 = vmatprep.subr.bf16.mxu0 %v8217_v28  ;;  %v8292_v27 = vld [vmem:[%s11843_s1 + $0xa84] ss:$16 sps:$4 sm:$0xff]   ;;  %v8287_v28 = vld [vmem:[%s11843_s1 + $0x880] ss:$16 sps:$4 sm:$0xff]  }
  0xe7   : > { %2221 = vmatprep.subr.bf16.mxu1 %v8220_v29  ;;  %v8290_v29 = vld [vmem:[%s11843_s1 + $0xa80] ss:$16 sps:$4 sm:$0xff]  }
  0xe9   : > { %2179 = vmatpush1.bf16.msra.mxu0 %v8215_v30  ;;  %v8295_v30 = vld [vmem:[%s11843_s1 + $0x864] ss:$16 sps:$4 sm:$0xff]  }
  0xea   : > { %2222 = vmatpush1.bf16.msra.mxu1 %v8218_v31  ;;  %2180 = vmatprep.subr.bf16.mxu0 %v8223_v32  ;;  %v8298_v31 = vld [vmem:[%s11843_s1 + $0xa64] ss:$16 sps:$4 sm:$0xff]   ;;  %v8293_v32 = vld [vmem:[%s11843_s1 + $0x860] ss:$16 sps:$4 sm:$0xff]  }
  0xeb   : > { %2223 = vmatprep.subr.bf16.mxu1 %v8226_v33  ;;  %v8296_v33 = vld [vmem:[%s11843_s1 + $0xa60] ss:$16 sps:$4 sm:$0xff]  }
  0xed   : > { %2181 = vmatpush2.bf16.msra.mxu0 %v8221_v34  ;;  %v8301_v34 = vld [vmem:[%s11843_s1 + $0x844] ss:$16 sps:$4 sm:$0xff]  }
  0xee   : > { %2224 = vmatpush2.bf16.msra.mxu1 %v8224_v35  ;;  %2182 = vmatprep.subr.bf16.mxu0 %v8229_v36  ;;  %v8304_v35 = vld [vmem:[%s11843_s1 + $0xa44] ss:$16 sps:$4 sm:$0xff]   ;;  %v8299_v36 = vld [vmem:[%s11843_s1 + $0x840] ss:$16 sps:$4 sm:$0xff]  }
  0xef   : > { %2225 = vmatprep.subr.bf16.mxu1 %v8232_v37  ;;  %v8302_v37 = vld [vmem:[%s11843_s1 + $0xa40] ss:$16 sps:$4 sm:$0xff]  }
  0xf1   : > { %2183 = vmatpush2.bf16.msra.mxu0 %v8227_v38  ;;  %v8307_v38 = vld [vmem:[%s11843_s1 + $0x824] ss:$16 sps:$4 sm:$0xff]  }
  0xf2   : > { %2226 = vmatpush2.bf16.msra.mxu1 %v8230_v39  ;;  %2184 = vmatprep.subr.bf16.mxu0 %v8235_v40  ;;  %v8310_v39 = vld [vmem:[%s11843_s1 + $0xa24] ss:$16 sps:$4 sm:$0xff]   ;;  %v8305_v40 = vld [vmem:[%s11843_s1 + $0x820] ss:$16 sps:$4 sm:$0xff]  }
  0xf3   : > { %2227 = vmatprep.subr.bf16.mxu1 %v8238_v41  ;;  %v8308_v41 = vld [vmem:[%s11843_s1 + $0xa20] ss:$16 sps:$4 sm:$0xff]  }
  0xf5   : > { %2185 = vmatpush2.bf16.msra.mxu0 %v8233_v42  ;;  %v8313_v42 = vld [vmem:[%s11843_s1 + $0x804] ss:$16 sps:$4 sm:$0xff]  }
  0xf6   : > { %2228 = vmatpush2.bf16.msra.mxu1 %v8236_v43  ;;  %2186 = vmatprep.subr.bf16.mxu0 %v8241_v46  ;;  %v8316_v43 = vld [vmem:[%s11843_s1 + $0xa04] ss:$16 sps:$4 sm:$0xff]   ;;  %v8311_v46 = vld [vmem:[%s11843_s1 + $0x800] ss:$16 sps:$4 sm:$0xff]  }
  0xf7   : > { %2229 = vmatprep.subr.bf16.mxu1 %v8244_v47  ;;  %v8314_v47 = vld [vmem:[%s11843_s1 + $0xa00] ss:$16 sps:$4 sm:$0xff]  }
  0xf9   : > { %2187 = vmatpush2.bf16.msra.mxu0 %v8239_v48  ;;  %v8319_v48 = vld [vmem:[%s11843_s1 + $0x9e4] ss:$16 sps:$4 sm:$0xff]  }
  0xfa   : > { %2230 = vmatpush2.bf16.msra.mxu1 %v8242_v49  ;;  %2188 = vmatprep.subr.bf16.mxu0 %v8247_v50  ;;  %v8322_v49 = vld [vmem:[%s11843_s1 + $0xbe4] ss:$16 sps:$4 sm:$0xff]   ;;  %v8317_v50 = vld [vmem:[%s11843_s1 + $0x9e0] ss:$16 sps:$4 sm:$0xff]  }
  0xfb   : > { %2231 = vmatprep.subr.bf16.mxu1 %v8250_v51  ;;  %v8320_v51 = vld [vmem:[%s11843_s1 + $0xbe0] ss:$16 sps:$4 sm:$0xff]  }
  0xfd   : > { %2189 = vmatpush2.bf16.msra.mxu0 %v8245_v54  ;;  %v8325_v54 = vld [vmem:[%s11843_s1 + $0x9c4] ss:$16 sps:$4 sm:$0xff]  }
  0xfe   : > { %2232 = vmatpush2.bf16.msra.mxu1 %v8248_v55  ;;  %2190 = vmatprep.subr.bf16.mxu0 %v8253_v56  ;;  %v8328_v55 = vld [vmem:[%s11843_s1 + $0xbc4] ss:$16 sps:$4 sm:$0xff]   ;;  %v8323_v56 = vld [vmem:[%s11843_s1 + $0x9c0] ss:$16 sps:$4 sm:$0xff]  }
  0xff   : > { %2233 = vmatprep.subr.bf16.mxu1 %v8256_v57  ;;  %v8326_v57 = vld [vmem:[%s11843_s1 + $0xbc0] ss:$16 sps:$4 sm:$0xff]  }
 0x101   : > { %2191 = vmatpush2.bf16.msra.mxu0 %v8251_v60  ;;  %v8331_v60 = vld [vmem:[%s11843_s1 + $0x9a4] ss:$16 sps:$4 sm:$0xff]  }
 0x102   : > { %2234 = vmatpush2.bf16.msra.mxu1 %v8254_v61  ;;  %2192 = vmatprep.subr.bf16.mxu0 %v8259_v62  ;;  %v8334_v61 = vld [vmem:[%s11843_s1 + $0xba4] ss:$16 sps:$4 sm:$0xff]   ;;  %v8329_v62 = vld [vmem:[%s11843_s1 + $0x9a0] ss:$16 sps:$4 sm:$0xff]  }
 0x103   : > { %2235 = vmatprep.subr.bf16.mxu1 %v8262_v63  ;;  %v8332_v63 = vld [vmem:[%s11843_s1 + $0xba0] ss:$16 sps:$4 sm:$0xff]  }
 0x105   : > { %2193 = vmatpush2.bf16.msra.mxu0 %v8257_v0  ;;  %v8337_v0 = vld [vmem:[%s11843_s1 + $0x984] ss:$16 sps:$4 sm:$0xff]  }
 0x106   : > { %2236 = vmatpush2.bf16.msra.mxu1 %v8260_v44  ;;  %2194 = vmatprep.subr.bf16.mxu0 %v8265_v45  ;;  %v8340_v44 = vld [vmem:[%s11843_s1 + $0xb84] ss:$16 sps:$4 sm:$0xff]   ;;  %v8335_v45 = vld [vmem:[%s11843_s1 + $0x980] ss:$16 sps:$4 sm:$0xff]  }
 0x107   : > { %2237 = vmatprep.subr.bf16.mxu1 %v8268_v3  ;;  %v8338_v3 = vld [vmem:[%s11843_s1 + $0xb80] ss:$16 sps:$4 sm:$0xff]  }
 0x109   : > { %2195 = vmatpush2.bf16.msra.mxu0 %v8263_v4  ;;  %v8343_v4 = vld [vmem:[%s11843_s1 + $0x964] ss:$16 sps:$4 sm:$0xff]  }
 0x10a   : > { %2238 = vmatpush2.bf16.msra.mxu1 %v8266_v5  ;;  %3048 = vmatprep.subr.bf16.mxu0 %v8271_v12  ;;  %v8346_v5 = vld [vmem:[%s11843_s1 + $0xb64] ss:$16 sps:$4 sm:$0xff]  }
 0x10b   : > { %3091 = vmatprep.subr.bf16.mxu1 %v8274_v52  ;;  %v8349_v12 = vld [vmem:[%s11843_s1 + $0x944] ss:$16 sps:$4 sm:$0xff]  }
 0x10c   : > { %2197 = vmatmul.mubr.bf16.vlgmr.msra.gmra.mxu0 %v9294_v7  ;;  %v8283_v7 = vld [vmem:[%s11843_s1 + $0x8a4] ss:$16 sps:$4 sm:$0xff]   ;;  %v10137_v17 = vpop.f32.mrf.mxu0 }
 0x10d   : > { %2240 = vmatmul.mubr.bf16.vlgmr.msra.gmra.mxu1 %v9296_v8  ;;  %3049 = vmatpush1.bf16.msra.mxu0 %v8269_v58  ;;  %v8286_v8 = vld [vmem:[%s11843_s1 + $0xaa4] ss:$16 sps:$4 sm:$0xff]   ;;  %v8347_v58 = vld [vmem:[%s11843_s1 + $0x940] ss:$16 sps:$4 sm:$0xff]   ;;  %v10139_v18 = vpop.f32.mrf.mxu1 }
 0x10e   : > { %3092 = vmatpush1.bf16.msra.mxu1 %v8272_v13  ;;  %3050 = vmatprep.subr.bf16.mxu0 %v8277_v19  ;;  %v8352_v52 = vld [vmem:[%s11843_s1 + $0xb44] ss:$16 sps:$4 sm:$0xff]   ;;  %v8350_v13 = vld [vmem:[%s11843_s1 + $0xb40] ss:$16 sps:$4 sm:$0xff]  }
 0x10f   : > { %3093 = vmatprep.subr.bf16.mxu1 %v8280_v21  ;;  %3080 = vmatprep.mubr.bf16.mxu0 %v9980_v22  ;;  %v8353_v19 = vld [vmem:[%s11843_s1 + $0x920] ss:$16 sps:$4 sm:$0xff]  }
 0x110   : > { %3123 = vmatprep.mubr.bf16.mxu1 %v9983_v23  ;;  %v8356_v21 = vld [vmem:[%s11843_s1 + $0xb20] ss:$16 sps:$4 sm:$0xff]  }
 0x111   : > { %3051 = vmatpush1.bf16.msra.mxu0 %v8275_v53  ;;  %v8361_v53 = vld [vmem:[%s11843_s1 + $0x904] ss:$16 sps:$4 sm:$0xff]  }
 0x112   : > { %3094 = vmatpush1.bf16.msra.mxu1 %v8278_v59  ;;  %3052 = vmatprep.subr.bf16.mxu0 %v8283_v7  ;;  %v8364_v59 = vld [vmem:[%s11843_s1 + $0xb04] ss:$16 sps:$4 sm:$0xff]   ;;  %v7073_v7 = vcombine.low %v9927_v1, %v9942_v6  ;;  %v8371_v1 = vld [vmem:[%s11843_s1 + $0x8ec] ss:$16 sps:$4 sm:$0xff]  }
 0x113   : > { %3095 = vmatprep.subr.bf16.mxu1 %v8286_v8  ;;  %v7075_v8 = vcombine.low %v9930_v2, %v9947_v10  ;;  %v8374_v2 = vld [vmem:[%s11843_s1 + $0xaec] ss:$16 sps:$4 sm:$0xff]  }
 0x114   : > { %v2392_v6 = vrot.slane %v7073_v7, 1  ;;  %v8417_v7 = vld [vmem:[%s11843_s1 + $0x9e8] ss:$16 sps:$4 sm:$0xff]  }
 0x115   : > { %3053 = vmatpush1.bf16.msra.mxu0 %v8281_v24  ;;  %v10157_v24 = vpop.f32.mrf.mxu0  ;;  %v2398_v10 = vrot.slane %v7075_v8, 1  ;;  %v8420_v8 = vld [vmem:[%s11843_s1 + $0xbe8] ss:$16 sps:$4 sm:$0xff]  }
 0x116   : > { %3096 = vmatpush1.bf16.msra.mxu1 %v8284_v25  ;;  %3054 = vmatprep.subr.bf16.mxu0 %v8289_v26  ;;  %v10159_v25 = vpop.f32.mrf.mxu1  ;;  %v8359_v26 = vld [vmem:[%s11843_s1 + $0x900] ss:$16 sps:$4 sm:$0xff]  }
 0x117   : > { %3097 = vmatprep.subr.bf16.mxu1 %v8292_v27  ;;  %v8362_v27 = vld [vmem:[%s11843_s1 + $0xb00] ss:$16 sps:$4 sm:$0xff]  }
 0x119   : > { %3055 = vmatpush1.bf16.msra.mxu0 %v8287_v28  ;;  %v2393_v28 = vrot.slane %v9307_v16, 1  ;;  %v8369_v16 = vld [vmem:[%s11843_s1 + $0x8e8] ss:$16 sps:$4 sm:$0xff]  }
 0x11a   : > { %3098 = vmatpush1.bf16.msra.mxu1 %v8290_v29  ;;  %3056 = vmatprep.subr.bf16.mxu0 %v8295_v30  ;;  %v2399_v29 = vrot.slane %v9314_v20, 1  ;;  %v10175_v30 = vpop.f32.mrf.mxu0  ;;  %v8380_v20 = vld [vmem:[%s11843_s1 + $0xacc] ss:$16 sps:$4 sm:$0xff]  }
 0x11b   : > { %3099 = vmatprep.subr.bf16.mxu1 %v8298_v31  ;;  %v10177_v31 = vpop.f32.mrf.mxu1 }
 0x11d   : > { %3057 = vmatpush1.bf16.msra.mxu0 %v8293_v32  ;;  %v8372_v32 = vld [vmem:[%s11843_s1 + $0xae8] ss:$16 sps:$4 sm:$0xff]  }
 0x11e   : > { %3100 = vmatpush1.bf16.msra.mxu1 %v8296_v33  ;;  %3058 = vmatprep.subr.bf16.mxu0 %v8301_v34  ;;  %v8377_v33 = vld [vmem:[%s11843_s1 + $0x8cc] ss:$16 sps:$4 sm:$0xff]   ;;  %v10192_v34 = vsel %vm2391_vm1, %v2392_v6, %v2393_v28  ;;  %v8423_v28 = vld [vmem:[%s11843_s1 + $0x9c8] ss:$16 sps:$4 sm:$0xff]  }
 0x11f   : > { %3101 = vmatprep.subr.bf16.mxu1 %v8304_v35  ;;  %v10195_v35 = vsel %vm2391_vm1, %v2398_v10, %v2399_v29  ;;  %v8434_v6 = vld [vmem:[%s11843_s1 + $0xbac] ss:$16 sps:$4 sm:$0xff]   ;;  %v8429_v10 = vld [vmem:[%s11843_s1 + $0x9a8] ss:$16 sps:$4 sm:$0xff]  }
 0x120   : > { %v8432_v29 = vld [vmem:[%s11843_s1 + $0xba8] ss:$16 sps:$4 sm:$0xff]  }
 0x121   : > { %3059 = vmatpush1.bf16.msra.mxu0 %v8299_v36  ;;  %v10197_v36 = vpop.f32.mrf.mxu0 }
 0x122   : > { %3102 = vmatpush1.bf16.msra.mxu1 %v8302_v37  ;;  %3060 = vmatprep.subr.bf16.mxu0 %v8307_v38  ;;  %v10199_v37 = vpop.f32.mrf.mxu1  ;;  %v8375_v38 = vld [vmem:[%s11843_s1 + $0x8c8] ss:$16 sps:$4 sm:$0xff]  }
 0x123   : > { %3103 = vmatprep.subr.bf16.mxu1 %v8310_v39  ;;  %v8378_v39 = vld [vmem:[%s11843_s1 + $0xac8] ss:$16 sps:$4 sm:$0xff]  }
 0x125   : > { %3061 = vmatpush1.bf16.msra.mxu0 %v8305_v40 }
 0x126   : > { %3104 = vmatpush1.bf16.msra.mxu1 %v8308_v41  ;;  %3062 = vmatprep.subr.bf16.mxu0 %v8313_v42  ;;  %v8383_v42 = vld [vmem:[%s11843_s1 + $0x8ac] ss:$16 sps:$4 sm:$0xff]  }
 0x127   : > { %3105 = vmatprep.subr.bf16.mxu1 %v8316_v43  ;;  %v8386_v43 = vld [vmem:[%s11843_s1 + $0xaac] ss:$16 sps:$4 sm:$0xff]  }
 0x129   : > { %3063 = vmatpush1.bf16.msra.mxu0 %v8311_v46 }
 0x12a   : > { %3106 = vmatpush1.bf16.msra.mxu1 %v8314_v47  ;;  %3064 = vmatprep.subr.bf16.mxu0 %v8319_v48 }
 0x12b   : > { %3107 = vmatprep.subr.bf16.mxu1 %v8322_v49 }
 0x12d   : > { %3065 = vmatpush2.bf16.msra.mxu0 %v8317_v50  ;;  %v8381_v50 = vld [vmem:[%s11843_s1 + $0x8a8] ss:$16 sps:$4 sm:$0xff]  }
 0x12e   : > { %3108 = vmatpush2.bf16.msra.mxu1 %v8320_v51  ;;  %3066 = vmatprep.subr.bf16.mxu0 %v8325_v54  ;;  %v8384_v51 = vld [vmem:[%s11843_s1 + $0xaa8] ss:$16 sps:$4 sm:$0xff]  }
 0x12f   : > { %3109 = vmatprep.subr.bf16.mxu1 %v8328_v55 }
 0x131   : > { %3067 = vmatpush2.bf16.msra.mxu0 %v8323_v56  ;;  %v8389_v56 = vld [vmem:[%s11843_s1 + $0x88c] ss:$16 sps:$4 sm:$0xff]  }
 0x132   : > { %3110 = vmatpush2.bf16.msra.mxu1 %v8326_v57  ;;  %3068 = vmatprep.subr.bf16.mxu0 %v8331_v60  ;;  %v8392_v57 = vld [vmem:[%s11843_s1 + $0xa8c] ss:$16 sps:$4 sm:$0xff]  }
 0x133   : > { %3111 = vmatprep.subr.bf16.mxu1 %v8334_v61 }
 0x135   : > { %3069 = vmatpush2.bf16.msra.mxu0 %v8329_v62 }
 0x136   : > { %3112 = vmatpush2.bf16.msra.mxu1 %v8332_v63  ;;  %3070 = vmatprep.subr.bf16.mxu0 %v8337_v0  ;;  %v8390_v63 = vld [vmem:[%s11843_s1 + $0xa88] ss:$16 sps:$4 sm:$0xff]   ;;  %v8395_v0 = vld [vmem:[%s11843_s1 + $0x86c] ss:$16 sps:$4 sm:$0xff]  }
 0x137   : > { %3113 = vmatprep.subr.bf16.mxu1 %v8340_v44  ;;  %v8398_v44 = vld [vmem:[%s11843_s1 + $0xa6c] ss:$16 sps:$4 sm:$0xff]  }
 0x139   : > { %3071 = vmatpush2.bf16.msra.mxu0 %v8335_v45  ;;  %v8393_v45 = vld [vmem:[%s11843_s1 + $0x868] ss:$16 sps:$4 sm:$0xff]  }
 0x13a   : > { %3114 = vmatpush2.bf16.msra.mxu1 %v8338_v3  ;;  %3072 = vmatprep.subr.bf16.mxu0 %v8343_v4  ;;  %v8396_v3 = vld [vmem:[%s11843_s1 + $0xa68] ss:$16 sps:$4 sm:$0xff]   ;;  %v8401_v4 = vld [vmem:[%s11843_s1 + $0x84c] ss:$16 sps:$4 sm:$0xff]  }
 0x13b   : > { %3115 = vmatprep.subr.bf16.mxu1 %v8346_v5  ;;  %v8404_v5 = vld [vmem:[%s11843_s1 + $0xa4c] ss:$16 sps:$4 sm:$0xff]  }
 0x13d   : > { %3073 = vmatpush2.bf16.msra.mxu0 %v8341_v9  ;;  %v8399_v9 = vld [vmem:[%s11843_s1 + $0x848] ss:$16 sps:$4 sm:$0xff]  }
 0x13e   : > { %3116 = vmatpush2.bf16.msra.mxu1 %v8344_v11  ;;  %3074 = vmatprep.subr.bf16.mxu0 %v8349_v12  ;;  %v8402_v11 = vld [vmem:[%s11843_s1 + $0xa48] ss:$16 sps:$4 sm:$0xff]   ;;  %v8407_v12 = vld [vmem:[%s11843_s1 + $0x82c] ss:$16 sps:$4 sm:$0xff]  }
 0x13f   : > { %3117 = vmatprep.subr.bf16.mxu1 %v8352_v52  ;;  %v8410_v52 = vld [vmem:[%s11843_s1 + $0xa2c] ss:$16 sps:$4 sm:$0xff]  }
 0x141   : > { %3075 = vmatpush2.bf16.msra.mxu0 %v8347_v58  ;;  %v8405_v58 = vld [vmem:[%s11843_s1 + $0x828] ss:$16 sps:$4 sm:$0xff]  }
 0x142   : > { %3118 = vmatpush2.bf16.msra.mxu1 %v8350_v13  ;;  %3076 = vmatprep.subr.bf16.mxu0 %v8355_v14  ;;  %v8408_v13 = vld [vmem:[%s11843_s1 + $0xa28] ss:$16 sps:$4 sm:$0xff]   ;;  %v8413_v14 = vld [vmem:[%s11843_s1 + $0x80c] ss:$16 sps:$4 sm:$0xff]  }
 0x143   : > { %3119 = vmatprep.subr.bf16.mxu1 %v8358_v15  ;;  %v8416_v15 = vld [vmem:[%s11843_s1 + $0xa0c] ss:$16 sps:$4 sm:$0xff]  }
 0x145   : > { %3077 = vmatpush2.bf16.msra.mxu0 %v8353_v19  ;;  %v8411_v19 = vld [vmem:[%s11843_s1 + $0x808] ss:$16 sps:$4 sm:$0xff]  }
 0x146   : > { %3120 = vmatpush2.bf16.msra.mxu1 %v8356_v21  ;;  %3078 = vmatprep.subr.bf16.mxu0 %v8361_v53  ;;  %v8414_v21 = vld [vmem:[%s11843_s1 + $0xa08] ss:$16 sps:$4 sm:$0xff]   ;;  %v8419_v53 = vld [vmem:[%s11843_s1 + $0x9ec] ss:$16 sps:$4 sm:$0xff]  }
 0x147   : > { %3121 = vmatprep.subr.bf16.mxu1 %v8364_v59  ;;  %v8422_v59 = vld [vmem:[%s11843_s1 + $0xbec] ss:$16 sps:$4 sm:$0xff]  }
 0x149   : > { %3079 = vmatpush2.bf16.msra.mxu0 %v8359_v26  ;;  %v8425_v26 = vld [vmem:[%s11843_s1 + $0x9cc] ss:$16 sps:$4 sm:$0xff]  }
 0x14a   : > { %3122 = vmatpush2.bf16.msra.mxu1 %v8362_v27  ;;  %3134 = vmatprep.subr.bf16.mxu0 %v8371_v1  ;;  %v8428_v27 = vld [vmem:[%s11843_s1 + $0xbcc] ss:$16 sps:$4 sm:$0xff]   ;;  %v8426_v1 = vld [vmem:[%s11843_s1 + $0xbc8] ss:$16 sps:$4 sm:$0xff]  }
 0x14b   : > { %3177 = vmatprep.subr.bf16.mxu1 %v8374_v2  ;;  %v8431_v2 = vld [vmem:[%s11843_s1 + $0x9ac] ss:$16 sps:$4 sm:$0xff]  }
 0x14c   : > { %v1382_v40 = vpop.f32.mrf.mxu0  ;;  %3081 = vmatmul.mubr.bf16.vlgmr.msra.gmra.mxu0 %v10192_v34 }
 0x14d   : > { %v1425_v41 = vpop.f32.mrf.mxu1  ;;  %3124 = vmatmul.mubr.bf16.vlgmr.msra.gmra.mxu1 %v10195_v35  ;;  %3135 = vmatpush1.bf16.msra.mxu0 %v8369_v16  ;;  %v8437_v16 = vld [vmem:[%s11843_s1 + $0x98c] ss:$16 sps:$4 sm:$0xff]  }
 0x14e   : > { %v10215_v46 = vadd.f32 %v1425_v41, %v1382_v40  ;;  %3178 = vmatpush1.bf16.msra.mxu1 %v8372_v32  ;;  %v1384_v47 = vpop.f32.mrf.mxu0  ;;  %3136 = vmatprep.subr.bf16.mxu0 %v8377_v33  ;;  %v8440_v32 = vld [vmem:[%s11843_s1 + $0xb8c] ss:$16 sps:$4 sm:$0xff]   ;;  %v8435_v33 = vld [vmem:[%s11843_s1 + $0x988] ss:$16 sps:$4 sm:$0xff]  }
 0x14f   : > { %v1427_v48 = vpop.f32.mrf.mxu1  ;;  %3179 = vmatprep.subr.bf16.mxu1 %v8380_v20  ;;  %3166 = vmatprep.mubr.bf16.mxu0 %v9980_v22  ;;  %v8438_v20 = vld [vmem:[%s11843_s1 + $0xb88] ss:$16 sps:$4 sm:$0xff]  }
 0x150   : > { %v10217_v49 = vadd.f32 %v1427_v48, %v1384_v47  ;;  %3209 = vmatprep.mubr.bf16.mxu1 %v9983_v23  ;;  %v1386_v54 = vpop.f32.mrf.mxu0  ;;  %v8387_v23 = vld [vmem:[%s11843_s1 + $0x888] ss:$16 sps:$4 sm:$0xff]  }
 0x151   : > { %v1429_v55 = vpop.f32.mrf.mxu1  ;;  %3137 = vmatpush1.bf16.msra.mxu0 %v8375_v38  ;;  %v8443_v38 = vld [vmem:[%s11843_s1 + $0x96c] ss:$16 sps:$4 sm:$0xff]   ;;  %v8441_v40 = vld [vmem:[%s11843_s1 + $0x968] ss:$16 sps:$4 sm:$0xff]  }
 0x152   : > { %v10233_v60 = vadd.f32 %v1429_v55, %v1386_v54  ;;  %3180 = vmatpush1.bf16.msra.mxu1 %v8378_v39  ;;  %v1388_v61 = vpop.f32.mrf.mxu0  ;;  %3138 = vmatprep.subr.bf16.mxu0 %v8383_v42  ;;  %v8446_v39 = vld [vmem:[%s11843_s1 + $0xb6c] ss:$16 sps:$4 sm:$0xff]   ;;  %v8444_v41 = vld [vmem:[%s11843_s1 + $0xb68] ss:$16 sps:$4 sm:$0xff]  }
 0x153   : > { %v1431_v62 = vpop.f32.mrf.mxu1  ;;  %3181 = vmatprep.subr.bf16.mxu1 %v8386_v43  ;;  %v8449_v42 = vld [vmem:[%s11843_s1 + $0x94c] ss:$16 sps:$4 sm:$0xff]   ;;  %v8447_v47 = vld [vmem:[%s11843_s1 + $0x948] ss:$16 sps:$4 sm:$0xff]  }
 0x154   : > { %v10235_v22 = vadd.f32 %v1431_v62, %v1388_v61  ;;  %v8452_v43 = vld [vmem:[%s11843_s1 + $0xb4c] ss:$16 sps:$4 sm:$0xff]   ;;  %v8450_v48 = vld [vmem:[%s11843_s1 + $0xb48] ss:$16 sps:$4 sm:$0xff]  }
 0x155   : > { %3139 = vmatpush1.bf16.msra.mxu0 %v8381_v50  ;;  %v8455_v50 = vld [vmem:[%s11843_s1 + $0x92c] ss:$16 sps:$4 sm:$0xff]   ;;  %v8453_v54 = vld [vmem:[%s11843_s1 + $0x928] ss:$16 sps:$4 sm:$0xff]  }
 0x156   : > { %3182 = vmatpush1.bf16.msra.mxu1 %v8384_v51  ;;  %3140 = vmatprep.subr.bf16.mxu0 %v8389_v56  ;;  %v8458_v51 = vld [vmem:[%s11843_s1 + $0xb2c] ss:$16 sps:$4 sm:$0xff]   ;;  %v8456_v55 = vld [vmem:[%s11843_s1 + $0xb28] ss:$16 sps:$4 sm:$0xff]  }
 0x157   : > { %3183 = vmatprep.subr.bf16.mxu1 %v8392_v57  ;;  %v8461_v56 = vld [vmem:[%s11843_s1 + $0x90c] ss:$16 sps:$4 sm:$0xff]   ;;  %v8459_v61 = vld [vmem:[%s11843_s1 + $0x908] ss:$16 sps:$4 sm:$0xff]  }
 0x158   : > { %v8464_v57 = vld [vmem:[%s11843_s1 + $0xb0c] ss:$16 sps:$4 sm:$0xff]   ;;  %v8462_v62 = vld [vmem:[%s11843_s1 + $0xb08] ss:$16 sps:$4 sm:$0xff]  }
 0x159   : > { %3141 = vmatpush1.bf16.msra.mxu0 %v8387_v23  ;;  %v8467_v23 = vld [vmem:[%s11846_s4 + $0x4e4] ss:$16 sps:$4 sm:$0xff]  }
 0x15a   : > { %3184 = vmatpush1.bf16.msra.mxu1 %v8390_v63  ;;  %3142 = vmatprep.subr.bf16.mxu0 %v8395_v0  ;;  %v8465_v63 = vld [vmem:[%s11846_s4 + $0x4e0] ss:$16 sps:$4 sm:$0xff]   ;;  %v8470_v0 = vld [vmem:[%s11846_s4 + $0x4c4] ss:$16 sps:$4 sm:$0xff]  }
 0x15b   : > { %3185 = vmatprep.subr.bf16.mxu1 %v8398_v44  ;;  %v8468_v44 = vld [vmem:[%s11846_s4 + $0x4c0] ss:$16 sps:$4 sm:$0xff]  }
 0x15d   : > { %3143 = vmatpush1.bf16.msra.mxu0 %v8393_v45  ;;  %v8473_v45 = vld [vmem:[%s11846_s4 + $0x4a4] ss:$16 sps:$4 sm:$0xff]  }
 0x15e   : > { %3186 = vmatpush1.bf16.msra.mxu1 %v8396_v3  ;;  %3144 = vmatprep.subr.bf16.mxu0 %v8401_v4  ;;  %v8471_v3 = vld [vmem:[%s11846_s4 + $0x4a0] ss:$16 sps:$4 sm:$0xff]   ;;  %v8479_v4 = vld [vmem:[%s11846_s4 + $0x464] ss:$16 sps:$4 sm:$0xff]  }
 0x15f   : > { %3187 = vmatprep.subr.bf16.mxu1 %v8404_v5  ;;  %v3303_v5 = vld [vmem:[#allocation2 + $0x18] sm:$0x11] }
 0x161   : > { %3145 = vmatpush1.bf16.msra.mxu0 %v8399_v9  ;;  %v8477_v9 = vld [vmem:[%s11846_s4 + $0x460] ss:$16 sps:$4 sm:$0xff]  }
 0x162   : > { %3188 = vmatpush1.bf16.msra.mxu1 %v8402_v11  ;;  %3146 = vmatprep.subr.bf16.mxu0 %v8407_v12  ;;  %v3304_v12 = vsel %vm10422_vm10, 0, %v3303_v5 }
 0x163   : > { %3189 = vmatprep.subr.bf16.mxu1 %v8410_v52  ;;  %v3314_v52 = vld [vmem:[#allocation2 + $0x8] sm:$0x11]  ;;  %3305 = vst [vmem:[#allocation2 + $0x18] sm:$0x11] %v3304_v12 }
 0x165   : > { %3147 = vmatpush1.bf16.msra.mxu0 %v8405_v58  ;;  %v3317_v58 = vld [vmem:[#allocation2] sm:$0x11] }
 0x166   : > { %3190 = vmatpush1.bf16.msra.mxu1 %v8408_v13  ;;  %3148 = vmatprep.subr.bf16.mxu0 %v8413_v14  ;;  %v8482_v13 = vld [vmem:[%s11846_s4 + $0x444] ss:$16 sps:$4 sm:$0xff]   ;;  %v3315_v14 = vsel %vm3313_vm13, 0, %v3314_v52 }
 0x167   : > { %3191 = vmatprep.subr.bf16.mxu1 %v8416_v15  ;;  %v3318_v15 = vsel %vm3313_vm13, 0, %v3317_v58  ;;  %3316 = vst [vmem:[#allocation2 + $0x8] sm:$0x11] %v3315_v14  ;;  %v8553_v52 = vld [vmem:[%s11846_s4 + $0x624] ss:$16 sps:$4 sm:$0xff]  }
 0x168   : > { %3319 = vst [vmem:[#allocation2] sm:$0x11] %v3318_v15 }
 0x169   : > { %3149 = vmatpush1.bf16.msra.mxu0 %v8411_v19  ;;  %v8480_v19 = vld [vmem:[%s11846_s4 + $0x440] ss:$16 sps:$4 sm:$0xff]  }
 0x16a   : > { %3192 = vmatpush1.bf16.msra.mxu1 %v8414_v21  ;;  %3150 = vmatprep.subr.bf16.mxu0 %v8419_v53  ;;  %v8485_v21 = vld [vmem:[%s11846_s4 + $0x424] ss:$16 sps:$4 sm:$0xff]  }
 0x16b   : > { %3193 = vmatprep.subr.bf16.mxu1 %v8422_v59  ;;  %v8598_v59 = vld [vmem:[%s11846_s4 + $0x54c] ss:$16 sps:$4 sm:$0xff]  }
 0x16d   : > { %3151 = vmatpush2.bf16.msra.mxu0 %v8417_v7  ;;  %v8483_v7 = vld [vmem:[%s11846_s4 + $0x420] ss:$16 sps:$4 sm:$0xff]  }
 0x16e   : > { %3194 = vmatpush2.bf16.msra.mxu1 %v8420_v8  ;;  %3152 = vmatprep.subr.bf16.mxu0 %v8425_v26  ;;  %v8488_v8 = vld [vmem:[%s11846_s4 + $0x404] ss:$16 sps:$4 sm:$0xff]   ;;  %v8486_v26 = vld [vmem:[%s11846_s4 + $0x400] ss:$16 sps:$4 sm:$0xff]  }
 0x16f   : > { %3195 = vmatprep.subr.bf16.mxu1 %v8428_v27  ;;  %v8491_v27 = vld [vmem:[%s11846_s4 + $0x5e4] ss:$16 sps:$4 sm:$0xff]  }
 0x171   : > { %3153 = vmatpush2.bf16.msra.mxu0 %v8423_v28  ;;  %v8489_v28 = vld [vmem:[%s11846_s4 + $0x5e0] ss:$16 sps:$4 sm:$0xff]  }
 0x172   : > { %3196 = vmatpush2.bf16.msra.mxu1 %v8426_v1  ;;  %3154 = vmatprep.subr.bf16.mxu0 %v8431_v2  ;;  %v8494_v1 = vld [vmem:[%s11846_s4 + $0x5c4] ss:$16 sps:$4 sm:$0xff]   ;;  %v8492_v2 = vld [vmem:[%s11846_s4 + $0x5c0] ss:$16 sps:$4 sm:$0xff]  }
 0x173   : > { %3197 = vmatprep.subr.bf16.mxu1 %v8434_v6  ;;  %v8497_v6 = vld [vmem:[%s11846_s4 + $0x5a4] ss:$16 sps:$4 sm:$0xff]  }
 0x175   : > { %3155 = vmatpush2.bf16.msra.mxu0 %v8429_v10  ;;  %v8495_v10 = vld [vmem:[%s11846_s4 + $0x5a0] ss:$16 sps:$4 sm:$0xff]  }
 0x176   : > { %3198 = vmatpush2.bf16.msra.mxu1 %v8432_v29  ;;  %3156 = vmatprep.subr.bf16.mxu0 %v8437_v16  ;;  %v8500_v29 = vld [vmem:[%s11846_s4 + $0x584] ss:$16 sps:$4 sm:$0xff]  }
 0x177   : > { %3199 = vmatprep.subr.bf16.mxu1 %v8440_v32  ;;  %v8516_v16 = vld [vmem:[%s11846_s4 + $0x6e4] ss:$16 sps:$4 sm:$0xff]   ;;  %v8514_v32 = vld [vmem:[%s11846_s4 + $0x6e0] ss:$16 sps:$4 sm:$0xff]  }
 0x179   : > { %3157 = vmatpush2.bf16.msra.mxu0 %v8435_v33  ;;  %v8498_v33 = vld [vmem:[%s11846_s4 + $0x580] ss:$16 sps:$4 sm:$0xff]  }
 0x17a   : > { %3200 = vmatpush2.bf16.msra.mxu1 %v8438_v20  ;;  %3158 = vmatprep.subr.bf16.mxu0 %v8443_v38  ;;  %v8503_v20 = vld [vmem:[%s11846_s4 + $0x564] ss:$16 sps:$4 sm:$0xff]   ;;  %v8521_v38 = vld [vmem:[%s11846_s4 + $0x6c0] ss:$16 sps:$4 sm:$0xff]  }
 0x17b   : > { %3201 = vmatprep.subr.bf16.mxu1 %v8446_v39  ;;  %v8523_v39 = vld [vmem:[%s11846_s4 + $0x6c4] ss:$16 sps:$4 sm:$0xff]  }
 0x17d   : > { %3159 = vmatpush2.bf16.msra.mxu0 %v8441_v40  ;;  %v8501_v40 = vld [vmem:[%s11846_s4 + $0x560] ss:$16 sps:$4 sm:$0xff]  }
 0x17e   : > { %3202 = vmatpush2.bf16.msra.mxu1 %v8444_v41  ;;  %3160 = vmatprep.subr.bf16.mxu0 %v8449_v42  ;;  %v8506_v41 = vld [vmem:[%s11846_s4 + $0x544] ss:$16 sps:$4 sm:$0xff]   ;;  %v8527_v42 = vld [vmem:[%s11846_s4 + $0x6a0] ss:$16 sps:$4 sm:$0xff]  }
 0x17f   : > { %3203 = vmatprep.subr.bf16.mxu1 %v8452_v43  ;;  %v8529_v43 = vld [vmem:[%s11846_s4 + $0x6a4] ss:$16 sps:$4 sm:$0xff]  }
 0x181   : > { %3161 = vmatpush2.bf16.msra.mxu0 %v8447_v47  ;;  %v8504_v47 = vld [vmem:[%s11846_s4 + $0x540] ss:$16 sps:$4 sm:$0xff]  }
 0x182   : > { %3204 = vmatpush2.bf16.msra.mxu1 %v8450_v48  ;;  %3162 = vmatprep.subr.bf16.mxu0 %v8455_v50 }
 0x183   : > { %3205 = vmatprep.subr.bf16.mxu1 %v8458_v51  ;;  %v8509_v51 = vld [vmem:[%s11846_s4 + $0x524] ss:$16 sps:$4 sm:$0xff]  }
 0x185   : > { %3163 = vmatpush2.bf16.msra.mxu0 %v8453_v54  ;;  %v8533_v54 = vld [vmem:[%s11846_s4 + $0x680] ss:$16 sps:$4 sm:$0xff]  }
 0x186   : > { %3206 = vmatpush2.bf16.msra.mxu1 %v8456_v55  ;;  %3164 = vmatprep.subr.bf16.mxu0 %v8461_v56  ;;  %v8535_v55 = vld [vmem:[%s11846_s4 + $0x684] ss:$16 sps:$4 sm:$0xff]   ;;  %v8507_v56 = vld [vmem:[%s11846_s4 + $0x520] ss:$16 sps:$4 sm:$0xff]  }
 0x187   : > { %3207 = vmatprep.subr.bf16.mxu1 %v8464_v57 }
 0x189   : > { %3165 = vmatpush2.bf16.msra.mxu0 %v8459_v61 }
 0x18a   : > { %3208 = vmatpush2.bf16.msra.mxu1 %v8462_v62  ;;  %4382 = vmatprep.subr.bf16.mxu0 %v8467_v23  ;;  %v8512_v62 = vld [vmem:[%s11846_s4 + $0x504] ss:$16 sps:$4 sm:$0xff]   ;;  %v8539_v23 = vld [vmem:[%s11846_s4 + $0x660] ss:$16 sps:$4 sm:$0xff]  }
 0x18b   : > { %4425 = vmatprep.subr.bf16.mxu1 %v8516_v16  ;;  %v3306_v16 = vld [vmem:[#allocation2 + $0x20] sm:$0x11] }
 0x18c   : > { %3167 = vmatmul.mubr.bf16.vlgmr.msra.gmra.mxu0 %v10192_v34  ;;  %v8476_v34 = vld [vmem:[%s11846_s4 + $0x484] ss:$16 sps:$4 sm:$0xff]   ;;  %v10518_v48 = vpop.f32.mrf.mxu0 }
 0x18d   : > { %3210 = vmatmul.mubr.bf16.vlgmr.msra.gmra.mxu1 %v10195_v35  ;;  %4383 = vmatpush1.bf16.msra.mxu0 %v8465_v63  ;;  %v8474_v35 = vld [vmem:[%s11846_s4 + $0x480] ss:$16 sps:$4 sm:$0xff]   ;;  %v10520_v50 = vpop.f32.mrf.mxu1  ;;  %v8541_v63 = vld [vmem:[%s11846_s4 + $0x664] ss:$16 sps:$4 sm:$0xff]  }
 0x18e   : > { %4384 = vmatprep.subr.bf16.mxu0 %v8470_v0  ;;  %4426 = vmatpush1.bf16.msra.mxu1 %v8514_v32  ;;  %v10534_v57 = vpop.f32.mrf.mxu0  ;;  %v8510_v0 = vld [vmem:[%s11846_s4 + $0x500] ss:$16 sps:$4 sm:$0xff]   ;;  %v3307_v32 = vsel %vm10422_vm10, 0, %v3306_v16 }
 0x18f   : > { %4427 = vmatprep.subr.bf16.mxu1 %v8523_v39  ;;  %v10536_v61 = vpop.f32.mrf.mxu1  ;;  %3308 = vst [vmem:[#allocation2 + $0x20] sm:$0x11] %v3307_v32  ;;  %v8583_v39 = vld [vmem:[%s11846_s4 + $0x784] ss:$16 sps:$4 sm:$0xff]  }
 0x191   : > { %4385 = vmatpush1.bf16.msra.mxu0 %v8468_v44  ;;  %v10550_v44 = vpop.f32.mrf.mxu0 }
 0x192   : > { %4386 = vmatprep.subr.bf16.mxu0 %v8473_v45  ;;  %4428 = vmatpush1.bf16.msra.mxu1 %v8521_v38  ;;  %v10552_v45 = vpop.f32.mrf.mxu1  ;;  %v8575_v38 = vld [vmem:[%s11846_s4 + $0x7a0] ss:$16 sps:$4 sm:$0xff]  }
 0x193   : > { %4429 = vmatprep.subr.bf16.mxu1 %v8529_v43  ;;  %v8593_v43 = vld [vmem:[%s11846_s4 + $0x740] ss:$16 sps:$4 sm:$0xff]  }
 0x194   : > { %v10565_v5 = vpop.f32.mrf.mxu1 }
 0x195   : > { %4387 = vmatpush1.bf16.msra.mxu0 %v8471_v3  ;;  %v8519_v3 = vld [vmem:[%s11846_s4 + $0x4ec] ss:$16 sps:$4 sm:$0xff]  }
 0x196   : > { %4388 = vmatprep.subr.bf16.mxu0 %v8476_v34  ;;  %4430 = vmatpush1.bf16.msra.mxu1 %v8527_v42  ;;  %v8545_v34 = vld [vmem:[%s11846_s4 + $0x640] ss:$16 sps:$4 sm:$0xff]  }
 0x197   : > { %4431 = vmatprep.subr.bf16.mxu1 %v8535_v55  ;;  %v8587_v42 = vld [vmem:[%s11846_s4 + $0x760] ss:$16 sps:$4 sm:$0xff]  }
 0x198   : > { %v8605_v55 = vld [vmem:[%s11846_s4 + $0x700] ss:$16 sps:$4 sm:$0xff]  }
 0x199   : > { %4389 = vmatpush1.bf16.msra.mxu0 %v8474_v35  ;;  %v8547_v35 = vld [vmem:[%s11846_s4 + $0x644] ss:$16 sps:$4 sm:$0xff]  }
 0x19a   : > { %4390 = vmatprep.subr.bf16.mxu0 %v8479_v4  ;;  %4432 = vmatpush1.bf16.msra.mxu1 %v8533_v54  ;;  %v10563_v4 = vpop.f32.mrf.mxu0  ;;  %v8601_v54 = vld [vmem:[%s11846_s4 + $0x724] ss:$16 sps:$4 sm:$0xff]  }
 0x19b   : > { %4433 = vmatprep.subr.bf16.mxu1 %v8541_v63 }
 0x19d   : > { %4391 = vmatpush1.bf16.msra.mxu0 %v8477_v9 }
 0x19e   : > { %4392 = vmatprep.subr.bf16.mxu0 %v8482_v13  ;;  %4434 = vmatpush1.bf16.msra.mxu1 %v8539_v23  ;;  %v8551_v13 = vld [vmem:[%s11846_s4 + $0x620] ss:$16 sps:$4 sm:$0xff]   ;;  %v3230_v23 = vlaneseq }
 0x19f   : > { %4435 = vmatprep.subr.bf16.mxu1 %v8547_v35 }
 0x1a0   : > { %v10644_v63 = vshrl.u32 %v3230_v23, 7 }
 0x1a1   : > { %4393 = vmatpush1.bf16.msra.mxu0 %v8480_v19 }
 0x1a2   : > { %4394 = vmatprep.subr.bf16.mxu0 %v8485_v21  ;;  %4436 = vmatpush1.bf16.msra.mxu1 %v8545_v34  ;;  %v10652_v35 = vsub.s32 0, %v10644_v63 }
 0x1a3   : > { %4437 = vmatprep.subr.bf16.mxu1 %v8553_v52  ;;  %v10660_v52 = vld [vmem:[%s11844_s2] sm:$0xf] }
 0x1a5   : > { %4395 = vmatpush1.bf16.msra.mxu0 %v8483_v7 }
 0x1a6   : > { %4396 = vmatprep.subr.bf16.mxu0 %v8488_v8  ;;  %4438 = vmatpush1.bf16.msra.mxu1 %v8551_v13 }
 0x1a9   : > { %4397 = vmatpush1.bf16.msra.mxu0 %v8486_v26  ;;  %v8559_v26 = vld [vmem:[%s11846_s4 + $0x604] ss:$16 sps:$4 sm:$0xff]  }
 0x1aa   : > { %4398 = vmatprep.subr.bf16.mxu0 %v8491_v27  ;;  %4439 = vmatprep.subr.bf16.mxu1 %v8559_v26 }
 0x1ad   : > { %4399 = vmatpush2.bf16.msra.mxu0 %v8489_v28  ;;  %v8557_v28 = vld [vmem:[%s11846_s4 + $0x600] ss:$16 sps:$4 sm:$0xff]  }
 0x1ae   : > { %4400 = vmatprep.subr.bf16.mxu0 %v8494_v1  ;;  %4440 = vmatpush1.bf16.msra.mxu1 %v8557_v28 }
 0x1b1   : > { %4401 = vmatpush2.bf16.msra.mxu0 %v8492_v2 }
 0x1b2   : > { %4402 = vmatprep.subr.bf16.mxu0 %v8497_v6 }
 0x1b5   : > { %4403 = vmatpush2.bf16.msra.mxu0 %v8495_v10  ;;  %v8565_v10 = vld [vmem:[%s11846_s4 + $0x7e4] ss:$16 sps:$4 sm:$0xff]  }
 0x1b6   : > { %4404 = vmatprep.subr.bf16.mxu0 %v8500_v29  ;;  %4441 = vmatprep.subr.bf16.mxu1 %v8565_v10 }
 0x1b9   : > { %4405 = vmatpush2.bf16.msra.mxu0 %v8498_v33  ;;  %v8569_v33 = vld [vmem:[%s11846_s4 + $0x7c0] ss:$16 sps:$4 sm:$0xff]  }
 0x1ba   : > { %4406 = vmatprep.subr.bf16.mxu0 %v8503_v20  ;;  %v8577_v20 = vld [vmem:[%s11846_s4 + $0x7a4] ss:$16 sps:$4 sm:$0xff]  }
 0x1bd   : > { %4407 = vmatpush2.bf16.msra.mxu0 %v8501_v40  ;;  %v8581_v40 = vld [vmem:[%s11846_s4 + $0x780] ss:$16 sps:$4 sm:$0xff]  }
 0x1be   : > { %4408 = vmatprep.subr.bf16.mxu0 %v8506_v41  ;;  %v8589_v41 = vld [vmem:[%s11846_s4 + $0x764] ss:$16 sps:$4 sm:$0xff]  }
 0x1c1   : > { %4409 = vmatpush2.bf16.msra.mxu0 %v8504_v47  ;;  %v8595_v47 = vld [vmem:[%s11846_s4 + $0x744] ss:$16 sps:$4 sm:$0xff]  }
 0x1c2   : > { %4410 = vmatprep.subr.bf16.mxu0 %v8509_v51  ;;  %v8599_v51 = vld [vmem:[%s11846_s4 + $0x720] ss:$16 sps:$4 sm:$0xff]  }
 0x1c5   : > { %4411 = vmatpush2.bf16.msra.mxu0 %v8507_v56  ;;  %v8607_v56 = vld [vmem:[%s11846_s4 + $0x704] ss:$16 sps:$4 sm:$0xff]  }
 0x1c6   : > { %4412 = vmatprep.subr.bf16.mxu0 %v8512_v62  ;;  %v8614_v62 = vld [vmem:[%s11846_s4 + $0x6ec] ss:$16 sps:$4 sm:$0xff]  }
 0x1c9   : > { %4413 = vmatpush2.bf16.msra.mxu0 %v8510_v0  ;;  %v1340_v0 = vadd.f32 %v10139_v18, %v10137_v17  ;;  %v10663_v17 = vsub.s32 1, %v10644_v63  ;;  %v1346_v18 = vadd.f32 %v10199_v37, %v10197_v36 }
 0x1ca   : > { %4468 = vmatprep.subr.bf16.mxu0 %v8519_v3  ;;  %v1342_v3 = vadd.f32 %v10159_v25, %v10157_v24 }
 0x1cb   : > { %v2113_v34 = vadd.f32 %v10518_v48, %v1340_v0 }
 0x1cc   : > { %v2198_v9 = vpop.f32.mrf.mxu0 }
 0x1cd   : > { %v2241_v12 = vpop.f32.mrf.mxu1  ;;  %v2199_v58 = vadd.f32 %v2198_v9, %v10215_v46  ;;  %v1344_v9 = vadd.f32 %v10177_v31, %v10175_v30  ;;  %v10671_v30 = vld [vmem:[%s11845_s3] sm:$0xf]  ;;  %v2156_v31 = vadd.f32 %v10520_v50, %v2113_v34 }
 0x1ce   : > { %v2200_v14 = vpop.f32.mrf.mxu0 }
 0x1cf   : > { %v2243_v15 = vpop.f32.mrf.mxu1  ;;  %v10574_v19 = vadd.f32 %v2241_v12, %v2199_v58  ;;  %v2201_v21 = vadd.f32 %v2200_v14, %v10217_v49  ;;  %v2115_v12 = vadd.f32 %v10534_v57, %v1342_v3  ;;  %v2117_v24 = vadd.f32 %v10550_v44, %v1344_v9 }
 0x1d0   : > { %v2202_v7 = vpop.f32.mrf.mxu0  ;;  %v3233_v58 = vrot.slane %v10660_v52, %v10652_v35  ;;  %v2119_v14 = vadd.f32 %v10563_v4, %v1346_v18 }
 0x1d1   : > { %v2245_v8 = vpop.f32.mrf.mxu1  ;;  %v10580_v27 = vadd.f32 %v2243_v15, %v2201_v21  ;;  %v2203_v46 = vadd.f32 %v2202_v7, %v10233_v60  ;;  %v8563_v60 = vld [vmem:[%s11846_s4 + $0x7e0] ss:$16 sps:$4 sm:$0xff]   ;;  %v2158_v13 = vadd.f32 %v10536_v61, %v2115_v12  ;;  %v3263_v15 = vrot.slane %v10671_v30, %v10652_v35  ;;  %v3395_v12 = vld [vmem:[#allocation2 + $0x8] sm:$0x11] }
 0x1d2   : > { %v2204_v1 = vpop.f32.mrf.mxu0  ;;  %4442 = vmatpush2.bf16.msra.mxu1 %v8563_v60  ;;  %v3237_v7 = vrot.slane %v10660_v52, %v10663_v17  ;;  %v2160_v50 = vadd.f32 %v10552_v45, %v2117_v24  ;;  %v3267_v61 = vrot.slane %v10671_v30, %v10663_v17 }
 0x1d3   : > { %v10586_v2 = vadd.f32 %v2245_v8, %v2203_v46  ;;  %v2205_v49 = vadd.f32 %v2204_v1, %v10235_v22  ;;  %v2247_v6 = vpop.f32.mrf.mxu1  ;;  %v8571_v22 = vld [vmem:[%s11846_s4 + $0x7c4] ss:$16 sps:$4 sm:$0xff]   ;;  %v2162_v1 = vadd.f32 %v10565_v5, %v2119_v14 }
 0x1d4   : > { %4443 = vmatprep.subr.bf16.mxu1 %v8571_v22 }
 0x1d5   : > { %v10592_v29 = vadd.f32 %v2247_v6, %v2205_v49 }
 0x1d6   : > { %4444 = vmatpush2.bf16.msra.mxu1 %v8569_v33 }
 0x1d7   : > { %4445 = vmatprep.subr.bf16.mxu1 %v8577_v20 }
 0x1da   : > { %4446 = vmatpush2.bf16.msra.mxu1 %v8575_v38 }
 0x1db   : > { %4447 = vmatprep.subr.bf16.mxu1 %v8583_v39 }
 0x1de   : > { %4448 = vmatpush2.bf16.msra.mxu1 %v8581_v40 }
 0x1df   : > { %4449 = vmatprep.subr.bf16.mxu1 %v8589_v41 }
 0x1e2   : > { %4450 = vmatpush2.bf16.msra.mxu1 %v8587_v42 }
 0x1e3   : > { %4451 = vmatprep.subr.bf16.mxu1 %v8595_v47 }
 0x1e6   : > { %4452 = vmatpush2.bf16.msra.mxu1 %v8593_v43 }
 0x1e7   : > { %4453 = vmatprep.subr.bf16.mxu1 %v8601_v54 }
 0x1ea   : > { %4454 = vmatpush2.bf16.msra.mxu1 %v8599_v51 }
 0x1eb   : > { %4455 = vmatprep.subr.bf16.mxu1 %v8607_v56  ;;  %v3387_v56 = vld [vmem:[#allocation2 + $0x18] sm:$0xff] }
 0x1ee   : > { %4456 = vmatpush2.bf16.msra.mxu1 %v8605_v55 }
 0x1ef   : > { %4511 = vmatprep.subr.bf16.mxu1 %v8614_v62 }
 0x20c   : > { %v3082_v25 = vpop.f32.mrf.mxu0 }
 0x20d   : > { %v3125_v48 = vpop.f32.mrf.mxu1 }
 0x20e   : > { %v3126_v57 = vadd.f32 %v3125_v48, %v3082_v25  ;;  %v3084_v36 = vpop.f32.mrf.mxu0 }
 0x20f   : > { %v3127_v37 = vpop.f32.mrf.mxu1 }
 0x210   : > { %v3220_v44 = vadd.f32 %v3126_v57, %v2156_v31  ;;  %v3128_v21 = vadd.f32 %v3127_v37, %v3084_v36  ;;  %v3086_v8 = vpop.f32.mrf.mxu0 }
 0x211   : > { %v3129_v26 = vpop.f32.mrf.mxu1 }
 0x212   : > { %v3250_v46 = vmul.f32 %v3233_v58, %v3220_v44  ;;  %v3221_v28 = vadd.f32 %v3128_v21, %v2158_v13  ;;  %v3130_v4 = vadd.f32 %v3129_v26, %v3086_v8  ;;  %v3088_v49 = vpop.f32.mrf.mxu0 }
 0x213   : > { %v3131_v6 = vpop.f32.mrf.mxu1 }
 0x214   : > { %v3280_v10 = vadd.f32 %v3263_v15, %v3250_v46  ;;  %v3251_v60 = vmul.f32 %v3237_v7, %v3221_v28  ;;  %v3224_v16 = vadd.f32 %v3130_v4, %v2160_v50  ;;  %v3132_v32 = vadd.f32 %v3131_v6, %v3088_v49 }
 0x216   : > { %v3281_v22 = vadd.f32 %v3267_v61, %v3251_v60  ;;  %v3254_v33 = vmul.f32 %v3233_v58, %v3224_v16  ;;  %v3225_v20 = vadd.f32 %v3132_v32, %v2162_v1  ;;  %v3288_v45 = vmax.f32 %v3280_v10, 0.0 }
 0x218   : > { %v3289_v38 = vmax.f32 %v3281_v22, 0.0  ;;  %v3284_v39 = vadd.f32 %v3263_v15, %v3254_v33  ;;  %v3255_v40 = vmul.f32 %v3237_v7, %v3225_v20  ;;  %v8517_v22 = vld [vmem:[%s11846_s4 + $0x4e8] ss:$16 sps:$4 sm:$0xff]  }
 0x21a   : > { %v7864_v41 = vpack.c.bf16 %v3289_v38, %v3288_v45  ;;  %v3285_v42 = vadd.f32 %v3267_v61, %v3255_v40  ;;  %v3292_v47 = vmax.f32 %v3284_v39, 0.0  ;;  %v8526_v39 = vld [vmem:[%s11846_s4 + $0x4cc] ss:$16 sps:$4 sm:$0xff]   ;;  %v8524_v40 = vld [vmem:[%s11846_s4 + $0x4c8] ss:$16 sps:$4 sm:$0xff]  }
 0x21c   : > { %v3343_v43 = vshrl.u32 %v7864_v41, 16  ;;  %v3293_v51 = vmax.f32 %v3285_v42, 0.0  ;;  %v3346_v5 = vshll.u32 %v7864_v41, 16  ;;  %v8532_v41 = vld [vmem:[%s11846_s4 + $0x4ac] ss:$16 sps:$4 sm:$0xff]  }
 0x21d   : > { %v8530_v42 = vld [vmem:[%s11846_s4 + $0x4a8] ss:$16 sps:$4 sm:$0xff]  }
 0x21e   : > { %v3345_v54 = vrot.slane %v3343_v43, 7  ;;  %v7866_v55 = vpack.c.bf16 %v3293_v51, %v3292_v47  ;;  %v8538_v43 = vld [vmem:[%s11846_s4 + $0x48c] ss:$16 sps:$4 sm:$0xff]   ;;  %v8536_v47 = vld [vmem:[%s11846_s4 + $0x488] ss:$16 sps:$4 sm:$0xff]  }
 0x21f   : > { %v8544_v51 = vld [vmem:[%s11846_s4 + $0x46c] ss:$16 sps:$4 sm:$0xff]  }
 0x220   : > { %v3348_v62 = vor.u32 %v3346_v5, %v3345_v54  ;;  %v3358_v23 = vshrl.u32 %v7866_v55, 16  ;;  %v3361_v34 = vshll.u32 %v7866_v55, 16  ;;  %v3356_v18 = vrot.slane %v3345_v54, 4  ;;  %v8542_v54 = vld [vmem:[%s11846_s4 + $0x468] ss:$16 sps:$4 sm:$0xff]  }
 0x221   : > { %v8550_v5 = vld [vmem:[%s11846_s4 + $0x44c] ss:$16 sps:$4 sm:$0xff]   ;;  %v8548_v55 = vld [vmem:[%s11846_s4 + $0x448] ss:$16 sps:$4 sm:$0xff]  }
 0x222   : > { %v3388_v0 = vsel %vm3386_vm5, %v3348_v62, %v3387_v56  ;;  %v3360_v3 = vrot.slane %v3358_v23, 7  ;;  %v8556_v56 = vld [vmem:[%s11846_s4 + $0x42c] ss:$16 sps:$4 sm:$0xff]   ;;  %v10756_v62 = vsub.s32 2, %v10644_v63  ;;  %v10759_v23 = vsub.s32 3, %v10644_v63 }
 0x223   : > { %3389 = vst [vmem:[#allocation2 + $0x18] sm:$0xff] %v3388_v0 }
 0x224   : > { %v3363_v24 = vor.u32 %v3361_v34, %v3360_v3  ;;  %v3374_v25 = vrot.slane %v3360_v3, 4 }
 0x226   : > { %v3364_v48 = vsel %vm10692_vm7, %v3356_v18, %v3363_v24  ;;  %v3396_v31 = vsel %vm10422_vm10, %v3374_v25, %v3395_v12  ;;  %v8562_v12 = vld [vmem:[%s11846_s4 + $0x40c] ss:$16 sps:$4 sm:$0xff]   ;;  %v3241_v24 = vrot.slane %v10660_v52, %v10756_v62 }
 0x227   : > { %3397 = vst [vmem:[#allocation2 + $0x8] sm:$0x11] %v3396_v31  ;;  %v10700_v57 = vcombine.high %v3388_v0, %v3364_v48  ;;  %v10702_v58 = vcombine.low %v3388_v0, %v3364_v48  ;;  %v8554_v0 = vld [vmem:[%s11846_s4 + $0x428] ss:$16 sps:$4 sm:$0xff]   ;;  %v3271_v31 = vrot.slane %v10671_v30, %v10756_v62 }
 0x229   : > { %v3705_v13 = vshll.u32 %v10700_v57, 16  ;;  %v3693_v14 = vshll.u32 %v10702_v58, 16  ;;  %v3703_v26 = vshrl.u32 %v10700_v57, 16  ;;  %v3691_v28 = vshrl.u32 %v10702_v58, 16 }
 0x22a   : > { %v5370_v36 = vld [vmem:[#allocation2 + $0x18] sm:$0xee] }
 0x22b   : > { %v7730_v44 = vcombine.high %v5370_v36, %v3364_v48  ;;  %v7729_v15 = vcombine.low %v5370_v36, %v3364_v48  ;;  %v3707_v7 = vrot.slane %v3705_v13, 1  ;;  %v3695_v8 = vrot.slane %v3693_v14, 1  ;;  %v8560_v36 = vld [vmem:[%s11846_s4 + $0x408] ss:$16 sps:$4 sm:$0xff]  }
 0x22c   : > { %v3245_v14 = vrot.slane %v10660_v52, %v10759_v23 }
 0x22d   : > { %v5514_v4 = vrot.slane %v7730_v44, 1  ;;  %v5511_v49 = vrot.slane %v7729_v15, 1  ;;  %v3708_v10 = vor.u32 %v3707_v7, %v3703_v26  ;;  %v3696_v16 = vor.u32 %v3695_v8, %v3691_v28  ;;  %v8568_v15 = vld [vmem:[%s11846_s4 + $0x5ec] ss:$16 sps:$4 sm:$0xff]  }
 0x22e   : > { %v3533_v37 = vld [vmem:[#allocation2 + $0x8] sm:$0x11]  ;;  %v3275_v7 = vrot.slane %v10671_v30, %v10759_v23 }
 0x22f   : > { %v7342_v21 = vcombine.high %v3533_v37, %v3533_v37  ;;  %v7341_v50 = vcombine.low %v3533_v37, %v3533_v37 }
 0x231   : > { %v3710_v46 = vshll.u32 %v7342_v21, 16  ;;  %v3698_v61 = vshll.u32 %v7341_v50, 16  ;;  %v5515_v1 = vrot.slane %v7342_v21, 1  ;;  %v5512_v6 = vrot.slane %v7341_v50, 1 }
 0x233   : > { %v3712_v60 = vrot.slane %v3710_v46, 1  ;;  %v3700_v32 = vrot.slane %v3698_v61, 1  ;;  %v10712_v33 = vsel %vm2391_vm1, %v5514_v4, %v5515_v1  ;;  %v10715_v20 = vsel %vm2391_vm1, %v5511_v49, %v5512_v6  ;;  %v8566_v4 = vld [vmem:[%s11846_s4 + $0x5e8] ss:$16 sps:$4 sm:$0xff]  }
 0x235   : > { %v3713_v45 = vsel %vm569_vm0, %v3708_v10, %v3712_v60  ;;  %v10719_v38 = vsel %vm569_vm0, %v3696_v16, %v3700_v32  ;;  %v8580_v32 = vld [vmem:[%s11846_s4 + $0x5ac] ss:$16 sps:$4 sm:$0xff]  }
 0x236   : > { %4414 = vmatprep.mubr.bf16.mxu0 %v3713_v45 }
 0x237   : > { %4415 = vmatmul.mubr.bf16.vlgmr.msra.gmra.mxu0 %v10719_v38 }
 0x238   : > { %4469 = vmatpush1.bf16.msra.mxu0 %v8517_v22  ;;  %4500 = vmatprep.mubr.bf16.mxu0 %v3713_v45 }
 0x239   : > { %4470 = vmatprep.subr.bf16.mxu0 %v8526_v39 }
 0x23c   : > { %4471 = vmatpush1.bf16.msra.mxu0 %v8524_v40 }
 0x23d   : > { %4472 = vmatprep.subr.bf16.mxu0 %v8532_v41 }
 0x240   : > { %4473 = vmatpush1.bf16.msra.mxu0 %v8530_v42  ;;  %v8586_v42 = vld [vmem:[%s11846_s4 + $0x58c] ss:$16 sps:$4 sm:$0xff]  }
 0x241   : > { %4474 = vmatprep.subr.bf16.mxu0 %v8538_v43 }
 0x244   : > { %4475 = vmatpush1.bf16.msra.mxu0 %v8536_v47 }
 0x245   : > { %4476 = vmatprep.subr.bf16.mxu0 %v8544_v51 }
 0x248   : > { %4477 = vmatpush1.bf16.msra.mxu0 %v8542_v54  ;;  %v3390_v54 = vld [vmem:[#allocation2 + $0x20] sm:$0xff] }
 0x249   : > { %4478 = vmatprep.subr.bf16.mxu0 %v8550_v5 }
 0x24c   : > { %4479 = vmatpush1.bf16.msra.mxu0 %v8548_v55  ;;  %v3168_v3 = vpop.f32.mrf.mxu0 }
 0x24d   : > { %v3211_v34 = vpop.f32.mrf.mxu1  ;;  %4480 = vmatprep.subr.bf16.mxu0 %v8556_v56  ;;  %v8584_v56 = vld [vmem:[%s11846_s4 + $0x588] ss:$16 sps:$4 sm:$0xff]  }
 0x24e   : > { %v3212_v18 = vadd.f32 %v3211_v34, %v3168_v3  ;;  %v3170_v25 = vpop.f32.mrf.mxu0 }
 0x24f   : > { %v3213_v48 = vpop.f32.mrf.mxu1 }
 0x250   : > { %v3222_v63 = vadd.f32 %v3212_v18, %v10574_v19  ;;  %v3214_v13 = vadd.f32 %v3213_v48, %v3170_v25  ;;  %4481 = vmatpush1.bf16.msra.mxu0 %v8554_v0  ;;  %v3172_v37 = vpop.f32.mrf.mxu0  ;;  %v8592_v0 = vld [vmem:[%s11846_s4 + $0x56c] ss:$16 sps:$4 sm:$0xff]   ;;  %v3398_v18 = vld [vmem:[#allocation2] sm:$0x11] }
 0x251   : > { %v3215_v44 = vpop.f32.mrf.mxu1  ;;  %4482 = vmatprep.subr.bf16.mxu0 %v8562_v12 }
 0x252   : > { %v3252_v19 = vmul.f32 %v3241_v24, %v3222_v63  ;;  %v3223_v21 = vadd.f32 %v3214_v13, %v10580_v27  ;;  %v3216_v50 = vadd.f32 %v3215_v44, %v3172_v37  ;;  %v3174_v52 = vpop.f32.mrf.mxu0  ;;  %v8574_v27 = vld [vmem:[%s11846_s4 + $0x5cc] ss:$16 sps:$4 sm:$0xff]   ;;  %v8590_v63 = vld [vmem:[%s11846_s4 + $0x568] ss:$16 sps:$4 sm:$0xff]  }
 0x253   : > { %v3217_v8 = vpop.f32.mrf.mxu1  ;;  %v8604_v37 = vld [vmem:[%s11846_s4 + $0x52c] ss:$16 sps:$4 sm:$0xff]  }
 0x254   : > { %v3282_v26 = vadd.f32 %v3271_v31, %v3252_v19  ;;  %v3253_v46 = vmul.f32 %v3245_v14, %v3223_v21  ;;  %v3226_v28 = vadd.f32 %v3216_v50, %v10586_v2  ;;  %v3218_v61 = vadd.f32 %v3217_v8, %v3174_v52  ;;  %4483 = vmatpush1.bf16.msra.mxu0 %v8560_v36  ;;  %v8572_v2 = vld [vmem:[%s11846_s4 + $0x5c8] ss:$16 sps:$4 sm:$0xff]   ;;  %v8610_v19 = vld [vmem:[%s11846_s4 + $0x50c] ss:$16 sps:$4 sm:$0xff]  }
 0x255   : > { %4484 = vmatprep.subr.bf16.mxu0 %v8568_v15  ;;  %v8596_v36 = vld [vmem:[%s11846_s4 + $0x548] ss:$16 sps:$4 sm:$0xff]  }
 0x256   : > { %v3283_v1 = vadd.f32 %v3275_v7, %v3253_v46  ;;  %v3256_v30 = vmul.f32 %v3241_v24, %v3226_v28  ;;  %v3227_v49 = vadd.f32 %v3218_v61, %v10592_v29  ;;  %v3290_v6 = vmax.f32 %v3282_v26, 0.0  ;;  %v8578_v29 = vld [vmem:[%s11846_s4 + $0x5a8] ss:$16 sps:$4 sm:$0xff]  }
 0x257   : > { %v8602_v15 = vld [vmem:[%s11846_s4 + $0x528] ss:$16 sps:$4 sm:$0xff]  }
 0x258   : > { %v3291_v10 = vmax.f32 %v3283_v1, 0.0  ;;  %v3286_v60 = vadd.f32 %v3271_v31, %v3256_v30  ;;  %v3257_v16 = vmul.f32 %v3245_v14, %v3227_v49  ;;  %4485 = vmatpush2.bf16.msra.mxu0 %v8566_v4  ;;  %v8608_v28 = vld [vmem:[%s11846_s4 + $0x508] ss:$16 sps:$4 sm:$0xff]  }
 0x259   : > { %4486 = vmatprep.subr.bf16.mxu0 %v8574_v27  ;;  %v8617_v27 = vld [vmem:[%s11846_s4 + $0xe4] ss:$16 sps:$4 sm:$0xff]  }
 0x25a   : > { %v7865_v22 = vpack.c.bf16 %v3291_v10, %v3290_v6  ;;  %v3287_v45 = vadd.f32 %v3275_v7, %v3257_v16  ;;  %v3294_v40 = vmax.f32 %v3286_v60, 0.0 }
 0x25c   : > { %v3350_v39 = vshrl.u32 %v7865_v22, 16  ;;  %v3295_v41 = vmax.f32 %v3287_v45, 0.0  ;;  %4487 = vmatpush2.bf16.msra.mxu0 %v8572_v2  ;;  %v3353_v47 = vshll.u32 %v7865_v22, 16  ;;  %v8612_v45 = vld [vmem:[%s11846_s4 + $0x6e8] ss:$16 sps:$4 sm:$0xff]  }
 0x25d   : > { %4488 = vmatprep.subr.bf16.mxu0 %v8580_v32 }
 0x25e   : > { %v3352_v43 = vrot.slane %v3350_v39, 7  ;;  %v7867_v51 = vpack.c.bf16 %v3295_v41, %v3294_v40  ;;  %v8615_v39 = vld [vmem:[%s11846_s4 + $0xe0] ss:$16 sps:$4 sm:$0xff]  }
 0x260   : > { %v3355_v5 = vor.u32 %v3353_v47, %v3352_v43  ;;  %v3367_v55 = vshrl.u32 %v7867_v51, 16  ;;  %4489 = vmatpush2.bf16.msra.mxu0 %v8578_v29  ;;  %v3370_v12 = vshll.u32 %v7867_v51, 16  ;;  %v3365_v24 = vrot.slane %v3352_v43, 4  ;;  %v8621_v43 = vld [vmem:[%s11846_s4 + $0x6cc] ss:$16 sps:$4 sm:$0xff]  }
 0x261   : > { %4490 = vmatprep.subr.bf16.mxu0 %v8586_v42  ;;  %v8624_v47 = vld [vmem:[%s11846_s4 + $0xc4] ss:$16 sps:$4 sm:$0xff]   ;;  %v8619_v51 = vld [vmem:[%s11846_s4 + $0x6c8] ss:$16 sps:$4 sm:$0xff]  }
 0x262   : > { %v3391_v3 = vsel %vm3386_vm5, %v3355_v5, %v3390_v54  ;;  %v3369_v34 = vrot.slane %v3367_v55, 7  ;;  %v8622_v54 = vld [vmem:[%s11846_s4 + $0xc0] ss:$16 sps:$4 sm:$0xff]   ;;  %v8627_v5 = vld [vmem:[%s11846_s4 + $0x6ac] ss:$16 sps:$4 sm:$0xff]  }
 0x263   : > { %3392 = vst [vmem:[#allocation2 + $0x20] sm:$0xff] %v3391_v3  ;;  %v8625_v55 = vld [vmem:[%s11846_s4 + $0x6a8] ss:$16 sps:$4 sm:$0xff]  }
 0x264   : > { %v3372_v25 = vor.u32 %v3370_v12, %v3369_v34  ;;  %v3375_v48 = vrot.slane %v3369_v34, 4  ;;  %4491 = vmatpush2.bf16.msra.mxu0 %v8584_v56  ;;  %v8628_v56 = vld [vmem:[%s11846_s4 + $0xa0] ss:$16 sps:$4 sm:$0xff]   ;;  %v8631_v34 = vld [vmem:[%s11846_s4 + $0x688] ss:$16 sps:$4 sm:$0xff]  }
 0x265   : > { %4492 = vmatprep.subr.bf16.mxu0 %v8592_v0  ;;  %v8633_v0 = vld [vmem:[%s11846_s4 + $0x68c] ss:$16 sps:$4 sm:$0xff]   ;;  %v8634_v12 = vld [vmem:[%s11846_s4 + $0x80] ss:$16 sps:$4 sm:$0xff]  }
 0x266   : > { %v3373_v53 = vsel %vm10692_vm7, %v3365_v24, %v3372_v25  ;;  %v3399_v31 = vsel %vm10422_vm10, %v3375_v48, %v3398_v18  ;;  %v8639_v18 = vld [vmem:[%s11846_s4 + $0x66c] ss:$16 sps:$4 sm:$0xff]   ;;  %v8642_v24 = vld [vmem:[%s11846_s4 + $0x64] ss:$16 sps:$4 sm:$0xff]   ;;  %v8637_v25 = vld [vmem:[%s11846_s4 + $0x668] ss:$16 sps:$4 sm:$0xff]  }
 0x267   : > { %3400 = vst [vmem:[#allocation2] sm:$0x11] %v3399_v31  ;;  %v10824_v13 = vcombine.high %v3391_v3, %v3373_v53  ;;  %v10826_v14 = vcombine.low %v3391_v3, %v3373_v53  ;;  %v8636_v3 = vld [vmem:[%s11846_s4 + $0x84] ss:$16 sps:$4 sm:$0xff]   ;;  %v8640_v48 = vld [vmem:[%s11846_s4 + $0x60] ss:$16 sps:$4 sm:$0xff]  }
 0x268   : > { %4493 = vmatpush2.bf16.msra.mxu0 %v8590_v63  ;;  %v8645_v63 = vld [vmem:[%s11846_s4 + $0x64c] ss:$16 sps:$4 sm:$0xff]   ;;  %v8646_v31 = vld [vmem:[%s11846_s4 + $0x40] ss:$16 sps:$4 sm:$0xff]  }
 0x269   : > { %4494 = vmatprep.subr.bf16.mxu0 %v8598_v59  ;;  %v3729_v9 = vshll.u32 %v10824_v13, 16  ;;  %v3717_v11 = vshll.u32 %v10826_v14, 16  ;;  %v3727_v61 = vshrl.u32 %v10824_v13, 16  ;;  %v3715_v1 = vshrl.u32 %v10826_v14, 16  ;;  %v8648_v59 = vld [vmem:[%s11846_s4 + $0x44] ss:$16 sps:$4 sm:$0xff]  }
 0x26a   : > { %v5371_v44 = vld [vmem:[#allocation2 + $0x20] sm:$0xee] }
 0x26b   : > { %v7732_v7 = vcombine.high %v5371_v44, %v3373_v53  ;;  %v7731_v50 = vcombine.low %v5371_v44, %v3373_v53  ;;  %v3731_v8 = vrot.slane %v3729_v9, 1  ;;  %v3719_v46 = vrot.slane %v3717_v11, 1  ;;  %v8643_v53 = vld [vmem:[%s11846_s4 + $0x648] ss:$16 sps:$4 sm:$0xff]   ;;  %v8652_v11 = vld [vmem:[%s11846_s4 + $0x20] ss:$16 sps:$4 sm:$0xff]  }
 0x26c   : > { %4495 = vmatpush2.bf16.msra.mxu0 %v8596_v36  ;;  %v8651_v36 = vld [vmem:[%s11846_s4 + $0x62c] ss:$16 sps:$4 sm:$0xff]   ;;  %v8649_v9 = vld [vmem:[%s11846_s4 + $0x628] ss:$16 sps:$4 sm:$0xff]  }
 0x26d   : > { %4496 = vmatprep.subr.bf16.mxu0 %v8604_v37  ;;  %v5520_v49 = vrot.slane %v7732_v7, 1  ;;  %v5517_v10 = vrot.slane %v7731_v50, 1  ;;  %v3732_v16 = vor.u32 %v3731_v8, %v3727_v61  ;;  %v3720_v32 = vor.u32 %v3719_v46, %v3715_v1  ;;  %v8654_v37 = vld [vmem:[%s11846_s4 + $0x24] ss:$16 sps:$4 sm:$0xff]   ;;  %v8657_v44 = vld [vmem:[%s11846_s4 + $0x60c] ss:$16 sps:$4 sm:$0xff]  }
 0x26e   : > { %v3534_v21 = vld [vmem:[#allocation2] sm:$0x11]  ;;  %v8663_v7 = vld [vmem:[%s11846_s4 + $0x7ec] ss:$16 sps:$4 sm:$0xff]   ;;  %v8673_v1 = vld [vmem:[%s11846_s4 + $0x7a8] ss:$16 sps:$4 sm:$0xff]  }
 0x26f   : > { %v7344_v52 = vcombine.high %v3534_v21, %v3534_v21  ;;  %v7343_v26 = vcombine.low %v3534_v21, %v3534_v21  ;;  %v8658_v21 = vld [vmem:[%s11846_s4] ss:$16 sps:$4 sm:$0xff]   ;;  %v8666_v50 = vld [vmem:[%s11846_s4 + $0x1e4] ss:$16 sps:$4 sm:$0xff]  }
 0x270   : > { %4497 = vmatpush2.bf16.msra.mxu0 %v8602_v15  ;;  %v8660_v15 = vld [vmem:[%s11846_s4 + $0x4] ss:$16 sps:$4 sm:$0xff]   ;;  %v8664_v8 = vld [vmem:[%s11846_s4 + $0x1e0] ss:$16 sps:$4 sm:$0xff]  }
 0x271   : > { %4498 = vmatprep.subr.bf16.mxu0 %v8610_v19  ;;  %v3734_v4 = vshll.u32 %v7344_v52, 16  ;;  %v3722_v30 = vshll.u32 %v7343_v26, 16  ;;  %v5521_v6 = vrot.slane %v7344_v52, 1  ;;  %v5518_v60 = vrot.slane %v7343_v26, 1  ;;  %v8655_v19 = vld [vmem:[%s11846_s4 + $0x608] ss:$16 sps:$4 sm:$0xff]  }
 0x272   : > { %v8661_v52 = vld [vmem:[%s11846_s4 + $0x7e8] ss:$16 sps:$4 sm:$0xff]   ;;  %v8669_v26 = vld [vmem:[%s11846_s4 + $0x7cc] ss:$16 sps:$4 sm:$0xff]   ;;  %v8672_v46 = vld [vmem:[%s11846_s4 + $0x1c4] ss:$16 sps:$4 sm:$0xff]  }
 0x273   : > { %v3736_v2 = vrot.slane %v3734_v4, 1  ;;  %v3724_v22 = vrot.slane %v3722_v30, 1  ;;  %v10857_v40 = vsel %vm2391_vm1, %v5520_v49, %v5521_v6  ;;  %v10860_v41 = vsel %vm2391_vm1, %v5517_v10, %v5518_v60  ;;  %v8670_v61 = vld [vmem:[%s11846_s4 + $0x1c0] ss:$16 sps:$4 sm:$0xff]   ;;  %v8675_v4 = vld [vmem:[%s11846_s4 + $0x7ac] ss:$16 sps:$4 sm:$0xff]  }
 0x274   : > { %4499 = vmatpush2.bf16.msra.mxu0 %v8608_v28  ;;  %v8667_v28 = vld [vmem:[%s11846_s4 + $0x7c8] ss:$16 sps:$4 sm:$0xff]   ;;  %v8676_v30 = vld [vmem:[%s11846_s4 + $0x1a0] ss:$16 sps:$4 sm:$0xff]   ;;  %v8681_v49 = vld [vmem:[%s11846_s4 + $0x78c] ss:$16 sps:$4 sm:$0xff]  }
 0x275   : > { %v3737_v29 = vsel %vm569_vm0, %v3732_v16, %v3736_v2  ;;  %5198 = vmatprep.subr.bf16.mxu0 %v8617_v27  ;;  %v10864_v42 = vsel %vm569_vm0, %v3720_v32, %v3724_v22  ;;  %v8678_v27 = vld [vmem:[%s11846_s4 + $0x1a4] ss:$16 sps:$4 sm:$0xff]   ;;  %v8679_v10 = vld [vmem:[%s11846_s4 + $0x788] ss:$16 sps:$4 sm:$0xff]   ;;  %v8682_v60 = vld [vmem:[%s11846_s4 + $0x180] ss:$16 sps:$4 sm:$0xff]  }
 0x276   : > { %4457 = vmatprep.mubr.bf16.mxu1 %v3737_v29  ;;  %v8684_v6 = vld [vmem:[%s11846_s4 + $0x184] ss:$16 sps:$4 sm:$0xff]   ;;  %v8687_v16 = vld [vmem:[%s11846_s4 + $0x76c] ss:$16 sps:$4 sm:$0xff]   ;;  %v8685_v32 = vld [vmem:[%s11846_s4 + $0x768] ss:$16 sps:$4 sm:$0xff]  }
 0x277   : > { %4501 = vmatmul.mubr.bf16.vlgmr.msra.gmra.mxu0 %v10719_v38  ;;  %4458 = vmatmul.mubr.bf16.vlgmr.msra.gmra.mxu1 %v10864_v42  ;;  %v8630_v38 = vld [vmem:[%s11846_s4 + $0xa4] ss:$16 sps:$4 sm:$0xff]   ;;  %v8688_v22 = vld [vmem:[%s11846_s4 + $0x160] ss:$16 sps:$4 sm:$0xff]  }
 0x278   : > { %4512 = vmatpush1.bf16.msra.mxu1 %v8612_v45  ;;  %5199 = vmatpush1.bf16.msra.mxu0 %v8615_v39  ;;  %v8690_v2 = vld [vmem:[%s11846_s4 + $0x164] ss:$16 sps:$4 sm:$0xff]   ;;  %v8693_v45 = vld [vmem:[%s11846_s4 + $0x74c] ss:$16 sps:$4 sm:$0xff]  }
 0x279   : > { %5230 = vmatprep.mubr.bf16.mxu0 %v10700_v57  ;;  %4543 = vmatprep.mubr.bf16.mxu1 %v3737_v29  ;;  %v8696_v39 = vld [vmem:[%s11846_s4 + $0x144] ss:$16 sps:$4 sm:$0xff]   ;;  %v8691_v29 = vld [vmem:[%s11846_s4 + $0x748] ss:$16 sps:$4 sm:$0xff]  }
 0x27a   : > { %4513 = vmatprep.subr.bf16.mxu1 %v8621_v43  ;;  %5200 = vmatprep.subr.bf16.mxu0 %v8624_v47  ;;  %v8694_v43 = vld [vmem:[%s11846_s4 + $0x140] ss:$16 sps:$4 sm:$0xff]   ;;  %v8699_v47 = vld [vmem:[%s11846_s4 + $0x72c] ss:$16 sps:$4 sm:$0xff]  }
 0x27c   : > { %4514 = vmatpush1.bf16.msra.mxu1 %v8619_v51  ;;  %5201 = vmatpush1.bf16.msra.mxu0 %v8622_v54  ;;  %v8702_v51 = vld [vmem:[%s11846_s4 + $0x124] ss:$16 sps:$4 sm:$0xff]   ;;  %v8697_v54 = vld [vmem:[%s11846_s4 + $0x728] ss:$16 sps:$4 sm:$0xff]  }
 0x27d   : > { %4515 = vmatprep.subr.bf16.mxu1 %v8627_v5  ;;  %5202 = vmatprep.subr.bf16.mxu0 %v8630_v38  ;;  %v8700_v5 = vld [vmem:[%s11846_s4 + $0x120] ss:$16 sps:$4 sm:$0xff]   ;;  %v8705_v38 = vld [vmem:[%s11846_s4 + $0x70c] ss:$16 sps:$4 sm:$0xff]  }
 0x280   : > { %4516 = vmatpush1.bf16.msra.mxu1 %v8625_v55  ;;  %5203 = vmatpush1.bf16.msra.mxu0 %v8628_v56  ;;  %v8708_v55 = vld [vmem:[%s11846_s4 + $0x104] ss:$16 sps:$4 sm:$0xff]   ;;  %v8703_v56 = vld [vmem:[%s11846_s4 + $0x708] ss:$16 sps:$4 sm:$0xff]  }
 0x281   : > { %4517 = vmatprep.subr.bf16.mxu1 %v8633_v0  ;;  %5204 = vmatprep.subr.bf16.mxu0 %v8636_v3  ;;  %v8706_v0 = vld [vmem:[%s11846_s4 + $0x100] ss:$16 sps:$4 sm:$0xff]   ;;  %v8711_v3 = vld [vmem:[%s11846_s4 + $0x2e4] ss:$16 sps:$4 sm:$0xff]  }
 0x284   : > { %4518 = vmatpush1.bf16.msra.mxu1 %v8631_v34  ;;  %5205 = vmatpush1.bf16.msra.mxu0 %v8634_v12  ;;  %v8714_v34 = vld [vmem:[%s11846_s4 + $0xec] ss:$16 sps:$4 sm:$0xff]   ;;  %v8709_v12 = vld [vmem:[%s11846_s4 + $0x2e0] ss:$16 sps:$4 sm:$0xff]  }
 0x285   : > { %4519 = vmatprep.subr.bf16.mxu1 %v8639_v18  ;;  %5206 = vmatprep.subr.bf16.mxu0 %v8642_v24  ;;  %v8712_v18 = vld [vmem:[%s11846_s4 + $0xe8] ss:$16 sps:$4 sm:$0xff]   ;;  %v8717_v24 = vld [vmem:[%s11846_s4 + $0x2c4] ss:$16 sps:$4 sm:$0xff]  }
 0x288   : > { %4520 = vmatpush1.bf16.msra.mxu1 %v8637_v25  ;;  %5207 = vmatpush1.bf16.msra.mxu0 %v8640_v48  ;;  %v8720_v25 = vld [vmem:[%s11846_s4 + $0xcc] ss:$16 sps:$4 sm:$0xff]   ;;  %v8715_v48 = vld [vmem:[%s11846_s4 + $0x2c0] ss:$16 sps:$4 sm:$0xff]  }
 0x289   : > { %4521 = vmatprep.subr.bf16.mxu1 %v8645_v63  ;;  %5208 = vmatprep.subr.bf16.mxu0 %v8648_v59  ;;  %v8718_v63 = vld [vmem:[%s11846_s4 + $0xc8] ss:$16 sps:$4 sm:$0xff]   ;;  %v8726_v59 = vld [vmem:[%s11846_s4 + $0xac] ss:$16 sps:$4 sm:$0xff]  }
 0x28c   : > { %4522 = vmatpush1.bf16.msra.mxu1 %v8643_v53  ;;  %5209 = vmatpush1.bf16.msra.mxu0 %v8646_v31  ;;  %v8721_v53 = vld [vmem:[%s11846_s4 + $0x2a0] ss:$16 sps:$4 sm:$0xff]   ;;  %v8729_v31 = vld [vmem:[%s11846_s4 + $0x284] ss:$16 sps:$4 sm:$0xff]  }
 0x28d   : > { %4523 = vmatprep.subr.bf16.mxu1 %v8651_v36  ;;  %5210 = vmatprep.subr.bf16.mxu0 %v8654_v37  ;;  %v8732_v36 = vld [vmem:[%s11846_s4 + $0x8c] ss:$16 sps:$4 sm:$0xff]   ;;  %v8727_v37 = vld [vmem:[%s11846_s4 + $0x280] ss:$16 sps:$4 sm:$0xff]  }
 0x290   : > { %4524 = vmatpush1.bf16.msra.mxu1 %v8649_v9  ;;  %5211 = vmatpush1.bf16.msra.mxu0 %v8652_v11  ;;  %v8730_v9 = vld [vmem:[%s11846_s4 + $0x88] ss:$16 sps:$4 sm:$0xff]   ;;  %v8735_v11 = vld [vmem:[%s11846_s4 + $0x264] ss:$16 sps:$4 sm:$0xff]  }
 0x291   : > { %4525 = vmatprep.subr.bf16.mxu1 %v8657_v44  ;;  %5212 = vmatprep.subr.bf16.mxu0 %v8660_v15  ;;  %v8738_v44 = vld [vmem:[%s11846_s4 + $0x6c] ss:$16 sps:$4 sm:$0xff]   ;;  %v8733_v15 = vld [vmem:[%s11846_s4 + $0x260] ss:$16 sps:$4 sm:$0xff]  }
 0x294   : > { %4526 = vmatpush1.bf16.msra.mxu1 %v8655_v19  ;;  %5213 = vmatpush1.bf16.msra.mxu0 %v8658_v21  ;;  %v8736_v19 = vld [vmem:[%s11846_s4 + $0x68] ss:$16 sps:$4 sm:$0xff]   ;;  %v8741_v21 = vld [vmem:[%s11846_s4 + $0x244] ss:$16 sps:$4 sm:$0xff]  }
 0x295   : > { %4527 = vmatprep.subr.bf16.mxu1 %v8663_v7  ;;  %5214 = vmatprep.subr.bf16.mxu0 %v8666_v50  ;;  %v8744_v7 = vld [vmem:[%s11846_s4 + $0x4c] ss:$16 sps:$4 sm:$0xff]   ;;  %v8739_v50 = vld [vmem:[%s11846_s4 + $0x240] ss:$16 sps:$4 sm:$0xff]  }
 0x298   : > { %4528 = vmatpush2.bf16.msra.mxu1 %v8661_v52  ;;  %5215 = vmatpush2.bf16.msra.mxu0 %v8664_v8  ;;  %v8742_v52 = vld [vmem:[%s11846_s4 + $0x48] ss:$16 sps:$4 sm:$0xff]   ;;  %v8747_v8 = vld [vmem:[%s11846_s4 + $0x224] ss:$16 sps:$4 sm:$0xff]  }
 0x299   : > { %4529 = vmatprep.subr.bf16.mxu1 %v8669_v26  ;;  %5216 = vmatprep.subr.bf16.mxu0 %v8672_v46  ;;  %v8750_v26 = vld [vmem:[%s11846_s4 + $0x2c] ss:$16 sps:$4 sm:$0xff]   ;;  %v8745_v46 = vld [vmem:[%s11846_s4 + $0x220] ss:$16 sps:$4 sm:$0xff]  }
 0x29c   : > { %4530 = vmatpush2.bf16.msra.mxu1 %v8667_v28  ;;  %5217 = vmatpush2.bf16.msra.mxu0 %v8670_v61  ;;  %v8748_v28 = vld [vmem:[%s11846_s4 + $0x28] ss:$16 sps:$4 sm:$0xff]   ;;  %v8753_v61 = vld [vmem:[%s11846_s4 + $0x204] ss:$16 sps:$4 sm:$0xff]  }
 0x29d   : > { %4531 = vmatprep.subr.bf16.mxu1 %v8675_v4  ;;  %5218 = vmatprep.subr.bf16.mxu0 %v8678_v27  ;;  %v8756_v4 = vld [vmem:[%s11846_s4 + $0xc] ss:$16 sps:$4 sm:$0xff]   ;;  %v8751_v27 = vld [vmem:[%s11846_s4 + $0x200] ss:$16 sps:$4 sm:$0xff]  }
 0x2a0   : > { %4532 = vmatpush2.bf16.msra.mxu1 %v8673_v1  ;;  %5219 = vmatpush2.bf16.msra.mxu0 %v8676_v30  ;;  %v8754_v1 = vld [vmem:[%s11846_s4 + $0x8] ss:$16 sps:$4 sm:$0xff]   ;;  %v8759_v30 = vld [vmem:[%s11846_s4 + $0x3e4] ss:$16 sps:$4 sm:$0xff]  }
 0x2a1   : > { %4533 = vmatprep.subr.bf16.mxu1 %v8681_v49  ;;  %5220 = vmatprep.subr.bf16.mxu0 %v8684_v6  ;;  %v8762_v49 = vld [vmem:[%s11846_s4 + $0x1ec] ss:$16 sps:$4 sm:$0xff]   ;;  %v8757_v6 = vld [vmem:[%s11846_s4 + $0x3e0] ss:$16 sps:$4 sm:$0xff]  }
 0x2a4   : > { %4534 = vmatpush2.bf16.msra.mxu1 %v8679_v10  ;;  %5221 = vmatpush2.bf16.msra.mxu0 %v8682_v60  ;;  %v8760_v10 = vld [vmem:[%s11846_s4 + $0x1e8] ss:$16 sps:$4 sm:$0xff]   ;;  %v8765_v60 = vld [vmem:[%s11846_s4 + $0x3c4] ss:$16 sps:$4 sm:$0xff]  }
 0x2a5   : > { %4535 = vmatprep.subr.bf16.mxu1 %v8687_v16  ;;  %5222 = vmatprep.subr.bf16.mxu0 %v8690_v2  ;;  %v8768_v16 = vld [vmem:[%s11846_s4 + $0x1cc] ss:$16 sps:$4 sm:$0xff]   ;;  %v8763_v2 = vld [vmem:[%s11846_s4 + $0x3c0] ss:$16 sps:$4 sm:$0xff]  }
 0x2a8   : > { %4536 = vmatpush2.bf16.msra.mxu1 %v8685_v32  ;;  %5223 = vmatpush2.bf16.msra.mxu0 %v8688_v22  ;;  %v8766_v32 = vld [vmem:[%s11846_s4 + $0x1c8] ss:$16 sps:$4 sm:$0xff]   ;;  %v8771_v22 = vld [vmem:[%s11846_s4 + $0x3a4] ss:$16 sps:$4 sm:$0xff]  }
 0x2a9   : > { %4537 = vmatprep.subr.bf16.mxu1 %v8693_v45  ;;  %5224 = vmatprep.subr.bf16.mxu0 %v8696_v39  ;;  %v8774_v45 = vld [vmem:[%s11846_s4 + $0x1ac] ss:$16 sps:$4 sm:$0xff]   ;;  %v8769_v39 = vld [vmem:[%s11846_s4 + $0x3a0] ss:$16 sps:$4 sm:$0xff]  }
 0x2ac   : > { %4538 = vmatpush2.bf16.msra.mxu1 %v8691_v29  ;;  %5225 = vmatpush2.bf16.msra.mxu0 %v8694_v43  ;;  %v8772_v29 = vld [vmem:[%s11846_s4 + $0x1a8] ss:$16 sps:$4 sm:$0xff]   ;;  %v8777_v43 = vld [vmem:[%s11846_s4 + $0x384] ss:$16 sps:$4 sm:$0xff]  }
 0x2ad   : > { %4539 = vmatprep.subr.bf16.mxu1 %v8699_v47  ;;  %5226 = vmatprep.subr.bf16.mxu0 %v8702_v51  ;;  %v8780_v47 = vld [vmem:[%s11846_s4 + $0x18c] ss:$16 sps:$4 sm:$0xff]   ;;  %v8775_v51 = vld [vmem:[%s11846_s4 + $0x380] ss:$16 sps:$4 sm:$0xff]  }
 0x2b0   : > { %4540 = vmatpush2.bf16.msra.mxu1 %v8697_v54  ;;  %5227 = vmatpush2.bf16.msra.mxu0 %v8700_v5  ;;  %v8778_v54 = vld [vmem:[%s11846_s4 + $0x188] ss:$16 sps:$4 sm:$0xff]   ;;  %v8783_v5 = vld [vmem:[%s11846_s4 + $0x364] ss:$16 sps:$4 sm:$0xff]  }
 0x2b1   : > { %4541 = vmatprep.subr.bf16.mxu1 %v8705_v38  ;;  %5228 = vmatprep.subr.bf16.mxu0 %v8708_v55  ;;  %v8786_v38 = vld [vmem:[%s11846_s4 + $0x16c] ss:$16 sps:$4 sm:$0xff]   ;;  %v8781_v55 = vld [vmem:[%s11846_s4 + $0x360] ss:$16 sps:$4 sm:$0xff]  }
 0x2b4   : > { %4542 = vmatpush2.bf16.msra.mxu1 %v8703_v56  ;;  %5229 = vmatpush2.bf16.msra.mxu0 %v8706_v0  ;;  %v8784_v56 = vld [vmem:[%s11846_s4 + $0x168] ss:$16 sps:$4 sm:$0xff]   ;;  %v8789_v0 = vld [vmem:[%s11846_s4 + $0x344] ss:$16 sps:$4 sm:$0xff]  }
 0x2b5   : > { %5241 = vmatprep.subr.bf16.mxu1 %v8711_v3  ;;  %5284 = vmatprep.subr.bf16.mxu0 %v8714_v34  ;;  %v8792_v3 = vld [vmem:[%s11846_s4 + $0x14c] ss:$16 sps:$4 sm:$0xff]   ;;  %v8787_v34 = vld [vmem:[%s11846_s4 + $0x340] ss:$16 sps:$4 sm:$0xff]  }
 0x2b7   : > { %4544 = vmatmul.mubr.bf16.vlgmr.msra.gmra.mxu1 %v10864_v42  ;;  %5231 = vmatmul.mubr.bf16.vlgmr.msra.gmra.mxu0 %v10702_v58  ;;  %v8723_v42 = vld [vmem:[%s11846_s4 + $0x2a4] ss:$16 sps:$4 sm:$0xff]  }
 0x2b8   : > { %5242 = vmatpush1.bf16.msra.mxu1 %v8709_v12  ;;  %5273 = vmatprep.mubr.bf16.mxu1 %v10824_v13  ;;  %v8790_v12 = vld [vmem:[%s11846_s4 + $0x148] ss:$16 sps:$4 sm:$0xff]  }
 0x2b9   : > { %5285 = vmatpush1.bf16.msra.mxu0 %v8712_v18  ;;  %5316 = vmatprep.mubr.bf16.mxu0 %v10700_v57  ;;  %v8724_v57 = vld [vmem:[%s11846_s4 + $0xa8] ss:$16 sps:$4 sm:$0xff]   ;;  %v8795_v18 = vld [vmem:[%s11846_s4 + $0x324] ss:$16 sps:$4 sm:$0xff]  }
 0x2ba   : > { %5243 = vmatprep.subr.bf16.mxu1 %v8717_v24  ;;  %5286 = vmatprep.subr.bf16.mxu0 %v8720_v25  ;;  %v8798_v24 = vld [vmem:[%s11846_s4 + $0x12c] ss:$16 sps:$4 sm:$0xff]   ;;  %v8793_v25 = vld [vmem:[%s11846_s4 + $0x320] ss:$16 sps:$4 sm:$0xff]  }
 0x2bc   : > { %5244 = vmatpush1.bf16.msra.mxu1 %v8715_v48  ;;  %v8796_v48 = vld [vmem:[%s11846_s4 + $0x128] ss:$16 sps:$4 sm:$0xff]  }
 0x2bd   : > { %5287 = vmatpush1.bf16.msra.mxu0 %v8718_v63  ;;  %5245 = vmatprep.subr.bf16.mxu1 %v8723_v42  ;;  %v8801_v63 = vld [vmem:[%s11846_s4 + $0x304] ss:$16 sps:$4 sm:$0xff]   ;;  %v8804_v42 = vld [vmem:[%s11846_s4 + $0x10c] ss:$16 sps:$4 sm:$0xff]  }
 0x2be   : > { %5288 = vmatprep.subr.bf16.mxu0 %v8726_v59  ;;  %v8799_v59 = vld [vmem:[%s11846_s4 + $0x300] ss:$16 sps:$4 sm:$0xff]  }
 0x2c0   : > { %5246 = vmatpush1.bf16.msra.mxu1 %v8721_v53  ;;  %v8802_v53 = vld [vmem:[%s11846_s4 + $0x108] ss:$16 sps:$4 sm:$0xff]  }
 0x2c1   : > { %5289 = vmatpush1.bf16.msra.mxu0 %v8724_v57  ;;  %5247 = vmatprep.subr.bf16.mxu1 %v8729_v31  ;;  %v8807_v57 = vld [vmem:[%s11846_s4 + $0x2ec] ss:$16 sps:$4 sm:$0xff]   ;;  %v8810_v31 = vld [vmem:[%s11846_s4 + $0x8e4] ss:$16 sps:$4 sm:$0xff]  }
 0x2c2   : > { %5290 = vmatprep.subr.bf16.mxu0 %v8732_v36  ;;  %v8805_v36 = vld [vmem:[%s11846_s4 + $0x2e8] ss:$16 sps:$4 sm:$0xff]  }
 0x2c4   : > { %5248 = vmatpush1.bf16.msra.mxu1 %v8727_v37  ;;  %v8808_v37 = vld [vmem:[%s11846_s4 + $0x8e0] ss:$16 sps:$4 sm:$0xff]  }
 0x2c5   : > { %5291 = vmatpush1.bf16.msra.mxu0 %v8730_v9  ;;  %5249 = vmatprep.subr.bf16.mxu1 %v8735_v11  ;;  %v8813_v9 = vld [vmem:[%s11846_s4 + $0x2cc] ss:$16 sps:$4 sm:$0xff]   ;;  %v8816_v11 = vld [vmem:[%s11846_s4 + $0x8c4] ss:$16 sps:$4 sm:$0xff]  }
 0x2c6   : > { %5292 = vmatprep.subr.bf16.mxu0 %v8738_v44  ;;  %v8811_v44 = vld [vmem:[%s11846_s4 + $0x2c8] ss:$16 sps:$4 sm:$0xff]  }
 0x2c8   : > { %5250 = vmatpush1.bf16.msra.mxu1 %v8733_v15  ;;  %v8814_v15 = vld [vmem:[%s11846_s4 + $0x8c0] ss:$16 sps:$4 sm:$0xff]  }
 0x2c9   : > { %5293 = vmatpush1.bf16.msra.mxu0 %v8736_v19  ;;  %5251 = vmatprep.subr.bf16.mxu1 %v8741_v21  ;;  %v8819_v19 = vld [vmem:[%s11846_s4 + $0x2ac] ss:$16 sps:$4 sm:$0xff]   ;;  %v8820_v21 = vld [vmem:[%s11846_s4 + $0x8a0] ss:$16 sps:$4 sm:$0xff]  }
 0x2ca   : > { %5294 = vmatprep.subr.bf16.mxu0 %v8744_v7  ;;  %v8825_v7 = vld [vmem:[%s11846_s4 + $0x28c] ss:$16 sps:$4 sm:$0xff]  }
 0x2cc   : > { %5252 = vmatpush1.bf16.msra.mxu1 %v8739_v50  ;;  %v8828_v50 = vld [vmem:[%s11846_s4 + $0x884] ss:$16 sps:$4 sm:$0xff]  }
 0x2cd   : > { %5295 = vmatpush1.bf16.msra.mxu0 %v8742_v52  ;;  %5253 = vmatprep.subr.bf16.mxu1 %v8747_v8  ;;  %v8823_v52 = vld [vmem:[%s11846_s4 + $0x288] ss:$16 sps:$4 sm:$0xff]   ;;  %v8826_v8 = vld [vmem:[%s11846_s4 + $0x880] ss:$16 sps:$4 sm:$0xff]  }
 0x2ce   : > { %5296 = vmatprep.subr.bf16.mxu0 %v8750_v26  ;;  %v8831_v26 = vld [vmem:[%s11846_s4 + $0x26c] ss:$16 sps:$4 sm:$0xff]  }
 0x2d0   : > { %5254 = vmatpush1.bf16.msra.mxu1 %v8745_v46  ;;  %v8834_v46 = vld [vmem:[%s11846_s4 + $0x864] ss:$16 sps:$4 sm:$0xff]  }
 0x2d1   : > { %5297 = vmatpush1.bf16.msra.mxu0 %v8748_v28  ;;  %5255 = vmatprep.subr.bf16.mxu1 %v8753_v61  ;;  %v8829_v28 = vld [vmem:[%s11846_s4 + $0x268] ss:$16 sps:$4 sm:$0xff]   ;;  %v8832_v61 = vld [vmem:[%s11846_s4 + $0x860] ss:$16 sps:$4 sm:$0xff]  }
 0x2d2   : > { %5298 = vmatprep.subr.bf16.mxu0 %v8756_v4  ;;  %v8837_v4 = vld [vmem:[%s11846_s4 + $0x24c] ss:$16 sps:$4 sm:$0xff]  }
 0x2d4   : > { %5256 = vmatpush1.bf16.msra.mxu1 %v8751_v27  ;;  %v8840_v27 = vld [vmem:[%s11846_s4 + $0x844] ss:$16 sps:$4 sm:$0xff]  }
 0x2d5   : > { %5299 = vmatpush1.bf16.msra.mxu0 %v8754_v1  ;;  %5257 = vmatprep.subr.bf16.mxu1 %v8759_v30  ;;  %v8835_v1 = vld [vmem:[%s11846_s4 + $0x248] ss:$16 sps:$4 sm:$0xff]   ;;  %v8838_v30 = vld [vmem:[%s11846_s4 + $0x840] ss:$16 sps:$4 sm:$0xff]  }
 0x2d6   : > { %5300 = vmatprep.subr.bf16.mxu0 %v8762_v49  ;;  %v8843_v49 = vld [vmem:[%s11846_s4 + $0x22c] ss:$16 sps:$4 sm:$0xff]  }
 0x2d8   : > { %5258 = vmatpush2.bf16.msra.mxu1 %v8757_v6  ;;  %v8846_v6 = vld [vmem:[%s11846_s4 + $0x824] ss:$16 sps:$4 sm:$0xff]  }
 0x2d9   : > { %5301 = vmatpush2.bf16.msra.mxu0 %v8760_v10  ;;  %5259 = vmatprep.subr.bf16.mxu1 %v8765_v60  ;;  %v8841_v10 = vld [vmem:[%s11846_s4 + $0x228] ss:$16 sps:$4 sm:$0xff]   ;;  %v8844_v60 = vld [vmem:[%s11846_s4 + $0x820] ss:$16 sps:$4 sm:$0xff]  }
 0x2da   : > { %5302 = vmatprep.subr.bf16.mxu0 %v8768_v16  ;;  %v8849_v16 = vld [vmem:[%s11846_s4 + $0x20c] ss:$16 sps:$4 sm:$0xff]  }
 0x2dc   : > { %5260 = vmatpush2.bf16.msra.mxu1 %v8763_v2  ;;  %v8852_v2 = vld [vmem:[%s11846_s4 + $0x804] ss:$16 sps:$4 sm:$0xff]  }
 0x2dd   : > { %5303 = vmatpush2.bf16.msra.mxu0 %v8766_v32  ;;  %5261 = vmatprep.subr.bf16.mxu1 %v8771_v22  ;;  %v8847_v32 = vld [vmem:[%s11846_s4 + $0x208] ss:$16 sps:$4 sm:$0xff]   ;;  %v8850_v22 = vld [vmem:[%s11846_s4 + $0x800] ss:$16 sps:$4 sm:$0xff]  }
 0x2de   : > { %5304 = vmatprep.subr.bf16.mxu0 %v8774_v45  ;;  %v8855_v45 = vld [vmem:[%s11846_s4 + $0x3ec] ss:$16 sps:$4 sm:$0xff]  }
 0x2e0   : > { %5262 = vmatpush2.bf16.msra.mxu1 %v8769_v39  ;;  %v8858_v39 = vld [vmem:[%s11846_s4 + $0x9e4] ss:$16 sps:$4 sm:$0xff]  }
 0x2e1   : > { %5305 = vmatpush2.bf16.msra.mxu0 %v8772_v29  ;;  %5263 = vmatprep.subr.bf16.mxu1 %v8777_v43  ;;  %v8853_v29 = vld [vmem:[%s11846_s4 + $0x3e8] ss:$16 sps:$4 sm:$0xff]   ;;  %v8856_v43 = vld [vmem:[%s11846_s4 + $0x9e0] ss:$16 sps:$4 sm:$0xff]  }
 0x2e2   : > { %5306 = vmatprep.subr.bf16.mxu0 %v8780_v47  ;;  %v8861_v47 = vld [vmem:[%s11846_s4 + $0x3cc] ss:$16 sps:$4 sm:$0xff]  }
 0x2e4   : > { %5264 = vmatpush2.bf16.msra.mxu1 %v8775_v51  ;;  %v8864_v51 = vld [vmem:[%s11846_s4 + $0x9c4] ss:$16 sps:$4 sm:$0xff]  }
 0x2e5   : > { %5307 = vmatpush2.bf16.msra.mxu0 %v8778_v54  ;;  %5265 = vmatprep.subr.bf16.mxu1 %v8783_v5  ;;  %v8859_v54 = vld [vmem:[%s11846_s4 + $0x3c8] ss:$16 sps:$4 sm:$0xff]   ;;  %v8862_v5 = vld [vmem:[%s11846_s4 + $0x9c0] ss:$16 sps:$4 sm:$0xff]  }
 0x2e6   : > { %5308 = vmatprep.subr.bf16.mxu0 %v8786_v38  ;;  %v8867_v38 = vld [vmem:[%s11846_s4 + $0x3ac] ss:$16 sps:$4 sm:$0xff]  }
 0x2e8   : > { %5266 = vmatpush2.bf16.msra.mxu1 %v8781_v55  ;;  %v8870_v55 = vld [vmem:[%s11846_s4 + $0x9a4] ss:$16 sps:$4 sm:$0xff]  }
 0x2e9   : > { %5309 = vmatpush2.bf16.msra.mxu0 %v8784_v56  ;;  %5267 = vmatprep.subr.bf16.mxu1 %v8789_v0  ;;  %v8865_v56 = vld [vmem:[%s11846_s4 + $0x3a8] ss:$16 sps:$4 sm:$0xff]   ;;  %v8868_v0 = vld [vmem:[%s11846_s4 + $0x9a0] ss:$16 sps:$4 sm:$0xff]  }
 0x2ea   : > { %5310 = vmatprep.subr.bf16.mxu0 %v8792_v3  ;;  %v8873_v3 = vld [vmem:[%s11846_s4 + $0x38c] ss:$16 sps:$4 sm:$0xff]  }
 0x2ec   : > { %5268 = vmatpush2.bf16.msra.mxu1 %v8787_v34  ;;  %v8876_v34 = vld [vmem:[%s11846_s4 + $0x984] ss:$16 sps:$4 sm:$0xff]  }
 0x2ed   : > { %5311 = vmatpush2.bf16.msra.mxu0 %v8790_v12  ;;  %5269 = vmatprep.subr.bf16.mxu1 %v8795_v18  ;;  %v8871_v12 = vld [vmem:[%s11846_s4 + $0x388] ss:$16 sps:$4 sm:$0xff]   ;;  %v8874_v18 = vld [vmem:[%s11846_s4 + $0x980] ss:$16 sps:$4 sm:$0xff]  }
 0x2ee   : > { %5312 = vmatprep.subr.bf16.mxu0 %v8798_v24  ;;  %v8879_v24 = vld [vmem:[%s11846_s4 + $0x36c] ss:$16 sps:$4 sm:$0xff]  }
 0x2f0   : > { %5270 = vmatpush2.bf16.msra.mxu1 %v8793_v25  ;;  %v8882_v25 = vld [vmem:[%s11846_s4 + $0x964] ss:$16 sps:$4 sm:$0xff]  }
 0x2f1   : > { %5313 = vmatpush2.bf16.msra.mxu0 %v8796_v48  ;;  %5271 = vmatprep.subr.bf16.mxu1 %v8801_v63  ;;  %v8877_v48 = vld [vmem:[%s11846_s4 + $0x368] ss:$16 sps:$4 sm:$0xff]   ;;  %v8880_v63 = vld [vmem:[%s11846_s4 + $0x960] ss:$16 sps:$4 sm:$0xff]  }
 0x2f2   : > { %5314 = vmatprep.subr.bf16.mxu0 %v8804_v42  ;;  %v8885_v42 = vld [vmem:[%s11846_s4 + $0x34c] ss:$16 sps:$4 sm:$0xff]  }
 0x2f4   : > { %5272 = vmatpush2.bf16.msra.mxu1 %v8799_v59  ;;  %v8888_v59 = vld [vmem:[%s11846_s4 + $0x944] ss:$16 sps:$4 sm:$0xff]  }
 0x2f5   : > { %5315 = vmatpush2.bf16.msra.mxu0 %v8802_v53  ;;  %5327 = vmatprep.subr.bf16.mxu1 %v8807_v57  ;;  %v8883_v53 = vld [vmem:[%s11846_s4 + $0x348] ss:$16 sps:$4 sm:$0xff]   ;;  %v8886_v57 = vld [vmem:[%s11846_s4 + $0x940] ss:$16 sps:$4 sm:$0xff]  }
 0x2f6   : > { %6167 = vmatprep.subr.bf16.mxu0 %v8810_v31  ;;  %v8891_v31 = vld [vmem:[%s11846_s4 + $0x32c] ss:$16 sps:$4 sm:$0xff]  }
 0x2f7   : > { %5274 = vmatmul.mubr.bf16.vlgmr.msra.gmra.mxu1 %v10826_v14 }
 0x2f8   : > { %5317 = vmatmul.mubr.bf16.vlgmr.msra.gmra.mxu0 %v10702_v58  ;;  %5328 = vmatpush1.bf16.msra.mxu1 %v8805_v36  ;;  %v8822_v58 = vld [vmem:[%s11846_s4 + $0x8a4] ss:$16 sps:$4 sm:$0xff]  }
 0x2f9   : > { %5359 = vmatprep.mubr.bf16.mxu1 %v10824_v13  ;;  %6168 = vmatpush1.bf16.msra.mxu0 %v8808_v37  ;;  %v8817_v13 = vld [vmem:[%s11846_s4 + $0x2a8] ss:$16 sps:$4 sm:$0xff]   ;;  %v8894_v36 = vld [vmem:[%s11846_s4 + $0x924] ss:$16 sps:$4 sm:$0xff]  }
 0x2fa   : > { %6199 = vmatprep.mubr.bf16.mxu0 %v10712_v33  ;;  %5329 = vmatprep.subr.bf16.mxu1 %v8813_v9  ;;  %v8889_v37 = vld [vmem:[%s11846_s4 + $0x328] ss:$16 sps:$4 sm:$0xff]   ;;  %v8892_v9 = vld [vmem:[%s11846_s4 + $0x920] ss:$16 sps:$4 sm:$0xff]  }
 0x2fb   : > { %6169 = vmatprep.subr.bf16.mxu0 %v8816_v11  ;;  %v8897_v11 = vld [vmem:[%s11846_s4 + $0x30c] ss:$16 sps:$4 sm:$0xff]  }
 0x2fc   : > { %5330 = vmatpush1.bf16.msra.mxu1 %v8811_v44  ;;  %v8900_v44 = vld [vmem:[%s11846_s4 + $0x904] ss:$16 sps:$4 sm:$0xff]  }
 0x2fd   : > { %6170 = vmatpush1.bf16.msra.mxu0 %v8814_v15  ;;  %5331 = vmatprep.subr.bf16.mxu1 %v8819_v19  ;;  %v8895_v15 = vld [vmem:[%s11846_s4 + $0x308] ss:$16 sps:$4 sm:$0xff]   ;;  %v8898_v19 = vld [vmem:[%s11846_s4 + $0x900] ss:$16 sps:$4 sm:$0xff]  }
 0x2fe   : > { %6171 = vmatprep.subr.bf16.mxu0 %v8822_v58  ;;  %v8903_v58 = vld [vmem:[%s11846_s4 + $0xae4] ss:$16 sps:$4 sm:$0xff]  }
 0x300   : > { %5332 = vmatpush1.bf16.msra.mxu1 %v8817_v13  ;;  %v8906_v13 = vld [vmem:[%s11846_s4 + $0x8ec] ss:$16 sps:$4 sm:$0xff]  }
 0x301   : > { %6172 = vmatpush1.bf16.msra.mxu0 %v8820_v21  ;;  %5333 = vmatprep.subr.bf16.mxu1 %v8825_v7  ;;  %v8901_v21 = vld [vmem:[%s11846_s4 + $0xae0] ss:$16 sps:$4 sm:$0xff]   ;;  %v8904_v7 = vld [vmem:[%s11846_s4 + $0x8e8] ss:$16 sps:$4 sm:$0xff]  }
 0x302   : > { %6173 = vmatprep.subr.bf16.mxu0 %v8828_v50  ;;  %v8909_v50 = vld [vmem:[%s11846_s4 + $0xac4] ss:$16 sps:$4 sm:$0xff]  }
 0x304   : > { %5334 = vmatpush1.bf16.msra.mxu1 %v8823_v52  ;;  %v8912_v52 = vld [vmem:[%s11846_s4 + $0x8cc] ss:$16 sps:$4 sm:$0xff]  }
 0x305   : > { %6174 = vmatpush1.bf16.msra.mxu0 %v8826_v8  ;;  %5335 = vmatprep.subr.bf16.mxu1 %v8831_v26  ;;  %v8907_v8 = vld [vmem:[%s11846_s4 + $0xac0] ss:$16 sps:$4 sm:$0xff]   ;;  %v8910_v26 = vld [vmem:[%s11846_s4 + $0x8c8] ss:$16 sps:$4 sm:$0xff]  }
 0x306   : > { %6175 = vmatprep.subr.bf16.mxu0 %v8834_v46  ;;  %v8918_v46 = vld [vmem:[%s11846_s4 + $0x8ac] ss:$16 sps:$4 sm:$0xff]  }
 0x308   : > { %5336 = vmatpush1.bf16.msra.mxu1 %v8829_v28  ;;  %v8913_v28 = vld [vmem:[%s11846_s4 + $0xaa0] ss:$16 sps:$4 sm:$0xff]  }
 0x309   : > { %6176 = vmatpush1.bf16.msra.mxu0 %v8832_v61  ;;  %5337 = vmatprep.subr.bf16.mxu1 %v8837_v4  ;;  %v8916_v61 = vld [vmem:[%s11846_s4 + $0x8a8] ss:$16 sps:$4 sm:$0xff]   ;;  %v8924_v4 = vld [vmem:[%s11846_s4 + $0x88c] ss:$16 sps:$4 sm:$0xff]  }
 0x30a   : > { %6177 = vmatprep.subr.bf16.mxu0 %v8840_v27  ;;  %v8919_v27 = vld [vmem:[%s11846_s4 + $0xa80] ss:$16 sps:$4 sm:$0xff]  }
 0x30c   : > { %5338 = vmatpush1.bf16.msra.mxu1 %v8835_v1  ;;  %v8922_v1 = vld [vmem:[%s11846_s4 + $0x888] ss:$16 sps:$4 sm:$0xff]  }
 0x30d   : > { %6178 = vmatpush1.bf16.msra.mxu0 %v8838_v30  ;;  %5339 = vmatprep.subr.bf16.mxu1 %v8843_v49  ;;  %v8927_v30 = vld [vmem:[%s11846_s4 + $0xa64] ss:$16 sps:$4 sm:$0xff]   ;;  %v8930_v49 = vld [vmem:[%s11846_s4 + $0x86c] ss:$16 sps:$4 sm:$0xff]  }
 0x30e   : > { %6179 = vmatprep.subr.bf16.mxu0 %v8846_v6  ;;  %v8925_v6 = vld [vmem:[%s11846_s4 + $0xa60] ss:$16 sps:$4 sm:$0xff]  }
 0x310   : > { %5340 = vmatpush1.bf16.msra.mxu1 %v8841_v10  ;;  %v8928_v10 = vld [vmem:[%s11846_s4 + $0x868] ss:$16 sps:$4 sm:$0xff]  }
 0x311   : > { %6180 = vmatpush1.bf16.msra.mxu0 %v8844_v60  ;;  %5341 = vmatprep.subr.bf16.mxu1 %v8849_v16  ;;  %v8933_v60 = vld [vmem:[%s11846_s4 + $0xa44] ss:$16 sps:$4 sm:$0xff]   ;;  %v8936_v16 = vld [vmem:[%s11846_s4 + $0x84c] ss:$16 sps:$4 sm:$0xff]  }
 0x312   : > { %6181 = vmatprep.subr.bf16.mxu0 %v8852_v2  ;;  %v8931_v2 = vld [vmem:[%s11846_s4 + $0xa40] ss:$16 sps:$4 sm:$0xff]  }
 0x314   : > { %5342 = vmatpush1.bf16.msra.mxu1 %v8847_v32  ;;  %v8934_v32 = vld [vmem:[%s11846_s4 + $0x848] ss:$16 sps:$4 sm:$0xff]  }
 0x315   : > { %6182 = vmatpush1.bf16.msra.mxu0 %v8850_v22  ;;  %5343 = vmatprep.subr.bf16.mxu1 %v8855_v45  ;;  %v8939_v22 = vld [vmem:[%s11846_s4 + $0xa24] ss:$16 sps:$4 sm:$0xff]   ;;  %v8942_v45 = vld [vmem:[%s11846_s4 + $0x82c] ss:$16 sps:$4 sm:$0xff]  }
 0x316   : > { %6183 = vmatprep.subr.bf16.mxu0 %v8858_v39  ;;  %v8937_v39 = vld [vmem:[%s11846_s4 + $0xa20] ss:$16 sps:$4 sm:$0xff]  }
 0x318   : > { %5344 = vmatpush2.bf16.msra.mxu1 %v8853_v29  ;;  %v8940_v29 = vld [vmem:[%s11846_s4 + $0x828] ss:$16 sps:$4 sm:$0xff]  }
 0x319   : > { %6184 = vmatpush2.bf16.msra.mxu0 %v8856_v43  ;;  %5345 = vmatprep.subr.bf16.mxu1 %v8861_v47  ;;  %v8945_v43 = vld [vmem:[%s11846_s4 + $0xa04] ss:$16 sps:$4 sm:$0xff]   ;;  %v8948_v47 = vld [vmem:[%s11846_s4 + $0x80c] ss:$16 sps:$4 sm:$0xff]  }
 0x31a   : > { %6185 = vmatprep.subr.bf16.mxu0 %v8864_v51  ;;  %v8943_v51 = vld [vmem:[%s11846_s4 + $0xa00] ss:$16 sps:$4 sm:$0xff]  }
 0x31c   : > { %5346 = vmatpush2.bf16.msra.mxu1 %v8859_v54  ;;  %v8946_v54 = vld [vmem:[%s11846_s4 + $0x808] ss:$16 sps:$4 sm:$0xff]  }
 0x31d   : > { %6186 = vmatpush2.bf16.msra.mxu0 %v8862_v5  ;;  %5347 = vmatprep.subr.bf16.mxu1 %v8867_v38  ;;  %v8951_v5 = vld [vmem:[%s11846_s4 + $0xbe4] ss:$16 sps:$4 sm:$0xff]   ;;  %v8954_v38 = vld [vmem:[%s11846_s4 + $0x9ec] ss:$16 sps:$4 sm:$0xff]  }
 0x31e   : > { %6187 = vmatprep.subr.bf16.mxu0 %v8870_v55  ;;  %v8949_v55 = vld [vmem:[%s11846_s4 + $0xbe0] ss:$16 sps:$4 sm:$0xff]  }
 0x320   : > { %5348 = vmatpush2.bf16.msra.mxu1 %v8865_v56  ;;  %v8952_v56 = vld [vmem:[%s11846_s4 + $0x9e8] ss:$16 sps:$4 sm:$0xff]  }
 0x321   : > { %6188 = vmatpush2.bf16.msra.mxu0 %v8868_v0  ;;  %5349 = vmatprep.subr.bf16.mxu1 %v8873_v3  ;;  %v8957_v0 = vld [vmem:[%s11846_s4 + $0xbc4] ss:$16 sps:$4 sm:$0xff]   ;;  %v8960_v3 = vld [vmem:[%s11846_s4 + $0x9cc] ss:$16 sps:$4 sm:$0xff]  }
 0x322   : > { %6189 = vmatprep.subr.bf16.mxu0 %v8876_v34  ;;  %v8955_v34 = vld [vmem:[%s11846_s4 + $0xbc0] ss:$16 sps:$4 sm:$0xff]  }
 0x324   : > { %5350 = vmatpush2.bf16.msra.mxu1 %v8871_v12  ;;  %v8958_v12 = vld [vmem:[%s11846_s4 + $0x9c8] ss:$16 sps:$4 sm:$0xff]  }
 0x325   : > { %6190 = vmatpush2.bf16.msra.mxu0 %v8874_v18  ;;  %5351 = vmatprep.subr.bf16.mxu1 %v8879_v24  ;;  %v8963_v18 = vld [vmem:[%s11846_s4 + $0xba4] ss:$16 sps:$4 sm:$0xff]   ;;  %v8966_v24 = vld [vmem:[%s11846_s4 + $0x9ac] ss:$16 sps:$4 sm:$0xff]  }
 0x326   : > { %6191 = vmatprep.subr.bf16.mxu0 %v8882_v25  ;;  %v8961_v25 = vld [vmem:[%s11846_s4 + $0xba0] ss:$16 sps:$4 sm:$0xff]  }
 0x328   : > { %5352 = vmatpush2.bf16.msra.mxu1 %v8877_v48  ;;  %v8964_v48 = vld [vmem:[%s11846_s4 + $0x9a8] ss:$16 sps:$4 sm:$0xff]  }
 0x329   : > { %6192 = vmatpush2.bf16.msra.mxu0 %v8880_v63  ;;  %5353 = vmatprep.subr.bf16.mxu1 %v8885_v42  ;;  %v8969_v63 = vld [vmem:[%s11846_s4 + $0xb84] ss:$16 sps:$4 sm:$0xff]   ;;  %v8972_v42 = vld [vmem:[%s11846_s4 + $0x98c] ss:$16 sps:$4 sm:$0xff]  }
 0x32a   : > { %6193 = vmatprep.subr.bf16.mxu0 %v8888_v59  ;;  %v8967_v59 = vld [vmem:[%s11846_s4 + $0xb80] ss:$16 sps:$4 sm:$0xff]  }
 0x32c   : > { %5354 = vmatpush2.bf16.msra.mxu1 %v8883_v53  ;;  %v8970_v53 = vld [vmem:[%s11846_s4 + $0x988] ss:$16 sps:$4 sm:$0xff]  }
 0x32d   : > { %6194 = vmatpush2.bf16.msra.mxu0 %v8886_v57  ;;  %5355 = vmatprep.subr.bf16.mxu1 %v8891_v31  ;;  %v8975_v57 = vld [vmem:[%s11846_s4 + $0xb64] ss:$16 sps:$4 sm:$0xff]   ;;  %v8978_v31 = vld [vmem:[%s11846_s4 + $0x96c] ss:$16 sps:$4 sm:$0xff]  }
 0x32e   : > { %6195 = vmatprep.subr.bf16.mxu0 %v8894_v36  ;;  %v11595_v36 = vpop.f32.mrf.mxu0 }
 0x330   : > { %5356 = vmatpush2.bf16.msra.mxu1 %v8889_v37  ;;  %v8973_v37 = vld [vmem:[%s11846_s4 + $0xb60] ss:$16 sps:$4 sm:$0xff]  }
 0x331   : > { %6196 = vmatpush2.bf16.msra.mxu0 %v8892_v9  ;;  %5357 = vmatprep.subr.bf16.mxu1 %v8897_v11  ;;  %v8976_v9 = vld [vmem:[%s11846_s4 + $0x968] ss:$16 sps:$4 sm:$0xff]   ;;  %v8981_v11 = vld [vmem:[%s11846_s4 + $0xb44] ss:$16 sps:$4 sm:$0xff]  }
 0x332   : > { %6197 = vmatprep.subr.bf16.mxu0 %v8900_v44  ;;  %v8984_v44 = vld [vmem:[%s11846_s4 + $0x94c] ss:$16 sps:$4 sm:$0xff]  }
 0x334   : > { %5358 = vmatpush2.bf16.msra.mxu1 %v8895_v15  ;;  %v11609_v15 = vpop.f32.mrf.mxu0 }
 0x335   : > { %6198 = vmatpush2.bf16.msra.mxu0 %v8898_v19  ;;  %6210 = vmatprep.subr.bf16.mxu1 %v8903_v58  ;;  %v8979_v19 = vld [vmem:[%s11846_s4 + $0xb40] ss:$16 sps:$4 sm:$0xff]  }
 0x336   : > { %6253 = vmatprep.subr.bf16.mxu0 %v8906_v13  ;;  %v8982_v13 = vld [vmem:[%s11846_s4 + $0x948] ss:$16 sps:$4 sm:$0xff]  }
 0x337   : > { %5360 = vmatmul.mubr.bf16.vlgmr.msra.gmra.mxu1 %v10826_v14  ;;  %v8915_v14 = vld [vmem:[%s11846_s4 + $0xaa4] ss:$16 sps:$4 sm:$0xff]   ;;  %v11614_v58 = vpop.f32.mrf.mxu1 }
 0x338   : > { %6200 = vmatmul.mubr.bf16.vlgmr.msra.gmra.mxu0 %v10715_v20  ;;  %6211 = vmatpush1.bf16.msra.mxu1 %v8901_v21  ;;  %v8987_v21 = vld [vmem:[%s11846_s4 + $0xb24] ss:$16 sps:$4 sm:$0xff]  }
 0x339   : > { %6242 = vmatprep.mubr.bf16.mxu1 %v10857_v40  ;;  %6254 = vmatpush1.bf16.msra.mxu0 %v8904_v7  ;;  %v8990_v7 = vld [vmem:[%s11846_s4 + $0x92c] ss:$16 sps:$4 sm:$0xff]  }
 0x33a   : > { %6285 = vmatprep.mubr.bf16.mxu0 %v10712_v33  ;;  %6212 = vmatprep.subr.bf16.mxu1 %v8909_v50  ;;  %v8921_v33 = vld [vmem:[%s11846_s4 + $0xa84] ss:$16 sps:$4 sm:$0xff]   ;;  %v11625_v50 = vpop.f32.mrf.mxu0 }
 0x33b   : > { %6255 = vmatprep.subr.bf16.mxu0 %v8912_v52  ;;  %v8985_v52 = vld [vmem:[%s11846_s4 + $0xb20] ss:$16 sps:$4 sm:$0xff]  }
 0x33c   : > { %6213 = vmatpush1.bf16.msra.mxu1 %v8907_v8  ;;  %v11630_v8 = vpop.f32.mrf.mxu1 }
 0x33d   : > { %6256 = vmatpush1.bf16.msra.mxu0 %v8910_v26  ;;  %6214 = vmatprep.subr.bf16.mxu1 %v8915_v14  ;;  %v8988_v26 = vld [vmem:[%s11846_s4 + $0x928] ss:$16 sps:$4 sm:$0xff]   ;;  %v8993_v14 = vld [vmem:[%s11846_s4 + $0xb04] ss:$16 sps:$4 sm:$0xff]  }
 0x33e   : > { %6257 = vmatprep.subr.bf16.mxu0 %v8918_v46  ;;  %v8996_v46 = vld [vmem:[%s11846_s4 + $0x90c] ss:$16 sps:$4 sm:$0xff]  }
 0x340   : > { %6215 = vmatpush1.bf16.msra.mxu1 %v8913_v28  ;;  %v11641_v28 = vpop.f32.mrf.mxu0 }
 0x341   : > { %6258 = vmatpush1.bf16.msra.mxu0 %v8916_v61  ;;  %6216 = vmatprep.subr.bf16.mxu1 %v8921_v33  ;;  %v8991_v61 = vld [vmem:[%s11846_s4 + $0xb00] ss:$16 sps:$4 sm:$0xff]  }
 0x342   : > { %6259 = vmatprep.subr.bf16.mxu0 %v8924_v4  ;;  %v4502_v33 = vpop.f32.mrf.mxu0  ;;  %v11646_v4 = vpop.f32.mrf.mxu1 }
 0x344   : > { %6217 = vmatpush1.bf16.msra.mxu1 %v8919_v27  ;;  %v8994_v27 = vld [vmem:[%s11846_s4 + $0x908] ss:$16 sps:$4 sm:$0xff]  }
 0x345   : > { %6260 = vmatpush1.bf16.msra.mxu0 %v8922_v1  ;;  %6218 = vmatprep.subr.bf16.mxu1 %v8927_v30  ;;  %v8999_v1 = vld [vmem:[%s11846_s4 + $0xaec] ss:$16 sps:$4 sm:$0xff]   ;;  %v8997_v30 = vld [vmem:[%s11846_s4 + $0xae8] ss:$16 sps:$4 sm:$0xff]  }
 0x346   : > { %6261 = vmatprep.subr.bf16.mxu0 %v8930_v49  ;;  %v4504_v49 = vpop.f32.mrf.mxu0 }
 0x348   : > { %6219 = vmatpush1.bf16.msra.mxu1 %v8925_v6  ;;  %v11657_v6 = vpop.f32.mrf.mxu1 }
 0x349   : > { %6262 = vmatpush1.bf16.msra.mxu0 %v8928_v10  ;;  %6220 = vmatprep.subr.bf16.mxu1 %v8933_v60  ;;  %v9002_v10 = vld [vmem:[%s11846_s4 + $0xacc] ss:$16 sps:$4 sm:$0xff]  }
 0x34a   : > { %6263 = vmatprep.subr.bf16.mxu0 %v8936_v16 }
 0x34c   : > { %6221 = vmatpush1.bf16.msra.mxu1 %v8931_v2  ;;  %v9000_v2 = vld [vmem:[%s11846_s4 + $0xac8] ss:$16 sps:$4 sm:$0xff]  }
 0x34d   : > { %6264 = vmatpush1.bf16.msra.mxu0 %v8934_v32  ;;  %6222 = vmatprep.subr.bf16.mxu1 %v8939_v22  ;;  %v4506_v32 = vpop.f32.mrf.mxu0 }
 0x34e   : > { %6265 = vmatprep.subr.bf16.mxu0 %v8942_v45  ;;  %v9005_v45 = vld [vmem:[%s11846_s4 + $0xaac] ss:$16 sps:$4 sm:$0xff]  }
 0x350   : > { %6223 = vmatpush1.bf16.msra.mxu1 %v8937_v39 }
 0x351   : > { %6266 = vmatpush1.bf16.msra.mxu0 %v8940_v29  ;;  %6224 = vmatprep.subr.bf16.mxu1 %v8945_v43 }
 0x352   : > { %6267 = vmatprep.subr.bf16.mxu0 %v8948_v47  ;;  %v4508_v47 = vpop.f32.mrf.mxu0 }
 0x354   : > { %6225 = vmatpush1.bf16.msra.mxu1 %v8943_v51 }
 0x355   : > { %6268 = vmatpush1.bf16.msra.mxu0 %v8946_v54  ;;  %6226 = vmatprep.subr.bf16.mxu1 %v8951_v5  ;;  %v9006_v5 = vld [vmem:[%s11846_s4 + $0xa88] ss:$16 sps:$4 sm:$0xff]  }
 0x356   : > { %6269 = vmatprep.subr.bf16.mxu0 %v8954_v38  ;;  %v9011_v38 = vld [vmem:[%s11846_s4 + $0xa6c] ss:$16 sps:$4 sm:$0xff]  }
 0x358   : > { %6227 = vmatpush2.bf16.msra.mxu1 %v8949_v55  ;;  %v9009_v55 = vld [vmem:[%s11846_s4 + $0xa68] ss:$16 sps:$4 sm:$0xff]  }
 0x359   : > { %6270 = vmatpush2.bf16.msra.mxu0 %v8952_v56  ;;  %6228 = vmatprep.subr.bf16.mxu1 %v8957_v0  ;;  %v9014_v56 = vld [vmem:[%s11846_s4 + $0xa4c] ss:$16 sps:$4 sm:$0xff]   ;;  %v9012_v0 = vld [vmem:[%s11846_s4 + $0xa48] ss:$16 sps:$4 sm:$0xff]  }
 0x35a   : > { %6271 = vmatprep.subr.bf16.mxu0 %v8960_v3  ;;  %v9017_v3 = vld [vmem:[%s11846_s4 + $0xa2c] ss:$16 sps:$4 sm:$0xff]  }
 0x35c   : > { %6229 = vmatpush2.bf16.msra.mxu1 %v8955_v34  ;;  %v9015_v34 = vld [vmem:[%s11846_s4 + $0xa28] ss:$16 sps:$4 sm:$0xff]  }
 0x35d   : > { %6272 = vmatpush2.bf16.msra.mxu0 %v8958_v12  ;;  %6230 = vmatprep.subr.bf16.mxu1 %v8963_v18  ;;  %v9020_v12 = vld [vmem:[%s11846_s4 + $0xa0c] ss:$16 sps:$4 sm:$0xff]   ;;  %v9018_v18 = vld [vmem:[%s11846_s4 + $0xa08] ss:$16 sps:$4 sm:$0xff]  }
 0x35e   : > { %6273 = vmatprep.subr.bf16.mxu0 %v8966_v24  ;;  %v9023_v24 = vld [vmem:[%s11846_s4 + $0xbec] ss:$16 sps:$4 sm:$0xff]  }
 0x360   : > { %6231 = vmatpush2.bf16.msra.mxu1 %v8961_v25  ;;  %v9021_v25 = vld [vmem:[%s11846_s4 + $0xbe8] ss:$16 sps:$4 sm:$0xff]  }
 0x361   : > { %6274 = vmatpush2.bf16.msra.mxu0 %v8964_v48  ;;  %6232 = vmatprep.subr.bf16.mxu1 %v8969_v63  ;;  %v9026_v48 = vld [vmem:[%s11846_s4 + $0xbcc] ss:$16 sps:$4 sm:$0xff]   ;;  %v9024_v63 = vld [vmem:[%s11846_s4 + $0xbc8] ss:$16 sps:$4 sm:$0xff]  }
 0x362   : > { %6275 = vmatprep.subr.bf16.mxu0 %v8972_v42  ;;  %v9029_v42 = vld [vmem:[%s11846_s4 + $0xbac] ss:$16 sps:$4 sm:$0xff]  }
 0x364   : > { %6233 = vmatpush2.bf16.msra.mxu1 %v8967_v59  ;;  %v9027_v59 = vld [vmem:[%s11846_s4 + $0xba8] ss:$16 sps:$4 sm:$0xff]  }
 0x365   : > { %6276 = vmatpush2.bf16.msra.mxu0 %v8970_v53  ;;  %6234 = vmatprep.subr.bf16.mxu1 %v8975_v57  ;;  %v9032_v53 = vld [vmem:[%s11846_s4 + $0xb8c] ss:$16 sps:$4 sm:$0xff]   ;;  %v9030_v57 = vld [vmem:[%s11846_s4 + $0xb88] ss:$16 sps:$4 sm:$0xff]  }
 0x366   : > { %6277 = vmatprep.subr.bf16.mxu0 %v8978_v31  ;;  %v9035_v31 = vld [vmem:[%s11846_s4 + $0xb6c] ss:$16 sps:$4 sm:$0xff]  }
 0x368   : > { %6235 = vmatpush2.bf16.msra.mxu1 %v8973_v37  ;;  %v9033_v37 = vld [vmem:[%s11846_s4 + $0xb68] ss:$16 sps:$4 sm:$0xff]  }
 0x369   : > { %6278 = vmatpush2.bf16.msra.mxu0 %v8976_v9  ;;  %6236 = vmatprep.subr.bf16.mxu1 %v8981_v11  ;;  %v9038_v9 = vld [vmem:[%s11846_s4 + $0xb4c] ss:$16 sps:$4 sm:$0xff]   ;;  %v9036_v11 = vld [vmem:[%s11846_s4 + $0xb48] ss:$16 sps:$4 sm:$0xff]  }
 0x36a   : > { %6279 = vmatprep.subr.bf16.mxu0 %v8984_v44  ;;  %v9041_v44 = vld [vmem:[%s11846_s4 + $0xb2c] ss:$16 sps:$4 sm:$0xff]  }
 0x36c   : > { %6237 = vmatpush2.bf16.msra.mxu1 %v8979_v19 }
 0x36d   : > { %6280 = vmatpush2.bf16.msra.mxu0 %v8982_v13  ;;  %6238 = vmatprep.subr.bf16.mxu1 %v8987_v21  ;;  %v9039_v13 = vld [vmem:[%s11846_s4 + $0xb28] ss:$16 sps:$4 sm:$0xff]   ;;  %v9044_v21 = vld [vmem:[%s11846_s4 + $0xb0c] ss:$16 sps:$4 sm:$0xff]  }
 0x36e   : > { %6281 = vmatprep.subr.bf16.mxu0 %v8990_v7 }
 0x370   : > { %6239 = vmatpush2.bf16.msra.mxu1 %v8985_v52  ;;  %v9042_v52 = vld [vmem:[%s11846_s4 + $0xb08] ss:$16 sps:$4 sm:$0xff]  }
 0x371   : > { %6282 = vmatpush2.bf16.msra.mxu0 %v8988_v26  ;;  %6240 = vmatprep.subr.bf16.mxu1 %v8993_v14 }
 0x372   : > { %6283 = vmatprep.subr.bf16.mxu0 %v8996_v46 }
 0x374   : > { %6241 = vmatpush2.bf16.msra.mxu1 %v8991_v61 }
 0x375   : > { %6284 = vmatpush2.bf16.msra.mxu0 %v8994_v27  ;;  %6296 = vmatprep.subr.bf16.mxu1 %v8999_v1 }
 0x377   : > { %v4545_v60 = vpop.f32.mrf.mxu1  ;;  %6243 = vmatmul.mubr.bf16.vlgmr.msra.gmra.mxu1 %v10860_v41  ;;  %v5232_v19 = vpop.f32.mrf.mxu0 }
 0x378   : > { %v11663_v16 = vadd.f32 %v4545_v60, %v4502_v33  ;;  %6286 = vmatmul.mubr.bf16.vlgmr.msra.gmra.mxu0 %v10715_v20  ;;  %6297 = vmatpush1.bf16.msra.mxu1 %v8997_v30  ;;  %v9003_v20 = vld [vmem:[%s11846_s4 + $0xaa8] ss:$16 sps:$4 sm:$0xff]  }
 0x379   : > { %6328 = vmatprep.mubr.bf16.mxu1 %v10857_v40  ;;  %v4547_v22 = vpop.f32.mrf.mxu1  ;;  %6298 = vmatprep.subr.bf16.mxu1 %v9002_v10  ;;  %v9008_v40 = vld [vmem:[%s11846_s4 + $0xa8c] ss:$16 sps:$4 sm:$0xff]   ;;  %v5234_v7 = vpop.f32.mrf.mxu0 }
 0x37a   : > { %v11673_v39 = vadd.f32 %v4547_v22, %v4504_v49 }
 0x37b   : > { %v4549_v29 = vpop.f32.mrf.mxu1  ;;  %v5236_v26 = vpop.f32.mrf.mxu0 }
 0x37c   : > { %v11675_v43 = vadd.f32 %v4549_v29, %v4506_v32  ;;  %6299 = vmatpush1.bf16.msra.mxu1 %v9000_v2 }
 0x37d   : > { %v4551_v51 = vpop.f32.mrf.mxu1  ;;  %6300 = vmatprep.subr.bf16.mxu1 %v9005_v45  ;;  %v5238_v14 = vpop.f32.mrf.mxu0 }
 0x37e   : > { %v11683_v54 = vadd.f32 %v4551_v51, %v4508_v47 }
 0x380   : > { %6301 = vmatpush1.bf16.msra.mxu1 %v9003_v20 }
 0x381   : > { %6302 = vmatprep.subr.bf16.mxu1 %v9008_v40  ;;  %v6407_v40 = vld [vmem:[%s9245_s10] sm:$0xff] }
 0x384   : > { %6303 = vmatpush1.bf16.msra.mxu1 %v9006_v5  ;;  %v4460_v5 = vadd.f32 %v11614_v58, %v11595_v36 }
 0x385   : > { %6304 = vmatprep.subr.bf16.mxu1 %v9011_v38  ;;  %v4462_v38 = vadd.f32 %v11630_v8, %v11609_v15  ;;  %v11792_v15 = vld [vmem:[%s11848_s6] sm:$0xf] }
 0x387   : > { %v5235_v36 = vadd.f32 %v5234_v7, %v4462_v38 }
 0x388   : > { %6305 = vmatpush1.bf16.msra.mxu1 %v9009_v55  ;;  %v4464_v55 = vadd.f32 %v11646_v4, %v11625_v50  ;;  %v6414_v50 = vunpack.c.h.bf16 %v6407_v40 }
 0x389   : > { %6306 = vmatprep.subr.bf16.mxu1 %v9014_v56 }
 0x38a   : > { %v5237_v58 = vadd.f32 %v5236_v26, %v4464_v55 }
 0x38c   : > { %6307 = vmatpush1.bf16.msra.mxu1 %v9012_v0  ;;  %v11784_v0 = vld [vmem:[%s11847_s5] sm:$0xf] }
 0x38d   : > { %6308 = vmatprep.subr.bf16.mxu1 %v9017_v3  ;;  %v6413_v3 = vunpack.c.l.bf16 %v6407_v40 }
 0x390   : > { %6309 = vmatpush1.bf16.msra.mxu1 %v9015_v34 }
 0x391   : > { %6310 = vmatprep.subr.bf16.mxu1 %v9020_v12  ;;  %v4466_v12 = vadd.f32 %v11657_v6, %v11641_v28  ;;  %v6438_v6 = vrot.slane %v6413_v3, 1 }
 0x393   : > { %v5239_v4 = vadd.f32 %v5238_v14, %v4466_v12 }
 0x394   : > { %6311 = vmatpush1.bf16.msra.mxu1 %v9018_v18  ;;  %v5233_v18 = vadd.f32 %v5232_v19, %v4460_v5 }
 0x395   : > { %6312 = vmatprep.subr.bf16.mxu1 %v9023_v24  ;;  %v6411_v24 = vld [vmem:[%s9245_s10 + $0x20] sm:$0x11] }
 0x398   : > { %6313 = vmatpush2.bf16.msra.mxu1 %v9021_v25 }
 0x399   : > { %6314 = vmatprep.subr.bf16.mxu1 %v9026_v48 }
 0x39c   : > { %6315 = vmatpush2.bf16.msra.mxu1 %v9024_v63 }
 0x39d   : > { %6316 = vmatprep.subr.bf16.mxu1 %v9029_v42  ;;  %v6352_v42 = vrot.slane %v11784_v0, %v10652_v35 }
 0x3a0   : > { %6317 = vmatpush2.bf16.msra.mxu1 %v9027_v59 }
 0x3a1   : > { %6318 = vmatprep.subr.bf16.mxu1 %v9032_v53 }
 0x3a4   : > { %6319 = vmatpush2.bf16.msra.mxu1 %v9030_v57 }
 0x3a5   : > { %6320 = vmatprep.subr.bf16.mxu1 %v9035_v31  ;;  %v6421_v31 = vunpack.c.l.bf16 %v6411_v24 }
 0x3a8   : > { %6321 = vmatpush2.bf16.msra.mxu1 %v9033_v37 }
 0x3a9   : > { %6322 = vmatprep.subr.bf16.mxu1 %v9038_v9  ;;  %v6382_v9 = vrot.slane %v11792_v15, %v10652_v35 }
 0x3ac   : > { %6323 = vmatpush2.bf16.msra.mxu1 %v9036_v11 }
 0x3ad   : > { %6324 = vmatprep.subr.bf16.mxu1 %v9041_v44  ;;  %v6356_v44 = vrot.slane %v11784_v0, %v10663_v17 }
 0x3b0   : > { %6325 = vmatpush2.bf16.msra.mxu1 %v9039_v13  ;;  %v6441_v13 = vrot.slane %v6414_v50, 1 }
 0x3b1   : > { %6326 = vmatprep.subr.bf16.mxu1 %v9044_v21 }
 0x3b4   : > { %6327 = vmatpush2.bf16.msra.mxu1 %v9042_v52  ;;  %v6422_v52 = vunpack.c.h.bf16 %v6411_v24 }
 0x3b7   : > { %6329 = vmatmul.mubr.bf16.vlgmr.msra.gmra.mxu1 %v10860_v41  ;;  %v5275_v60 = vpop.f32.mrf.mxu1 }
 0x3b8   : > { %v5318_v46 = vpop.f32.mrf.mxu0  ;;  %v5276_v48 = vadd.f32 %v5275_v60, %v5233_v18 }
 0x3b9   : > { %v5319_v61 = vadd.f32 %v5318_v46, %v11663_v16  ;;  %v5277_v2 = vpop.f32.mrf.mxu1  ;;  %v6386_v46 = vrot.slane %v11792_v15, %v10663_v17 }
 0x3ba   : > { %v5320_v33 = vpop.f32.mrf.mxu0  ;;  %v5278_v59 = vadd.f32 %v5277_v2, %v5235_v36  ;;  %v6408_v36 = vld [vmem:[%s9245_s10 + $0x8] sm:$0xff] }
 0x3bb   : > { %v5321_v27 = vadd.f32 %v5320_v33, %v11673_v39  ;;  %v5279_v32 = vpop.f32.mrf.mxu1  ;;  %v6415_v50 = vunpack.c.l.bf16 %v6408_v36 }
 0x3bc   : > { %v5322_v1 = vpop.f32.mrf.mxu0  ;;  %v5280_v19 = vadd.f32 %v5279_v32, %v5237_v58  ;;  %v6410_v58 = vld [vmem:[%s9245_s10 + $0x18] sm:$0xff] }
 0x3bd   : > { %v5323_v30 = vadd.f32 %v5322_v1, %v11675_v43  ;;  %v5281_v22 = vpop.f32.mrf.mxu1  ;;  %v6450_v1 = vrot.slane %v6421_v31, 1 }
 0x3be   : > { %v5324_v49 = vpop.f32.mrf.mxu0  ;;  %v5282_v33 = vadd.f32 %v5281_v22, %v5239_v4  ;;  %v6412_v4 = vld [vmem:[%s9245_s10 + $0x28] sm:$0x11] }
 0x3bf   : > { %v5325_v10 = vadd.f32 %v5324_v49, %v11683_v54  ;;  %v6409_v54 = vld [vmem:[%s9245_s10 + $0x10] sm:$0xff] }
 0x3c0   : > { %v6417_v34 = vunpack.c.l.bf16 %v6409_v54  ;;  %v6418_v8 = vunpack.c.h.bf16 %v6409_v54 }
 0x3c2   : > { %v6439_v53 = vrot.slane %v6417_v34, 1  ;;  %v6442_v21 = vrot.slane %v6418_v8, 1  ;;  %v6419_v8 = vunpack.c.l.bf16 %v6410_v58 }
 0x3c4   : > { %v6440_v35 = vsel %vm2391_vm1, %v6438_v6, %v6439_v53  ;;  %v6443_v32 = vsel %vm2391_vm1, %v6441_v13, %v6442_v21  ;;  %v6451_v17 = vsel %vm2391_vm1, %v6439_v53, %v6450_v1  ;;  %v6444_v53 = vrot.slane %v6415_v50, 1 }
 0x3f7   : > { %v5361_v45 = vpop.f32.mrf.mxu1 }
 0x3f8   : > { %v11765_v41 = vadd.f32 %v5361_v45, %v5319_v61  ;;  %v6201_v51 = vpop.f32.mrf.mxu0  ;;  %v6452_v45 = vrot.slane %v6422_v52, 1  ;;  %v6424_v52 = vunpack.c.h.bf16 %v6412_v4 }
 0x3f9   : > { %v5363_v29 = vpop.f32.mrf.mxu1 }
 0x3fa   : > { %v11767_v16 = vadd.f32 %v5363_v29, %v5321_v27  ;;  %v6203_v56 = vpop.f32.mrf.mxu0  ;;  %v6453_v38 = vsel %vm2391_vm1, %v6442_v21, %v6452_v45 }
 0x3fb   : > { %v5365_v20 = vpop.f32.mrf.mxu1 }
 0x3fc   : > { %v11769_v39 = vadd.f32 %v5365_v20, %v5323_v30  ;;  %v6205_v28 = vpop.f32.mrf.mxu0 }
 0x3fd   : > { %v5367_v43 = vpop.f32.mrf.mxu1 }
 0x3fe   : > { %v11771_v47 = vadd.f32 %v5367_v43, %v5325_v10  ;;  %v6207_v27 = vpop.f32.mrf.mxu0 }
 0x437   : > { %v6244_v25 = vpop.f32.mrf.mxu1 }
 0x438   : > { %v6245_v63 = vadd.f32 %v6244_v25, %v6201_v51  ;;  %v6287_v24 = vpop.f32.mrf.mxu0 }
 0x439   : > { %v6246_v57 = vpop.f32.mrf.mxu1 }
 0x43a   : > { %v6339_v37 = vadd.f32 %v6245_v63, %v5276_v48  ;;  %v6247_v11 = vadd.f32 %v6246_v57, %v6203_v56  ;;  %v6289_v25 = vpop.f32.mrf.mxu0  ;;  %v6416_v63 = vunpack.c.h.bf16 %v6408_v36  ;;  %v6445_v57 = vrot.slane %v6419_v8, 1 }
 0x43b   : > { %v6248_v7 = vpop.f32.mrf.mxu1 }
 0x43c   : > { %v6369_v26 = vmul.f32 %v6352_v42, %v6339_v37  ;;  %v6340_v14 = vadd.f32 %v6247_v11, %v5278_v59  ;;  %v6249_v61 = vadd.f32 %v6248_v7, %v6205_v28  ;;  %v6360_v28 = vrot.slane %v11784_v0, %v10756_v62  ;;  %v6291_v6 = vpop.f32.mrf.mxu0 }
 0x43d   : > { %v6250_v30 = vpop.f32.mrf.mxu1  ;;  %v6423_v37 = vunpack.c.l.bf16 %v6412_v4  ;;  %v6390_v11 = vrot.slane %v11792_v15, %v10756_v62  ;;  %v6447_v13 = vrot.slane %v6416_v63, 1 }
 0x43e   : > { %v6399_v49 = vadd.f32 %v6382_v9, %v6369_v26  ;;  %v6370_v10 = vmul.f32 %v6356_v44, %v6340_v14  ;;  %v6343_v60 = vadd.f32 %v6249_v61, %v5280_v19  ;;  %v6251_v2 = vadd.f32 %v6250_v30, %v6207_v27 }
 0x43f   : > { %v6364_v19 = vrot.slane %v11784_v0, %v10759_v23  ;;  %v6454_v27 = vrot.slane %v6423_v37, 1 }
 0x440   : > { %v6466_v29 = vadd.f32 %v6440_v35, %v6399_v49  ;;  %v6400_v20 = vadd.f32 %v6386_v46, %v6370_v10  ;;  %v6373_v43 = vmul.f32 %v6352_v42, %v6343_v60  ;;  %v6344_v51 = vadd.f32 %v6251_v2, %v5282_v33  ;;  %v6293_v33 = vpop.f32.mrf.mxu0 }
 0x441   : > { %v6420_v42 = vunpack.c.h.bf16 %v6410_v58  ;;  %v6456_v10 = vrot.slane %v6424_v52, 1  ;;  %v6455_v2 = vsel %vm2391_vm1, %v6445_v57, %v6454_v27 }
 0x442   : > { %v6474_v22 = vmax.f32 %v6466_v29, 0.0  ;;  %v6467_v40 = vadd.f32 %v6443_v32, %v6400_v20  ;;  %v6403_v54 = vadd.f32 %v6382_v9, %v6373_v43  ;;  %v6374_v5 = vmul.f32 %v6356_v44, %v6344_v51 }
 0x443   : > { %v6448_v21 = vrot.slane %v6420_v42, 1 }
 0x444   : > { %6482 = vst [vmem:[%s11808_s9] sm:$0xff] %v6474_v22  ;;  %v6475_v55 = vmax.f32 %v6467_v40, 0.0  ;;  %v6470_v56 = vadd.f32 %v6451_v17, %v6403_v54  ;;  %v6404_v3 = vadd.f32 %v6386_v46, %v6374_v5  ;;  %v6394_v46 = vrot.slane %v11792_v15, %v10759_v23 }
 0x445   : > { %v6449_v49 = vsel %vm2391_vm1, %v6447_v13, %v6448_v21 }
 0x446   : > { %6483 = vst [vmem:[%s11808_s9 + $0x8] sm:$0xff] %v6475_v55  ;;  %v6478_v34 = vmax.f32 %v6470_v56, 0.0  ;;  %v6471_v12 = vadd.f32 %v6453_v38, %v6404_v3 }
 0x448   : > { %6486 = vst [vmem:[%s11808_s9 + $0x20] sm:$0xff] %v6478_v34  ;;  %v6479_v18 = vmax.f32 %v6471_v12, 0.0 }
 0x44a   : > { %6487 = vst [vmem:[%s11808_s9 + $0x28] sm:$0xff] %v6479_v18 }
 0x477   : > { %v6330_v48 = vpop.f32.mrf.mxu1 }
 0x478   : > { %v6331_v59 = vadd.f32 %v6330_v48, %v6287_v24 }
 0x479   : > { %v6332_v31 = vpop.f32.mrf.mxu1 }
 0x47a   : > { %v6341_v9 = vadd.f32 %v6331_v59, %v11765_v41  ;;  %v6333_v44 = vadd.f32 %v6332_v31, %v6289_v25  ;;  %v6446_v41 = vsel %vm2391_vm1, %v6444_v53, %v6445_v57 }
 0x47b   : > { %v6334_v7 = vpop.f32.mrf.mxu1 }
 0x47c   : > { %v6371_v26 = vmul.f32 %v6360_v28, %v6341_v9  ;;  %v6342_v14 = vadd.f32 %v6333_v44, %v11767_v16  ;;  %v6335_v61 = vadd.f32 %v6334_v7, %v6291_v6 }
 0x47d   : > { %v6336_v62 = vpop.f32.mrf.mxu1 }
 0x47e   : > { %v6401_v35 = vadd.f32 %v6390_v11, %v6371_v26  ;;  %v6372_v1 = vmul.f32 %v6364_v19, %v6342_v14  ;;  %v6345_v0 = vadd.f32 %v6335_v61, %v11769_v39  ;;  %v6337_v30 = vadd.f32 %v6336_v62, %v6293_v33 }
 0x47f   : > { %v6457_v39 = vsel %vm2391_vm1, %v6448_v21, %v6456_v10 }
 0x480   : > { %v6468_v16 = vadd.f32 %v6446_v41, %v6401_v35  ;;  %v6402_v60 = vadd.f32 %v6394_v46, %v6372_v1  ;;  %v6375_v23 = vmul.f32 %v6360_v28, %v6345_v0  ;;  %v6346_v15 = vadd.f32 %v6337_v30, %v11771_v47 }
 0x482   : > { %v6476_v32 = vmax.f32 %v6468_v16, 0.0  ;;  %v6469_v45 = vadd.f32 %v6449_v49, %v6402_v60  ;;  %v6405_v29 = vadd.f32 %v6390_v11, %v6375_v23  ;;  %v6376_v20 = vmul.f32 %v6364_v19, %v6346_v15 }
 0x484   : > { %6484 = vst [vmem:[%s11808_s9 + $0x10] sm:$0xff] %v6476_v32  ;;  %v6477_v43 = vmax.f32 %v6469_v45, 0.0  ;;  %v6472_v51 = vadd.f32 %v6455_v2, %v6405_v29  ;;  %v6406_v17 = vadd.f32 %v6394_v46, %v6376_v20 }
 0x486   : > { %6485 = vst [vmem:[%s11808_s9 + $0x18] sm:$0xff] %v6477_v43  ;;  %v6480_v22 = vmax.f32 %v6472_v51, 0.0  ;;  %v6473_v40 = vadd.f32 %v6457_v39, %v6406_v17 }
 0x488   : > { %6488 = vst [vmem:[%s11808_s9 + $0x30] sm:$0xff] %v6480_v22  ;;  %v6481_v54 = vmax.f32 %v6473_v40, 0.0 }
 0x48a   : > { %6489 = vst [vmem:[%s11808_s9 + $0x38] sm:$0xff] %v6481_v54 }
 0x48b PF: > { %s17_s24 = sadd.s32 1, %s9053_s24  }
 0x48c   : > { %p14_p4 = scmp.ge.s32.totalorder %s17_s24, 4  }
 0x48e   :  { %16 = sbr.rel (!%p14_p4) target bundleno = 1 (0x1), region = 82 }

</bundles_post_ra>
